<compile_context>
chip_gen: v7x
topology: tpu7x:2x2x1
jax: 0.10.0
libtpu: 0.0.40
codegen_flags: <defaults>
</compile_context>

<pallas_src>
import jax
import jax.numpy as jnp
from jax.experimental import pallas as pl
from jax.experimental.pallas import tpu as pltpu

# ------------------------------- sizes --------------------------------------
BATCH = 2
V_COARSE = 431            # num coarse mesh vertices (module: self.num_vertices)
V_MID = 2 * V_COARSE      # 862
V_FINE = 2 * V_MID        # 1724
NUM_JOINTS = 14
NUM_HYPEREDGES = 64
HIDDEN = 64               # model_dim[1]
DTYPE = jnp.float32
WEIGHT_DTYPE = jnp.bfloat16   # heavy streamed weights; accumulation stays f32


# --------------------------- shared forward math -----------------------------
def _forward_math(x_t, p_t, w1bd, b1c, w2bd, b2c, u1_t, uf_t):
    """Transposed, batch-folded forward chain (used by kernel AND jnp reference).

    x_t   : (B*3, V)      f32   vertices, batch folded into rows, V on lanes
    p_t   : (V, V)        bf16  P^T (hypergraph propagation, transposed)
    w1bd  : (B*H, B*3)    f32   block_diag(W1^T) over batch
    b1c   : (B*H, 1)      f32   bias 1, lane-broadcast column
    w2bd  : (B*3, B*H)    f32   block_diag(W2^T) over batch
    b2c   : (B*3, 1)      f32
    u1_t  : (V, Vm)       bf16  U1^T
    uf_t  : (V, Vf)       bf16  (U2 @ U1)^T
    """
    f32 = jnp.float32
    # HGGCN layer 1:  relu(P X W1 + b1)  ->  relu(W1bd (X^T P^T) + b1)
    px = jnp.dot(x_t.astype(p_t.dtype), p_t, preferred_element_type=f32)   # (B3, V)
    h1 = jnp.dot(w1bd, px, preferred_element_type=f32) + b1c               # (BH, V)
    h1 = jnp.maximum(h1, 0.0)
    # HGGCN layer 2 + residual:  P h1 W2 + b2 + X
    ph = jnp.dot(h1.astype(p_t.dtype), p_t, preferred_element_type=f32)    # (BH, V)
    y = jnp.dot(w2bd, ph, preferred_element_type=f32) + b2c + x_t          # (B3, V)
    # upsampling: both levels depend only on y (U_fused pre-computed), lane-dense
    yb = y.astype(u1_t.dtype)
    mid = jnp.dot(yb, u1_t, preferred_element_type=f32)                    # (B3, Vm)
    fine = jnp.dot(yb, uf_t, preferred_element_type=f32)                   # (B3, Vf)
    return y, mid, fine


# ------------------------------- kernel --------------------------------------
def _hgcn_regressor_kernel(x_ref, p_ref, w1_ref, b1_ref, w2_ref, b2_ref,
                           u1_ref, uf_ref,
                           coarse_ref, mid_ref, fine_ref):
    """Whole (tiny) problem in a single un-gridded invocation; all refs in VMEM."""
    y, mid, fine = _forward_math(
        x_ref[...], p_ref[...], w1_ref[...], b1_ref[...],
        w2_ref[...], b2_ref[...], u1_ref[...], uf_ref[...])
    coarse_ref[...] = y.astype(coarse_ref.dtype)
    mid_ref[...] = mid.astype(mid_ref.dtype)
    fine_ref[...] = fine.astype(fine_ref.dtype)


# ------------------------- wrapper-side plumbing ------------------------------
def _block_diag(m, b):
    """(r, c) -> (b*r, b*c) block-diagonal replication (batch-major rows)."""
    r, c = m.shape
    eye = jnp.eye(b, dtype=m.dtype)
    return (eye[:, None, :, None] * m[None, :, None, :]).reshape(b * r, b * c)


def _preprocess(vertices_coord, prop_matrix, w1, b1, w2, b2, u1, u2):
    b, v, c = vertices_coord.shape
    # (B, V, 3) -> (B*3, V): batch folded into rows, V lane-dense.
    x_t = jnp.transpose(vertices_coord, (0, 2, 1)).reshape(b * c, v).astype(DTYPE)
    p_t = jnp.transpose(prop_matrix).astype(WEIGHT_DTYPE)
    w1bd = _block_diag(jnp.transpose(w1).astype(DTYPE), b)          # (B*H, B*3)
    w2bd = _block_diag(jnp.transpose(w2).astype(DTYPE), b)          # (B*3, B*H)
    b1c = jnp.tile(b1.reshape(-1), b).reshape(b * HIDDEN, 1).astype(DTYPE)
    b2c = jnp.tile(b2.reshape(-1), b).reshape(b * 3, 1).astype(DTYPE)
    u1_t = jnp.transpose(u1).astype(WEIGHT_DTYPE)                   # (V, Vm)
    uf_t = jnp.transpose(u2 @ u1).astype(WEIGHT_DTYPE)              # (V, Vf) fused
    return x_t, p_t, w1bd, b1c, w2bd, b2c, u1_t, uf_t


def _postprocess(coarse_t, mid_t, fine_t, b):
    to_bvc = lambda t: jnp.transpose(t.reshape(b, 3, t.shape[-1]), (0, 2, 1))
    return to_bvc(coarse_t), to_bvc(mid_t), to_bvc(fine_t)


def hgcn_mesh_regressor(vertices_coord, prop_matrix, w1, b1, w2, b2, u1, u2):
    b, v, c = vertices_coord.shape
    assert v == V_COARSE and c == 3
    args = _preprocess(vertices_coord, prop_matrix, w1, b1, w2, b2, u1, u2)

    # advisory cost hint (kernel is only a few microseconds)
    mm = lambda m, k, n: 2 * m * k * n
    flops = (mm(b * 3, v, v) + mm(b * HIDDEN, b * 3, v) + mm(b * HIDDEN, v, v)
             + mm(b * 3, b * HIDDEN, v) + mm(b * 3, v, V_MID) + mm(b * 3, v, V_FINE))
    bytes_in = sum(int(a.size) * jnp.dtype(a.dtype).itemsize for a in args)
    bytes_out = 4 * b * 3 * (V_COARSE + V_MID + V_FINE)

    coarse_t, mid_t, fine_t = pl.pallas_call(
        _hgcn_regressor_kernel,
        out_shape=(
            jax.ShapeDtypeStruct((b * 3, V_COARSE), DTYPE),
            jax.ShapeDtypeStruct((b * 3, V_MID), DTYPE),
            jax.ShapeDtypeStruct((b * 3, V_FINE), DTYPE),
        ),
        compiler_params=pltpu.CompilerParams(
            vmem_limit_bytes=32 << 20,   # fits v5e/v6e (128 MiB) and v7x (64 MiB)
        ),
        cost_estimate=pl.CostEstimate(
            flops=flops, transcendentals=0, bytes_accessed=bytes_in + bytes_out),
    )(*args)

    return _postprocess(coarse_t, mid_t, fine_t, b)


def hgcn_mesh_regressor_ref(vertices_coord, prop_matrix, w1, b1, w2, b2, u1, u2):
    """Pure-jnp reference using the exact same math/dtypes as the kernel."""
    b = vertices_coord.shape[0]
    args = _preprocess(vertices_coord, prop_matrix, w1, b1, w2, b2, u1, u2)
    coarse_t, mid_t, fine_t = _forward_math(*args)
    return _postprocess(coarse_t, mid_t, fine_t, b)


# --------------------- deterministic parameter synthesis ---------------------
def build_propagation_matrix(key):
    """P = Dv^{-1/2} H De^{-1} H^T Dv^{-1/2} from a synthetic incidence matrix."""
    incident = jax.random.uniform(key, (V_COARSE, NUM_HYPEREDGES), dtype=DTYPE)
    dv = jnp.sum(incident, axis=1)
    de = jnp.sum(incident, axis=0)
    dv_inv_sqrt = 1.0 / jnp.sqrt(dv)
    de_inv = 1.0 / de
    hn = incident * dv_inv_sqrt[:, None]
    prop = (hn * de_inv[None, :]) @ hn.T
    return incident, prop.astype(DTYPE)


def build_upsample_matrix(n_out, n_in):
    """Each finer vertex is the average of two (deterministically chosen) coarser ones."""
    rows = jnp.arange(n_out)
    idx0 = rows % n_in
    idx1 = (rows + 37) % n_in
    u = 0.5 * jax.nn.one_hot(idx0, n_in, dtype=DTYPE) \
        + 0.5 * jax.nn.one_hot(idx1, n_in, dtype=DTYPE)
    return u


# ----------------------------------- main -------------------------------------
if __name__ == "__main__":
    key = jax.random.PRNGKey(0)
    k_x, k_h, k_w1, k_w2, k_adj = jax.random.split(key, 5)

    # input coarse vertex coordinates (B, 431, 3)
    vertices_coord = jax.random.normal(k_x, (BATCH, V_COARSE, 3), dtype=DTYPE)

    # synthetic replacements for torch.load(...)
    incident_matrix, prop_matrix = build_propagation_matrix(k_h)
    adjacency_matrix = jax.random.uniform(k_adj, (NUM_JOINTS, NUM_JOINTS),
                                          dtype=DTYPE)  # built, unused (see TODO)

    # HGGCNBlock parameters (in=3, hidden=64, out=3), deterministic init
    w1 = 0.05 * jax.random.normal(k_w1, (3, HIDDEN), dtype=DTYPE)
    b1 = jnp.zeros((1, HIDDEN), dtype=DTYPE)
    w2 = 0.05 * jax.random.normal(k_w2, (HIDDEN, 3), dtype=DTYPE)
    b2 = jnp.zeros((1, 3), dtype=DTYPE)

    # mesh_sampler upsampling matrices
    u1 = build_upsample_matrix(V_MID, V_COARSE)   # coarse -> mid
    u2 = build_upsample_matrix(V_FINE, V_MID)     # mid -> fine

    fwd = jax.jit(hgcn_mesh_regressor)
    coarse, mid, fine = fwd(vertices_coord, prop_matrix, w1, b1, w2, b2, u1, u2)
    jax.block_until_ready((coarse, mid, fine))

    assert coarse.shape == (BATCH, V_COARSE, 3)
    assert mid.shape == (BATCH, V_MID, 3)
    assert fine.shape == (BATCH, V_FINE, 3)
    assert bool(jnp.all(jnp.isfinite(coarse)))
    assert bool(jnp.all(jnp.isfinite(mid)))
    assert bool(jnp.all(jnp.isfinite(fine)))

    # numerical parity with the pure-jnp reference (same bf16 weights, f32 accum)
    r_coarse, r_mid, r_fine = hgcn_mesh_regressor_ref(
        vertices_coord, prop_matrix, w1, b1, w2, b2, u1, u2)
    assert bool(jnp.allclose(coarse, r_coarse, atol=2e-2, rtol=2e-2))
    assert bool(jnp.allclose(mid, r_mid, atol=2e-2, rtol=2e-2))
    assert bool(jnp.allclose(fine, r_fine, atol=2e-2, rtol=2e-2))

    print("KERNEL_OK")
</pallas_src>

<mosaic_0001>
module attributes {stable_mosaic.version = 11 : i64} {
  func.func @_hgcn_regressor_kernel(%arg0: memref<6x431xf32, #tpu.memory_space<vmem>>, %arg1: memref<431x431xbf16, #tpu.memory_space<vmem>>, %arg2: memref<128x6xf32, #tpu.memory_space<vmem>>, %arg3: memref<128x1xf32, #tpu.memory_space<vmem>>, %arg4: memref<6x128xf32, #tpu.memory_space<vmem>>, %arg5: memref<6x1xf32, #tpu.memory_space<vmem>>, %arg6: memref<431x862xbf16, #tpu.memory_space<vmem>>, %arg7: memref<431x1724xbf16, #tpu.memory_space<vmem>>, %arg8: memref<6x431xf32, #tpu.memory_space<vmem>>, %arg9: memref<6x862xf32, #tpu.memory_space<vmem>>, %arg10: memref<6x1724xf32, #tpu.memory_space<vmem>>) attributes {dimension_semantics = [], scalar_prefetch = 0 : i64, scratch_operands = 0 : i64, tpu.core_type = #tpu.core_type<tc>} {
    %c0 = arith.constant 0 : index
    %c0_0 = arith.constant 0 : index
    %0 = vector.load %arg0[%c0, %c0_0] : memref<6x431xf32, #tpu.memory_space<vmem>>, vector<6x431xf32>
    %c0_1 = arith.constant 0 : index
    %c0_2 = arith.constant 0 : index
    %1 = vector.load %arg1[%c0_1, %c0_2] : memref<431x431xbf16, #tpu.memory_space<vmem>>, vector<431x431xbf16>
    %c0_3 = arith.constant 0 : index
    %c0_4 = arith.constant 0 : index
    %2 = vector.load %arg2[%c0_3, %c0_4] : memref<128x6xf32, #tpu.memory_space<vmem>>, vector<128x6xf32>
    %c0_5 = arith.constant 0 : index
    %c0_6 = arith.constant 0 : index
    %3 = vector.load %arg3[%c0_5, %c0_6] : memref<128x1xf32, #tpu.memory_space<vmem>>, vector<128x1xf32>
    %c0_7 = arith.constant 0 : index
    %c0_8 = arith.constant 0 : index
    %4 = vector.load %arg4[%c0_7, %c0_8] : memref<6x128xf32, #tpu.memory_space<vmem>>, vector<6x128xf32>
    %c0_9 = arith.constant 0 : index
    %c0_10 = arith.constant 0 : index
    %5 = vector.load %arg5[%c0_9, %c0_10] : memref<6x1xf32, #tpu.memory_space<vmem>>, vector<6x1xf32>
    %c0_11 = arith.constant 0 : index
    %c0_12 = arith.constant 0 : index
    %6 = vector.load %arg6[%c0_11, %c0_12] : memref<431x862xbf16, #tpu.memory_space<vmem>>, vector<431x862xbf16>
    %c0_13 = arith.constant 0 : index
    %c0_14 = arith.constant 0 : index
    %7 = vector.load %arg7[%c0_13, %c0_14] : memref<431x1724xbf16, #tpu.memory_space<vmem>>, vector<431x1724xbf16>
    %8 = arith.truncf %0 : vector<6x431xf32> to vector<6x431xbf16>
    %cst = arith.constant dense<0.000000e+00> : vector<6x431xf32>
    %9 = tpu.matmul %8, %1, %cst {dimension_numbers = #tpu.dot_dimension_numbers<[1], [0], [0], [1], [0, 0, 1, 1], [], []>} : vector<6x431xbf16>, vector<431x431xbf16>, vector<6x431xf32> -> vector<6x431xf32>
    %cst_15 = arith.constant dense<0.000000e+00> : vector<128x431xf32>
    %10 = tpu.matmul %2, %9, %cst_15 {dimension_numbers = #tpu.dot_dimension_numbers<[1], [0], [0], [1], [0, 0, 1, 1], [], []>} : vector<128x6xf32>, vector<6x431xf32>, vector<128x431xf32> -> vector<128x431xf32>
    %11 = vector.broadcast %3 : vector<128x1xf32> to vector<128x431xf32>
    %12 = arith.addf %10, %11 : vector<128x431xf32>
    %cst_16 = arith.constant 0.000000e+00 : f32
    %13 = vector.broadcast %cst_16 : f32 to vector<128x431xf32>
    %14 = arith.maximumf %12, %13 : vector<128x431xf32>
    %15 = arith.truncf %14 : vector<128x431xf32> to vector<128x431xbf16>
    %cst_17 = arith.constant dense<0.000000e+00> : vector<128x431xf32>
    %16 = tpu.matmul %15, %1, %cst_17 {dimension_numbers = #tpu.dot_dimension_numbers<[1], [0], [0], [1], [0, 0, 1, 1], [], []>} : vector<128x431xbf16>, vector<431x431xbf16>, vector<128x431xf32> -> vector<128x431xf32>
    %cst_18 = arith.constant dense<0.000000e+00> : vector<6x431xf32>
    %17 = tpu.matmul %4, %16, %cst_18 {dimension_numbers = #tpu.dot_dimension_numbers<[1], [0], [0], [1], [0, 0, 1, 1], [], []>} : vector<6x128xf32>, vector<128x431xf32>, vector<6x431xf32> -> vector<6x431xf32>
    %18 = vector.broadcast %5 : vector<6x1xf32> to vector<6x431xf32>
    %19 = arith.addf %17, %18 : vector<6x431xf32>
    %20 = arith.addf %19, %0 : vector<6x431xf32>
    %21 = arith.truncf %20 : vector<6x431xf32> to vector<6x431xbf16>
    %cst_19 = arith.constant dense<0.000000e+00> : vector<6x862xf32>
    %22 = tpu.matmul %21, %6, %cst_19 {dimension_numbers = #tpu.dot_dimension_numbers<[1], [0], [0], [1], [0, 0, 1, 1], [], []>} : vector<6x431xbf16>, vector<431x862xbf16>, vector<6x862xf32> -> vector<6x862xf32>
    %cst_20 = arith.constant dense<0.000000e+00> : vector<6x1724xf32>
    %23 = tpu.matmul %21, %7, %cst_20 {dimension_numbers = #tpu.dot_dimension_numbers<[1], [0], [0], [1], [0, 0, 1, 1], [], []>} : vector<6x431xbf16>, vector<431x1724xbf16>, vector<6x1724xf32> -> vector<6x1724xf32>
    %c0_21 = arith.constant 0 : index
    %c0_22 = arith.constant 0 : index
    %24 = vector.load %arg8[%c0_21, %c0_22] : memref<6x431xf32, #tpu.memory_space<vmem>>, vector<6x431xf32>
    tpu.vector_store %arg8[%c0_21, %c0_22], %20 {strides = array<i32>} : memref<6x431xf32, #tpu.memory_space<vmem>>, vector<6x431xf32>,
    %c0_23 = arith.constant 0 : index
    %c0_24 = arith.constant 0 : index
    %25 = vector.load %arg9[%c0_23, %c0_24] : memref<6x862xf32, #tpu.memory_space<vmem>>, vector<6x862xf32>
    tpu.vector_store %arg9[%c0_23, %c0_24], %22 {strides = array<i32>} : memref<6x862xf32, #tpu.memory_space<vmem>>, vector<6x862xf32>,
    %c0_25 = arith.constant 0 : index
    %c0_26 = arith.constant 0 : index
    %26 = vector.load %arg10[%c0_25, %c0_26] : memref<6x1724xf32, #tpu.memory_space<vmem>>, vector<6x1724xf32>
    tpu.vector_store %arg10[%c0_25, %c0_26], %23 {strides = array<i32>} : memref<6x1724xf32, #tpu.memory_space<vmem>>, vector<6x1724xf32>,
    return
  }
}

</mosaic_0001>

<bundles_post_ra>
// kernel: tile.14
= control target key start
LH: loop header
LB: loop body
LE: loop exit
PB: predicated region body
PF: predicated region fallthrough
CT: control target
= control target key end

     0   :  { %2 = vsyncpa [#allocation1], 0  ;;  %s44_s6 = smov [#allocation0]   ;;  %s70_s0 = inlined_call_operand.hbm [shape: f32[3], index: 0, kind: input, shape index: {}]   ;;  %s71_s1 = inlined_call_operand.vmem [shape: f32[2,3], index: 1, kind: output, shape index: {}]  }
   0x1   :  { %s9_s7 = sshll.u32 %s44_s6, 4  ;;  %s20_s10 = scalar_lea.hbm %s70_s0, 16  ;;  %s10_s7 = int_to_ptr.vmem [resolvable:$true] %s9_s7 }
   0x2   :  { %p21_p0 = scmp.ne.s32.totalorder %s70_s0, %s20_s10  ;;  %p24_p1 = scmp.lt.u32.totalorder %s20_s10, %s70_s0 }
   0x4   :  { %p26_p2 = pnand %p24_p1, %p21_p0 }
   0x6   :  { %29 = shalt.err (!%p26_p2)
}
   0x7   :  { %s30_s15 = scalar_lea.vmem %s10_s7, 16  ;;  %s34_s16 = scalar_lea.vmem %s10_s7, 32 }
   0x8   :  { %p31_p3 = scmp.ne.s32.totalorder %s10_s7, %s30_s15  ;;  %p35_p4 = scmp.lt.s32.totalorder %s10_s7, %s10_s7 }
   0x9   :  { %p36_p5 = scmp.lt.s32.totalorder %s34_s16, %s30_s15 }
   0xb   :  { %p37_p6 = por %p36_p5, %p35_p4 }
   0xd   :  { %p38_p7 = pnand %p37_p6, %p31_p3 }
   0xf   :  { %41 = shalt.err (!%p38_p7)
}
  0x10   :  { %12 = dma.hbm_to_vmem [thread:$0]  %s70_s0, 16, %s10_s7, [#allocation1]  }
  0x11   :  { %42 = dma.done.wait [#allocation1], 16  }
  0x12   :  { %43 = vsyncadd [#allocation1], 4294967280  ;;  %v16_v0 = vld [vmem:[#allocation0] ss:$0 sm:$0xff] }
  0x13   :  { %17 = vst [vmem:[%s71_s1] sm:$0x3] %v16_v0 }
  0x14   :  { %18 = vsyncpa [#allocation1], 1 }

// kernel: tile.10
= control target key start
LH: loop header
LB: loop body
LE: loop exit
PB: predicated region body
PF: predicated region fallthrough
CT: control target
= control target key end

     0   :  { %2 = vsyncpa [#allocation1], 0  ;;  %s44_s6 = smov [#allocation0]   ;;  %s70_s0 = inlined_call_operand.hbm [shape: f32[64], index: 0, kind: input, shape index: {}]   ;;  %s71_s1 = inlined_call_operand.vmem [shape: f32[2,64], index: 1, kind: output, shape index: {}]  }
   0x1   :  { %s9_s7 = sshll.u32 %s44_s6, 4  ;;  %s20_s10 = scalar_lea.hbm %s70_s0, 16  ;;  %s10_s7 = int_to_ptr.vmem [resolvable:$true] %s9_s7 }
   0x2   :  { %p21_p0 = scmp.ne.s32.totalorder %s70_s0, %s20_s10  ;;  %p24_p1 = scmp.lt.u32.totalorder %s20_s10, %s70_s0 }
   0x4   :  { %p26_p2 = pnand %p24_p1, %p21_p0 }
   0x6   :  { %29 = shalt.err (!%p26_p2)
}
   0x7   :  { %s30_s15 = scalar_lea.vmem %s10_s7, 16  ;;  %s34_s16 = scalar_lea.vmem %s10_s7, 32 }
   0x8   :  { %p31_p3 = scmp.ne.s32.totalorder %s10_s7, %s30_s15  ;;  %p35_p4 = scmp.lt.s32.totalorder %s10_s7, %s10_s7 }
   0x9   :  { %p36_p5 = scmp.lt.s32.totalorder %s34_s16, %s30_s15 }
   0xb   :  { %p37_p6 = por %p36_p5, %p35_p4 }
   0xd   :  { %p38_p7 = pnand %p37_p6, %p31_p3 }
   0xf   :  { %41 = shalt.err (!%p38_p7)
}
  0x10   :  { %12 = dma.hbm_to_vmem [thread:$0]  %s70_s0, 16, %s10_s7, [#allocation1]  }
  0x11   :  { %42 = dma.done.wait [#allocation1], 16  }
  0x12   :  { %43 = vsyncadd [#allocation1], 4294967280  ;;  %v16_v0 = vld [vmem:[#allocation0] ss:$0 sm:$0xff] }
  0x13   :  { %17 = vst [vmem:[%s71_s1] sm:$0x3] %v16_v0 }
  0x14   :  { %18 = vsyncpa [#allocation1], 1 }

// kernel: tile.1
= control target key start
LH: loop header
LB: loop body
LE: loop exit
PB: predicated region body
PF: predicated region fallthrough
CT: control target
= control target key end

     0   :  { %vm7_vm0 = vcmask 7168   ;;  %s26_s10 = smov 126   ;;  %s49_s0 = inlined_call_operand.vmem [shape: f32[2,3], index: 0, kind: input, shape index: {}]   ;;  %s50_s1 = inlined_call_operand.vmem [shape: f32[6,1], index: 1, kind: output, shape index: {}]  }
   0x1   :  { %v4_v0 = vld [vmem:[%s49_s0] sm:$0x3]  ;;  %s25_s0 = smov 127  }
   0x2   :  { %5 = vst [vmem:[#allocation0] sm:$0x3] %v4_v0 }
   0x9   :  { %v9_v1 = vld [vmem:[#allocation0] sm:$0x3]  }
   0xa   :  { %v6_v2 = vld [vmem:[#allocation0] sm:$0x3]   ;;  %10 = vrot.lane.b32.xlu0 %v9_v1, %s25_s0 }
   0xb   :  { %8 = vst.msk [vmem:[%s50_s1] ss:$3 sm:$0x3] %vm7_vm0, %v6_v2   ;;  %v15_v3 = vld [vmem:[#allocation0] sm:$0x3]  }
   0xe   :  { %16 = vrot.lane.b32.xlu0 %v15_v3, %s26_s10 }
  0x7c   :  { %v11_v4 = vpop.permute.xlu0 %10  }
  0x7d   :  { %21 = vst.msk [vmem:[%s50_s1 + $0x1] ss:$3 sm:$0x3] %vm7_vm0, %v11_v4  }
  0x80   :  { %v17_v5 = vpop.permute.xlu0 %16  }
  0x81   :  { %22 = vst.msk [vmem:[%s50_s1 + $0x2] ss:$3 sm:$0x3] %vm7_vm0, %v17_v5  }

// kernel: tile.0
= control target key start
LH: loop header
LB: loop body
LE: loop exit
PB: predicated region body
PF: predicated region fallthrough
CT: control target
= control target key end

     0   :  { %s706_s8 = smov 125   ;;  %s707_s9 = smov 126   ;;  %vm7_vm0 = vcmask 7168   ;;  %s1293_s0 = inlined_call_operand.vmem [shape: f32[2,64], index: 0, kind: input, shape index: {}]   ;;  %s1294_s1 = inlined_call_operand.vmem [shape: f32[128,1], index: 1, kind: output, shape index: {}]  }
   0x1   :  { %v4_v0 = vld [vmem:[%s1293_s0] sm:$0x3]  ;;  %s705_s0 = smov 127   ;;  %s708_s10 = smov 124  }
   0x2   :  { %5 = vst [vmem:[#allocation0] sm:$0x3] %v4_v0  ;;  %s709_s11 = smov 123   ;;  %s710_s12 = smov 122  }
   0x3   :  { %s711_s13 = smov 121   ;;  %s712_s14 = smov 120  }
   0x4   :  { %s713_s15 = smov 119   ;;  %s714_s16 = smov 118  }
   0x5   :  { %s715_s17 = smov 117   ;;  %s716_s18 = smov 116  }
   0x6   :  { %s717_s19 = smov 115   ;;  %s718_s20 = smov 114  }
   0x7   :  { %s719_s21 = smov 113   ;;  %s720_s22 = smov 112  }
   0x8   :  { %s721_s23 = smov 111   ;;  %s722_s24 = smov 110  }
   0x9   :  { %v11_v1 = vld [vmem:[#allocation0] sm:$0x3]   ;;  %s723_s25 = smov 109   ;;  %s724_s26 = smov 108  }
   0xa   :  { %v27_v2 = vld [vmem:[#allocation0] sm:$0x3]   ;;  %12 = vrot.lane.b32.xlu0 %v11_v1, %s705_s0  ;;  %s725_s27 = smov 107   ;;  %s726_s28 = smov 106  }
   0xb   :  { %28 = vrot.lane.b32.xlu1 %v27_v2, %s706_s8  ;;  %v19_v3 = vld [vmem:[#allocation0] sm:$0x3]   ;;  %s727_s29 = smov 105   ;;  %s728_s30 = smov 104  }
   0xc   :  { %v35_v4 = vld [vmem:[#allocation0] sm:$0x3]   ;;  %s729_s2 = smov 103   ;;  %s730_s3 = smov 102  }
   0xd   :  { %v43_v5 = vld [vmem:[#allocation0] sm:$0x3]   ;;  %s731_s4 = smov 101   ;;  %s732_s5 = smov 100  }
   0xe   :  { %20 = vrot.lane.b32.xlu0 %v19_v3, %s707_s9  ;;  %v51_v6 = vld [vmem:[#allocation0] sm:$0x3]   ;;  %s733_s6 = smov 99   ;;  %s734_s7 = smov 98  }
   0xf   :  { %36 = vrot.lane.b32.xlu1 %v35_v4, %s708_s10  ;;  %v59_v7 = vld [vmem:[#allocation0] sm:$0x3]   ;;  %s735_s0 = smov 97   ;;  %s736_s8 = smov 96  }
  0x10   :  { %v67_v8 = vld [vmem:[#allocation0] sm:$0x3]   ;;  %s737_s9 = smov 95   ;;  %s738_s10 = smov 94  }
  0x11   :  { %v75_v9 = vld [vmem:[#allocation0] sm:$0x3]  }
  0x12   :  { %44 = vrot.lane.b32.xlu0 %v43_v5, %s709_s11  ;;  %v83_v10 = vld [vmem:[#allocation0] sm:$0x3]   ;;  %s739_s11 = smov 93  }
  0x13   :  { %52 = vrot.lane.b32.xlu1 %v51_v6, %s710_s12  ;;  %v91_v11 = vld [vmem:[#allocation0] sm:$0x3]   ;;  %s740_s12 = smov 92  }
  0x14   :  { %v99_v12 = vld [vmem:[#allocation0] sm:$0x3]  }
  0x15   :  { %v107_v13 = vld [vmem:[#allocation0] sm:$0x3]  }
  0x16   :  { %60 = vrot.lane.b32.xlu0 %v59_v7, %s711_s13  ;;  %v115_v14 = vld [vmem:[#allocation0] sm:$0x3]   ;;  %s741_s13 = smov 91  }
  0x17   :  { %68 = vrot.lane.b32.xlu1 %v67_v8, %s712_s14  ;;  %v123_v15 = vld [vmem:[#allocation0] sm:$0x3]   ;;  %s742_s14 = smov 90  }
  0x18   :  { %v131_v16 = vld [vmem:[#allocation0] sm:$0x3]  }
  0x19   :  { %v139_v17 = vld [vmem:[#allocation0] sm:$0x3]  }
  0x1a   :  { %76 = vrot.lane.b32.xlu0 %v75_v9, %s713_s15  ;;  %v147_v18 = vld [vmem:[#allocation0] sm:$0x3]   ;;  %s743_s15 = smov 89  }
  0x1b   :  { %84 = vrot.lane.b32.xlu1 %v83_v10, %s714_s16  ;;  %v155_v19 = vld [vmem:[#allocation0] sm:$0x3]   ;;  %s744_s16 = smov 88  }
  0x1c   :  { %v163_v20 = vld [vmem:[#allocation0] sm:$0x3]  }
  0x1d   :  { %v171_v21 = vld [vmem:[#allocation0] sm:$0x3]  }
  0x1e   :  { %92 = vrot.lane.b32.xlu0 %v91_v11, %s715_s17  ;;  %v179_v22 = vld [vmem:[#allocation0] sm:$0x3]   ;;  %s745_s17 = smov 87  }
  0x1f   :  { %100 = vrot.lane.b32.xlu1 %v99_v12, %s716_s18  ;;  %v187_v23 = vld [vmem:[#allocation0] sm:$0x3]   ;;  %s746_s18 = smov 86  }
  0x20   :  { %v195_v24 = vld [vmem:[#allocation0] sm:$0x3]  }
  0x21   :  { %v203_v25 = vld [vmem:[#allocation0] sm:$0x3]  }
  0x22   :  { %108 = vrot.lane.b32.xlu0 %v107_v13, %s717_s19  ;;  %v211_v26 = vld [vmem:[#allocation0] sm:$0x3]   ;;  %s747_s19 = smov 85  }
  0x23   :  { %116 = vrot.lane.b32.xlu1 %v115_v14, %s718_s20  ;;  %v219_v27 = vld [vmem:[#allocation0] sm:$0x3]   ;;  %s748_s20 = smov 84  }
  0x24   :  { %v227_v28 = vld [vmem:[#allocation0] sm:$0x3]  }
  0x25   :  { %v235_v29 = vld [vmem:[#allocation0] sm:$0x3]  }
  0x26   :  { %124 = vrot.lane.b32.xlu0 %v123_v15, %s719_s21  ;;  %v243_v30 = vld [vmem:[#allocation0] sm:$0x3]   ;;  %s749_s21 = smov 83  }
  0x27   :  { %132 = vrot.lane.b32.xlu1 %v131_v16, %s720_s22  ;;  %v251_v31 = vld [vmem:[#allocation0] sm:$0x3]   ;;  %s750_s22 = smov 82  }
  0x28   :  { %v259_v32 = vld [vmem:[#allocation0] sm:$0x3]  }
  0x29   :  { %v267_v33 = vld [vmem:[#allocation0] sm:$0x3]  }
  0x2a   :  { %140 = vrot.lane.b32.xlu0 %v139_v17, %s721_s23  ;;  %v275_v34 = vld [vmem:[#allocation0] sm:$0x3]   ;;  %s751_s23 = smov 81  }
  0x2b   :  { %148 = vrot.lane.b32.xlu1 %v147_v18, %s722_s24  ;;  %v283_v35 = vld [vmem:[#allocation0] sm:$0x3]   ;;  %s752_s24 = smov 80  }
  0x2c   :  { %v291_v36 = vld [vmem:[#allocation0] sm:$0x3]  }
  0x2d   :  { %v299_v37 = vld [vmem:[#allocation0] sm:$0x3]  }
  0x2e   :  { %156 = vrot.lane.b32.xlu0 %v155_v19, %s723_s25  ;;  %v307_v38 = vld [vmem:[#allocation0] sm:$0x3]   ;;  %s753_s25 = smov 79  }
  0x2f   :  { %164 = vrot.lane.b32.xlu1 %v163_v20, %s724_s26  ;;  %v315_v39 = vld [vmem:[#allocation0] sm:$0x3]   ;;  %s754_s26 = smov 78  }
  0x30   :  { %v323_v40 = vld [vmem:[#allocation0] sm:$0x3]  }
  0x31   :  { %v331_v41 = vld [vmem:[#allocation0] sm:$0x3]  }
  0x32   :  { %172 = vrot.lane.b32.xlu0 %v171_v21, %s725_s27  ;;  %v339_v42 = vld [vmem:[#allocation0] sm:$0x3]   ;;  %s755_s27 = smov 77  }
  0x33   :  { %180 = vrot.lane.b32.xlu1 %v179_v22, %s726_s28  ;;  %v347_v43 = vld [vmem:[#allocation0] sm:$0x3]   ;;  %s756_s28 = smov 76  }
  0x34   :  { %v355_v44 = vld [vmem:[#allocation0] sm:$0x3]  }
  0x35   :  { %v363_v45 = vld [vmem:[#allocation0] sm:$0x3]  }
  0x36   :  { %188 = vrot.lane.b32.xlu0 %v187_v23, %s727_s29  ;;  %v371_v46 = vld [vmem:[#allocation0] sm:$0x3]   ;;  %s757_s29 = smov 75  }
  0x37   :  { %196 = vrot.lane.b32.xlu1 %v195_v24, %s728_s30  ;;  %v379_v47 = vld [vmem:[#allocation0] sm:$0x3]   ;;  %s758_s30 = smov 74  }
  0x38   :  { %v387_v48 = vld [vmem:[#allocation0] sm:$0x3]  }
  0x39   :  { %v395_v49 = vld [vmem:[#allocation0] sm:$0x3]  }
  0x3a   :  { %204 = vrot.lane.b32.xlu0 %v203_v25, %s729_s2  ;;  %v403_v50 = vld [vmem:[#allocation0] sm:$0x3]   ;;  %s759_s2 = smov 73  }
  0x3b   :  { %212 = vrot.lane.b32.xlu1 %v211_v26, %s730_s3  ;;  %v411_v51 = vld [vmem:[#allocation0] sm:$0x3]   ;;  %s760_s3 = smov 72  }
  0x3c   :  { %v419_v52 = vld [vmem:[#allocation0] sm:$0x3]  }
  0x3d   :  { %v427_v53 = vld [vmem:[#allocation0] sm:$0x3]  }
  0x3e   :  { %220 = vrot.lane.b32.xlu0 %v219_v27, %s731_s4  ;;  %v435_v54 = vld [vmem:[#allocation0] sm:$0x3]  }
  0x3f   :  { %228 = vrot.lane.b32.xlu1 %v227_v28, %s732_s5  ;;  %v443_v55 = vld [vmem:[#allocation0] sm:$0x3]  }
  0x40   :  { %v451_v56 = vld [vmem:[#allocation0] sm:$0x3]  }
  0x41   :  { %v459_v57 = vld [vmem:[#allocation0] sm:$0x3]  }
  0x42   :  { %236 = vrot.lane.b32.xlu0 %v235_v29, %s733_s6  ;;  %v467_v58 = vld [vmem:[#allocation0] sm:$0x3]  }
  0x43   :  { %244 = vrot.lane.b32.xlu1 %v243_v30, %s734_s7  ;;  %v6_v59 = vld [vmem:[#allocation0] sm:$0x3]  }
  0x44   :  { %8 = vst.msk [vmem:[%s1294_s1] sm:$0x1] %vm7_vm0, %v6_v59   ;;  %515 = vst.msk [vmem:[%s1294_s1 + $0x3f] sm:$0x2] %vm7_vm0, %v6_v59   ;;  %v475_v60 = vld [vmem:[#allocation0] sm:$0x3]  }
  0x45   :  { %v483_v61 = vld [vmem:[#allocation0] sm:$0x3]  }
  0x46   :  { %252 = vrot.lane.b32.xlu0 %v251_v31, %s735_s0  ;;  %s761_s0 = smov 71   ;;  %v491_v0 = vld [vmem:[#allocation0] sm:$0x3]  }
  0x47   :  { %260 = vrot.lane.b32.xlu1 %v259_v32, %s736_s8  ;;  %s762_s8 = smov 70   ;;  %v499_v1 = vld [vmem:[#allocation0] sm:$0x3]  }
  0x48   :  { %v507_v4 = vld [vmem:[#allocation0] sm:$0x3]  }
  0x4a   :  { %268 = vrot.lane.b32.xlu0 %v267_v33, %s737_s9 }
  0x4b   :  { %276 = vrot.lane.b32.xlu1 %v275_v34, %s738_s10 }
  0x4e   :  { %284 = vrot.lane.b32.xlu0 %v283_v35, %s739_s11 }
  0x4f   :  { %292 = vrot.lane.b32.xlu1 %v291_v36, %s740_s12 }
  0x52   :  { %300 = vrot.lane.b32.xlu0 %v299_v37, %s741_s13 }
  0x53   :  { %308 = vrot.lane.b32.xlu1 %v307_v38, %s742_s14 }
  0x56   :  { %316 = vrot.lane.b32.xlu0 %v315_v39, %s743_s15 }
  0x57   :  { %324 = vrot.lane.b32.xlu1 %v323_v40, %s744_s16 }
  0x5a   :  { %332 = vrot.lane.b32.xlu0 %v331_v41, %s745_s17  ;;  %s763_s17 = smov 69  }
  0x5b   :  { %340 = vrot.lane.b32.xlu1 %v339_v42, %s746_s18  ;;  %s764_s18 = smov 68  }
  0x5e   :  { %348 = vrot.lane.b32.xlu0 %v347_v43, %s747_s19 }
  0x5f   :  { %356 = vrot.lane.b32.xlu1 %v355_v44, %s748_s20 }
  0x62   :  { %364 = vrot.lane.b32.xlu0 %v363_v45, %s749_s21 }
  0x63   :  { %372 = vrot.lane.b32.xlu1 %v371_v46, %s750_s22 }
  0x66   :  { %380 = vrot.lane.b32.xlu0 %v379_v47, %s751_s23 }
  0x67   :  { %388 = vrot.lane.b32.xlu1 %v387_v48, %s752_s24 }
  0x6a   :  { %396 = vrot.lane.b32.xlu0 %v395_v49, %s753_s25 }
  0x6b   :  { %404 = vrot.lane.b32.xlu1 %v403_v50, %s754_s26 }
  0x6e   :  { %412 = vrot.lane.b32.xlu0 %v411_v51, %s755_s27  ;;  %s765_s27 = smov 67  }
  0x6f   :  { %420 = vrot.lane.b32.xlu1 %v419_v52, %s756_s28  ;;  %s766_s28 = smov 66  }
  0x72   :  { %428 = vrot.lane.b32.xlu0 %v427_v53, %s757_s29 }
  0x73   :  { %436 = vrot.lane.b32.xlu1 %v435_v54, %s758_s30 }
  0x76   :  { %444 = vrot.lane.b32.xlu0 %v443_v55, %s759_s2 }
  0x77   :  { %452 = vrot.lane.b32.xlu1 %v451_v56, %s760_s3 }
  0x7a   :  { %460 = vrot.lane.b32.xlu0 %v459_v57, %s761_s0  ;;  %s767_s0 = smov 65  }
  0x7b   :  { %468 = vrot.lane.b32.xlu1 %v467_v58, %s762_s8 }
  0x7c   :  { %v13_v62 = vpop.permute.xlu0 %12  }
  0x7d   :  { %v29_v63 = vpop.permute.xlu1 %28   ;;  %516 = vst.msk [vmem:[%s1294_s1 + $0x1] sm:$0x1] %vm7_vm0, %v13_v62   ;;  %517 = vst.msk [vmem:[%s1294_s1 + $0x40] sm:$0x2] %vm7_vm0, %v13_v62  }
  0x7e   :  { %520 = vst.msk [vmem:[%s1294_s1 + $0x3] sm:$0x1] %vm7_vm0, %v29_v63   ;;  %521 = vst.msk [vmem:[%s1294_s1 + $0x42] sm:$0x2] %vm7_vm0, %v29_v63   ;;  %476 = vrot.lane.b32.xlu0 %v475_v60, %s763_s17 }
  0x7f   :  { %484 = vrot.lane.b32.xlu1 %v483_v61, %s764_s18 }
  0x80   :  { %v21_v2 = vpop.permute.xlu0 %20  }
  0x81   :  { %v37_v3 = vpop.permute.xlu1 %36   ;;  %518 = vst.msk [vmem:[%s1294_s1 + $0x2] sm:$0x1] %vm7_vm0, %v21_v2   ;;  %519 = vst.msk [vmem:[%s1294_s1 + $0x41] sm:$0x2] %vm7_vm0, %v21_v2  }
  0x82   :  { %522 = vst.msk [vmem:[%s1294_s1 + $0x4] sm:$0x1] %vm7_vm0, %v37_v3   ;;  %523 = vst.msk [vmem:[%s1294_s1 + $0x43] sm:$0x2] %vm7_vm0, %v37_v3   ;;  %492 = vrot.lane.b32.xlu0 %v491_v0, %s765_s27 }
  0x83   :  { %500 = vrot.lane.b32.xlu1 %v499_v1, %s766_s28 }
  0x84   :  { %v45_v5 = vpop.permute.xlu0 %44  }
  0x85   :  { %v53_v6 = vpop.permute.xlu1 %52   ;;  %524 = vst.msk [vmem:[%s1294_s1 + $0x5] sm:$0x1] %vm7_vm0, %v45_v5   ;;  %525 = vst.msk [vmem:[%s1294_s1 + $0x44] sm:$0x2] %vm7_vm0, %v45_v5  }
  0x86   :  { %526 = vst.msk [vmem:[%s1294_s1 + $0x6] sm:$0x1] %vm7_vm0, %v53_v6   ;;  %527 = vst.msk [vmem:[%s1294_s1 + $0x45] sm:$0x2] %vm7_vm0, %v53_v6   ;;  %508 = vrot.lane.b32.xlu0 %v507_v4, %s767_s0 }
  0x88   :  { %v61_v7 = vpop.permute.xlu0 %60  }
  0x89   :  { %v69_v8 = vpop.permute.xlu1 %68   ;;  %528 = vst.msk [vmem:[%s1294_s1 + $0x7] sm:$0x1] %vm7_vm0, %v61_v7   ;;  %529 = vst.msk [vmem:[%s1294_s1 + $0x46] sm:$0x2] %vm7_vm0, %v61_v7  }
  0x8a   :  { %530 = vst.msk [vmem:[%s1294_s1 + $0x8] sm:$0x1] %vm7_vm0, %v69_v8   ;;  %531 = vst.msk [vmem:[%s1294_s1 + $0x47] sm:$0x2] %vm7_vm0, %v69_v8  }
  0x8c   :  { %v77_v9 = vpop.permute.xlu0 %76  }
  0x8d   :  { %v85_v10 = vpop.permute.xlu1 %84   ;;  %532 = vst.msk [vmem:[%s1294_s1 + $0x9] sm:$0x1] %vm7_vm0, %v77_v9   ;;  %533 = vst.msk [vmem:[%s1294_s1 + $0x48] sm:$0x2] %vm7_vm0, %v77_v9  }
  0x8e   :  { %534 = vst.msk [vmem:[%s1294_s1 + $0xa] sm:$0x1] %vm7_vm0, %v85_v10   ;;  %535 = vst.msk [vmem:[%s1294_s1 + $0x49] sm:$0x2] %vm7_vm0, %v85_v10  }
  0x90   :  { %v93_v11 = vpop.permute.xlu0 %92  }
  0x91   :  { %v101_v12 = vpop.permute.xlu1 %100   ;;  %536 = vst.msk [vmem:[%s1294_s1 + $0xb] sm:$0x1] %vm7_vm0, %v93_v11   ;;  %537 = vst.msk [vmem:[%s1294_s1 + $0x4a] sm:$0x2] %vm7_vm0, %v93_v11  }
  0x92   :  { %538 = vst.msk [vmem:[%s1294_s1 + $0xc] sm:$0x1] %vm7_vm0, %v101_v12   ;;  %539 = vst.msk [vmem:[%s1294_s1 + $0x4b] sm:$0x2] %vm7_vm0, %v101_v12  }
  0x94   :  { %v109_v13 = vpop.permute.xlu0 %108  }
  0x95   :  { %v117_v14 = vpop.permute.xlu1 %116   ;;  %540 = vst.msk [vmem:[%s1294_s1 + $0xd] sm:$0x1] %vm7_vm0, %v109_v13   ;;  %541 = vst.msk [vmem:[%s1294_s1 + $0x4c] sm:$0x2] %vm7_vm0, %v109_v13  }
  0x96   :  { %542 = vst.msk [vmem:[%s1294_s1 + $0xe] sm:$0x1] %vm7_vm0, %v117_v14   ;;  %543 = vst.msk [vmem:[%s1294_s1 + $0x4d] sm:$0x2] %vm7_vm0, %v117_v14  }
  0x98   :  { %v125_v15 = vpop.permute.xlu0 %124  }
  0x99   :  { %v133_v16 = vpop.permute.xlu1 %132   ;;  %544 = vst.msk [vmem:[%s1294_s1 + $0xf] sm:$0x1] %vm7_vm0, %v125_v15   ;;  %545 = vst.msk [vmem:[%s1294_s1 + $0x4e] sm:$0x2] %vm7_vm0, %v125_v15  }
  0x9a   :  { %546 = vst.msk [vmem:[%s1294_s1 + $0x10] sm:$0x1] %vm7_vm0, %v133_v16   ;;  %547 = vst.msk [vmem:[%s1294_s1 + $0x4f] sm:$0x2] %vm7_vm0, %v133_v16  }
  0x9c   :  { %v141_v17 = vpop.permute.xlu0 %140  }
  0x9d   :  { %v149_v18 = vpop.permute.xlu1 %148   ;;  %548 = vst.msk [vmem:[%s1294_s1 + $0x11] sm:$0x1] %vm7_vm0, %v141_v17   ;;  %549 = vst.msk [vmem:[%s1294_s1 + $0x50] sm:$0x2] %vm7_vm0, %v141_v17  }
  0x9e   :  { %550 = vst.msk [vmem:[%s1294_s1 + $0x12] sm:$0x1] %vm7_vm0, %v149_v18   ;;  %551 = vst.msk [vmem:[%s1294_s1 + $0x51] sm:$0x2] %vm7_vm0, %v149_v18  }
  0xa0   :  { %v157_v19 = vpop.permute.xlu0 %156  }
  0xa1   :  { %v165_v20 = vpop.permute.xlu1 %164   ;;  %552 = vst.msk [vmem:[%s1294_s1 + $0x13] sm:$0x1] %vm7_vm0, %v157_v19   ;;  %553 = vst.msk [vmem:[%s1294_s1 + $0x52] sm:$0x2] %vm7_vm0, %v157_v19  }
  0xa2   :  { %554 = vst.msk [vmem:[%s1294_s1 + $0x14] sm:$0x1] %vm7_vm0, %v165_v20   ;;  %555 = vst.msk [vmem:[%s1294_s1 + $0x53] sm:$0x2] %vm7_vm0, %v165_v20  }
  0xa4   :  { %v173_v21 = vpop.permute.xlu0 %172  }
  0xa5   :  { %v181_v22 = vpop.permute.xlu1 %180   ;;  %556 = vst.msk [vmem:[%s1294_s1 + $0x15] sm:$0x1] %vm7_vm0, %v173_v21   ;;  %557 = vst.msk [vmem:[%s1294_s1 + $0x54] sm:$0x2] %vm7_vm0, %v173_v21  }
  0xa6   :  { %558 = vst.msk [vmem:[%s1294_s1 + $0x16] sm:$0x1] %vm7_vm0, %v181_v22   ;;  %559 = vst.msk [vmem:[%s1294_s1 + $0x55] sm:$0x2] %vm7_vm0, %v181_v22  }
  0xa8   :  { %v189_v23 = vpop.permute.xlu0 %188  }
  0xa9   :  { %v197_v24 = vpop.permute.xlu1 %196   ;;  %560 = vst.msk [vmem:[%s1294_s1 + $0x17] sm:$0x1] %vm7_vm0, %v189_v23   ;;  %561 = vst.msk [vmem:[%s1294_s1 + $0x56] sm:$0x2] %vm7_vm0, %v189_v23  }
  0xaa   :  { %562 = vst.msk [vmem:[%s1294_s1 + $0x18] sm:$0x1] %vm7_vm0, %v197_v24   ;;  %563 = vst.msk [vmem:[%s1294_s1 + $0x57] sm:$0x2] %vm7_vm0, %v197_v24  }
  0xac   :  { %v205_v25 = vpop.permute.xlu0 %204  }
  0xad   :  { %v213_v26 = vpop.permute.xlu1 %212   ;;  %564 = vst.msk [vmem:[%s1294_s1 + $0x19] sm:$0x1] %vm7_vm0, %v205_v25   ;;  %565 = vst.msk [vmem:[%s1294_s1 + $0x58] sm:$0x2] %vm7_vm0, %v205_v25  }
  0xae   :  { %566 = vst.msk [vmem:[%s1294_s1 + $0x1a] sm:$0x1] %vm7_vm0, %v213_v26   ;;  %567 = vst.msk [vmem:[%s1294_s1 + $0x59] sm:$0x2] %vm7_vm0, %v213_v26  }
  0xb0   :  { %v221_v27 = vpop.permute.xlu0 %220  }
  0xb1   :  { %v229_v28 = vpop.permute.xlu1 %228   ;;  %568 = vst.msk [vmem:[%s1294_s1 + $0x1b] sm:$0x1] %vm7_vm0, %v221_v27   ;;  %569 = vst.msk [vmem:[%s1294_s1 + $0x5a] sm:$0x2] %vm7_vm0, %v221_v27  }
  0xb2   :  { %570 = vst.msk [vmem:[%s1294_s1 + $0x1c] sm:$0x1] %vm7_vm0, %v229_v28   ;;  %571 = vst.msk [vmem:[%s1294_s1 + $0x5b] sm:$0x2] %vm7_vm0, %v229_v28  }
  0xb4   :  { %v237_v29 = vpop.permute.xlu0 %236  }
  0xb5   :  { %v245_v30 = vpop.permute.xlu1 %244   ;;  %572 = vst.msk [vmem:[%s1294_s1 + $0x1d] sm:$0x1] %vm7_vm0, %v237_v29   ;;  %573 = vst.msk [vmem:[%s1294_s1 + $0x5c] sm:$0x2] %vm7_vm0, %v237_v29  }
  0xb6   :  { %574 = vst.msk [vmem:[%s1294_s1 + $0x1e] sm:$0x1] %vm7_vm0, %v245_v30   ;;  %575 = vst.msk [vmem:[%s1294_s1 + $0x5d] sm:$0x2] %vm7_vm0, %v245_v30  }
  0xb8   :  { %v253_v31 = vpop.permute.xlu0 %252  }
  0xb9   :  { %v261_v32 = vpop.permute.xlu1 %260   ;;  %576 = vst.msk [vmem:[%s1294_s1 + $0x1f] sm:$0x1] %vm7_vm0, %v253_v31   ;;  %577 = vst.msk [vmem:[%s1294_s1 + $0x5e] sm:$0x2] %vm7_vm0, %v253_v31  }
  0xba   :  { %578 = vst.msk [vmem:[%s1294_s1 + $0x20] sm:$0x1] %vm7_vm0, %v261_v32   ;;  %579 = vst.msk [vmem:[%s1294_s1 + $0x5f] sm:$0x2] %vm7_vm0, %v261_v32  }
  0xbc   :  { %v269_v33 = vpop.permute.xlu0 %268  }
  0xbd   :  { %v277_v34 = vpop.permute.xlu1 %276   ;;  %580 = vst.msk [vmem:[%s1294_s1 + $0x21] sm:$0x1] %vm7_vm0, %v269_v33   ;;  %581 = vst.msk [vmem:[%s1294_s1 + $0x60] sm:$0x2] %vm7_vm0, %v269_v33  }
  0xbe   :  { %582 = vst.msk [vmem:[%s1294_s1 + $0x22] sm:$0x1] %vm7_vm0, %v277_v34   ;;  %583 = vst.msk [vmem:[%s1294_s1 + $0x61] sm:$0x2] %vm7_vm0, %v277_v34  }
  0xc0   :  { %v285_v35 = vpop.permute.xlu0 %284  }
  0xc1   :  { %v293_v36 = vpop.permute.xlu1 %292   ;;  %584 = vst.msk [vmem:[%s1294_s1 + $0x23] sm:$0x1] %vm7_vm0, %v285_v35   ;;  %585 = vst.msk [vmem:[%s1294_s1 + $0x62] sm:$0x2] %vm7_vm0, %v285_v35  }
  0xc2   :  { %586 = vst.msk [vmem:[%s1294_s1 + $0x24] sm:$0x1] %vm7_vm0, %v293_v36   ;;  %587 = vst.msk [vmem:[%s1294_s1 + $0x63] sm:$0x2] %vm7_vm0, %v293_v36  }
  0xc4   :  { %v301_v37 = vpop.permute.xlu0 %300  }
  0xc5   :  { %v309_v38 = vpop.permute.xlu1 %308   ;;  %588 = vst.msk [vmem:[%s1294_s1 + $0x25] sm:$0x1] %vm7_vm0, %v301_v37   ;;  %589 = vst.msk [vmem:[%s1294_s1 + $0x64] sm:$0x2] %vm7_vm0, %v301_v37  }
  0xc6   :  { %590 = vst.msk [vmem:[%s1294_s1 + $0x26] sm:$0x1] %vm7_vm0, %v309_v38   ;;  %591 = vst.msk [vmem:[%s1294_s1 + $0x65] sm:$0x2] %vm7_vm0, %v309_v38  }
  0xc8   :  { %v317_v39 = vpop.permute.xlu0 %316  }
  0xc9   :  { %v325_v40 = vpop.permute.xlu1 %324   ;;  %592 = vst.msk [vmem:[%s1294_s1 + $0x27] sm:$0x1] %vm7_vm0, %v317_v39   ;;  %593 = vst.msk [vmem:[%s1294_s1 + $0x66] sm:$0x2] %vm7_vm0, %v317_v39  }
  0xca   :  { %594 = vst.msk [vmem:[%s1294_s1 + $0x28] sm:$0x1] %vm7_vm0, %v325_v40   ;;  %595 = vst.msk [vmem:[%s1294_s1 + $0x67] sm:$0x2] %vm7_vm0, %v325_v40  }
  0xcc   :  { %v333_v41 = vpop.permute.xlu0 %332  }
  0xcd   :  { %v341_v42 = vpop.permute.xlu1 %340   ;;  %596 = vst.msk [vmem:[%s1294_s1 + $0x29] sm:$0x1] %vm7_vm0, %v333_v41   ;;  %597 = vst.msk [vmem:[%s1294_s1 + $0x68] sm:$0x2] %vm7_vm0, %v333_v41  }
  0xce   :  { %598 = vst.msk [vmem:[%s1294_s1 + $0x2a] sm:$0x1] %vm7_vm0, %v341_v42   ;;  %599 = vst.msk [vmem:[%s1294_s1 + $0x69] sm:$0x2] %vm7_vm0, %v341_v42  }
  0xd0   :  { %v349_v43 = vpop.permute.xlu0 %348  }
  0xd1   :  { %v357_v44 = vpop.permute.xlu1 %356   ;;  %600 = vst.msk [vmem:[%s1294_s1 + $0x2b] sm:$0x1] %vm7_vm0, %v349_v43   ;;  %601 = vst.msk [vmem:[%s1294_s1 + $0x6a] sm:$0x2] %vm7_vm0, %v349_v43  }
  0xd2   :  { %602 = vst.msk [vmem:[%s1294_s1 + $0x2c] sm:$0x1] %vm7_vm0, %v357_v44   ;;  %603 = vst.msk [vmem:[%s1294_s1 + $0x6b] sm:$0x2] %vm7_vm0, %v357_v44  }
  0xd4   :  { %v365_v45 = vpop.permute.xlu0 %364  }
  0xd5   :  { %v373_v46 = vpop.permute.xlu1 %372   ;;  %604 = vst.msk [vmem:[%s1294_s1 + $0x2d] sm:$0x1] %vm7_vm0, %v365_v45   ;;  %605 = vst.msk [vmem:[%s1294_s1 + $0x6c] sm:$0x2] %vm7_vm0, %v365_v45  }
  0xd6   :  { %606 = vst.msk [vmem:[%s1294_s1 + $0x2e] sm:$0x1] %vm7_vm0, %v373_v46   ;;  %607 = vst.msk [vmem:[%s1294_s1 + $0x6d] sm:$0x2] %vm7_vm0, %v373_v46  }
  0xd8   :  { %v381_v47 = vpop.permute.xlu0 %380  }
  0xd9   :  { %v389_v48 = vpop.permute.xlu1 %388   ;;  %608 = vst.msk [vmem:[%s1294_s1 + $0x2f] sm:$0x1] %vm7_vm0, %v381_v47   ;;  %609 = vst.msk [vmem:[%s1294_s1 + $0x6e] sm:$0x2] %vm7_vm0, %v381_v47  }
  0xda   :  { %610 = vst.msk [vmem:[%s1294_s1 + $0x30] sm:$0x1] %vm7_vm0, %v389_v48   ;;  %611 = vst.msk [vmem:[%s1294_s1 + $0x6f] sm:$0x2] %vm7_vm0, %v389_v48  }
  0xdc   :  { %v397_v49 = vpop.permute.xlu0 %396  }
  0xdd   :  { %v405_v50 = vpop.permute.xlu1 %404   ;;  %612 = vst.msk [vmem:[%s1294_s1 + $0x31] sm:$0x1] %vm7_vm0, %v397_v49   ;;  %613 = vst.msk [vmem:[%s1294_s1 + $0x70] sm:$0x2] %vm7_vm0, %v397_v49  }
  0xde   :  { %614 = vst.msk [vmem:[%s1294_s1 + $0x32] sm:$0x1] %vm7_vm0, %v405_v50   ;;  %615 = vst.msk [vmem:[%s1294_s1 + $0x71] sm:$0x2] %vm7_vm0, %v405_v50  }
  0xe0   :  { %v413_v51 = vpop.permute.xlu0 %412  }
  0xe1   :  { %v421_v52 = vpop.permute.xlu1 %420   ;;  %616 = vst.msk [vmem:[%s1294_s1 + $0x33] sm:$0x1] %vm7_vm0, %v413_v51   ;;  %617 = vst.msk [vmem:[%s1294_s1 + $0x72] sm:$0x2] %vm7_vm0, %v413_v51  }
  0xe2   :  { %618 = vst.msk [vmem:[%s1294_s1 + $0x34] sm:$0x1] %vm7_vm0, %v421_v52   ;;  %619 = vst.msk [vmem:[%s1294_s1 + $0x73] sm:$0x2] %vm7_vm0, %v421_v52  }
  0xe4   :  { %v429_v53 = vpop.permute.xlu0 %428  }
  0xe5   :  { %v437_v54 = vpop.permute.xlu1 %436   ;;  %620 = vst.msk [vmem:[%s1294_s1 + $0x35] sm:$0x1] %vm7_vm0, %v429_v53   ;;  %621 = vst.msk [vmem:[%s1294_s1 + $0x74] sm:$0x2] %vm7_vm0, %v429_v53  }
  0xe6   :  { %622 = vst.msk [vmem:[%s1294_s1 + $0x36] sm:$0x1] %vm7_vm0, %v437_v54   ;;  %623 = vst.msk [vmem:[%s1294_s1 + $0x75] sm:$0x2] %vm7_vm0, %v437_v54  }
  0xe8   :  { %v445_v55 = vpop.permute.xlu0 %444  }
  0xe9   :  { %v453_v56 = vpop.permute.xlu1 %452   ;;  %624 = vst.msk [vmem:[%s1294_s1 + $0x37] sm:$0x1] %vm7_vm0, %v445_v55   ;;  %625 = vst.msk [vmem:[%s1294_s1 + $0x76] sm:$0x2] %vm7_vm0, %v445_v55  }
  0xea   :  { %626 = vst.msk [vmem:[%s1294_s1 + $0x38] sm:$0x1] %vm7_vm0, %v453_v56   ;;  %627 = vst.msk [vmem:[%s1294_s1 + $0x77] sm:$0x2] %vm7_vm0, %v453_v56  }
  0xec   :  { %v461_v57 = vpop.permute.xlu0 %460  }
  0xed   :  { %v469_v58 = vpop.permute.xlu1 %468   ;;  %628 = vst.msk [vmem:[%s1294_s1 + $0x39] sm:$0x1] %vm7_vm0, %v461_v57   ;;  %629 = vst.msk [vmem:[%s1294_s1 + $0x78] sm:$0x2] %vm7_vm0, %v461_v57  }
  0xee   :  { %630 = vst.msk [vmem:[%s1294_s1 + $0x3a] sm:$0x1] %vm7_vm0, %v469_v58   ;;  %631 = vst.msk [vmem:[%s1294_s1 + $0x79] sm:$0x2] %vm7_vm0, %v469_v58  }
  0xf0   :  { %v477_v59 = vpop.permute.xlu0 %476  }
  0xf1   :  { %v485_v60 = vpop.permute.xlu1 %484   ;;  %632 = vst.msk [vmem:[%s1294_s1 + $0x3b] sm:$0x1] %vm7_vm0, %v477_v59   ;;  %633 = vst.msk [vmem:[%s1294_s1 + $0x7a] sm:$0x2] %vm7_vm0, %v477_v59  }
  0xf2   :  { %634 = vst.msk [vmem:[%s1294_s1 + $0x3c] sm:$0x1] %vm7_vm0, %v485_v60   ;;  %635 = vst.msk [vmem:[%s1294_s1 + $0x7b] sm:$0x2] %vm7_vm0, %v485_v60  }
  0xf4   :  { %v493_v61 = vpop.permute.xlu0 %492  }
  0xf5   :  { %v501_v62 = vpop.permute.xlu1 %500   ;;  %636 = vst.msk [vmem:[%s1294_s1 + $0x3d] sm:$0x1] %vm7_vm0, %v493_v61   ;;  %637 = vst.msk [vmem:[%s1294_s1 + $0x7c] sm:$0x2] %vm7_vm0, %v493_v61  }
  0xf6   :  { %638 = vst.msk [vmem:[%s1294_s1 + $0x3e] sm:$0x1] %vm7_vm0, %v501_v62   ;;  %639 = vst.msk [vmem:[%s1294_s1 + $0x7d] sm:$0x2] %vm7_vm0, %v501_v62  }
  0xf8   :  { %v509_v63 = vpop.permute.xlu0 %508  }
  0xf9   :  { %640 = vst.msk [vmem:[%s1294_s1 + $0x3f] sm:$0x1] %vm7_vm0, %v509_v63   ;;  %641 = vst.msk [vmem:[%s1294_s1 + $0x7e] sm:$0x2] %vm7_vm0, %v509_v63  }

// kernel: hgcn_mesh_regressor.1
= control target key start
LH: loop header
LB: loop body
LE: loop exit
PB: predicated region body
PF: predicated region fallthrough
CT: control target
= control target key end

     0   :  { %vm1313_vm0 = vcmask 384000   ;;  %vm1317_vm1 = vcmask 1046528   ;;  %vm1318_vm2 = vcmask 1047552   ;;  %vm1626_vm3 = vcmask 1045504   ;;  %s11526_s1 = inlined_call_operand.vmem [shape: bf16[431,431], index: 1, kind: input, shape index: {}]   ;;  %s11527_s0 = inlined_call_operand.vmem [shape: f32[6,431], index: 0, kind: input, shape index: {}]   ;;  %s11528_s3 = inlined_call_operand.vmem [shape: f32[128,1], index: 3, kind: input, shape index: {}]   ;;  %s11529_s5 = inlined_call_operand.vmem [shape: f32[6,1], index: 5, kind: input, shape index: {}]   ;;  %s11530_s2 = inlined_call_operand.vmem [shape: f32[128,6], index: 2, kind: input, shape index: {}]   ;;  %s11531_s6 = inlined_call_operand.vmem [shape: bf16[431,862], index: 6, kind: input, shape index: {}]   ;;  %s11532_s4 = inlined_call_operand.vmem [shape: f32[6,128], index: 4, kind: input, shape index: {}]   ;;  %s11533_s7 = inlined_call_operand.vmem [shape: bf16[431,1724], index: 7, kind: input, shape index: {}]   ;;  %s11534_s8 = inlined_call_operand.vmem [shape: f32[6,431], index: 8, kind: output, shape index: {0}]   ;;  %s11535_s9 = inlined_call_operand.vmem [shape: f32[6,862], index: 9, kind: output, shape index: {1}]   ;;  %s11536_s10 = inlined_call_operand.vmem [shape: f32[6,1724], index: 10, kind: output, shape index: {2}]  }
   0x1   :  { %v8542_v0 = vld [vmem:[%s11526_s1 + $0x4] ss:$16 sps:$4 sm:$0xff]   ;;  %v8547_v1 = vld [vmem:[%s11526_s1 + $0xc] ss:$16 sps:$4 sm:$0xff]   ;;  %v8553_v2 = vld [vmem:[%s11526_s1] ss:$16 sps:$4 sm:$0xff]  }
   0x2   :  { %1333 = vmatprep.subr.bf16.mxu0 %v8542_v0  ;;  %v8558_v3 = vld [vmem:[%s11526_s1 + $0x8] ss:$16 sps:$4 sm:$0xff]   ;;  %1415 = vmatprep.subr.bf16.mxu1 %v8547_v1  ;;  %v8564_v4 = vld [vmem:[%s11526_s1 + $0x24] ss:$16 sps:$4 sm:$0xff]   ;;  %v8571_v5 = vld [vmem:[%s11526_s1 + $0x2c] ss:$16 sps:$4 sm:$0xff]  }
   0x3   :  { %1334 = vmatpush1.bf16.msra.mxu0 %v8553_v2  ;;  %1416 = vmatpush1.bf16.msra.mxu1 %v8558_v3  ;;  %v8576_v6 = vld [vmem:[%s11526_s1 + $0x20] ss:$16 sps:$4 sm:$0xff]   ;;  %v8582_v7 = vld [vmem:[%s11526_s1 + $0x28] ss:$16 sps:$4 sm:$0xff]   ;;  %v8588_v8 = vld [vmem:[%s11526_s1 + $0x44] ss:$16 sps:$4 sm:$0xff]  }
   0x4   :  { %1335 = vmatprep.subr.bf16.mxu0 %v8564_v4  ;;  %1417 = vmatprep.subr.bf16.mxu1 %v8571_v5  ;;  %v8593_v9 = vld [vmem:[%s11526_s1 + $0x4c] ss:$16 sps:$4 sm:$0xff]   ;;  %v8598_v10 = vld [vmem:[%s11526_s1 + $0x40] ss:$16 sps:$4 sm:$0xff]   ;;  %v8603_v11 = vld [vmem:[%s11526_s1 + $0x48] ss:$16 sps:$4 sm:$0xff]  }
   0x5   :  { %v8610_v12 = vld [vmem:[%s11526_s1 + $0x64] ss:$16 sps:$4 sm:$0xff]   ;;  %v8617_v13 = vld [vmem:[%s11526_s1 + $0x6c] ss:$16 sps:$4 sm:$0xff]   ;;  %v8622_v14 = vld [vmem:[%s11526_s1 + $0x60] ss:$16 sps:$4 sm:$0xff]  }
   0x6   :  { %v8629_v15 = vld [vmem:[%s11526_s1 + $0x68] ss:$16 sps:$4 sm:$0xff]   ;;  %v8634_v16 = vld [vmem:[%s11526_s1 + $0x84] ss:$16 sps:$4 sm:$0xff]   ;;  %v8641_v17 = vld [vmem:[%s11526_s1 + $0x8c] ss:$16 sps:$4 sm:$0xff]  }
   0x7   :  { %1336 = vmatpush1.bf16.msra.mxu0 %v8576_v6  ;;  %1418 = vmatpush1.bf16.msra.mxu1 %v8582_v7  ;;  %v8646_v18 = vld [vmem:[%s11526_s1 + $0x80] ss:$16 sps:$4 sm:$0xff]   ;;  %v8651_v19 = vld [vmem:[%s11526_s1 + $0x88] ss:$16 sps:$4 sm:$0xff]   ;;  %v8658_v20 = vld [vmem:[%s11526_s1 + $0xa4] ss:$16 sps:$4 sm:$0xff]  }
   0x8   :  { %1337 = vmatprep.subr.bf16.mxu0 %v8588_v8  ;;  %1419 = vmatprep.subr.bf16.mxu1 %v8593_v9  ;;  %v8665_v21 = vld [vmem:[%s11526_s1 + $0xac] ss:$16 sps:$4 sm:$0xff]   ;;  %v8670_v22 = vld [vmem:[%s11526_s1 + $0xa0] ss:$16 sps:$4 sm:$0xff]   ;;  %v8677_v23 = vld [vmem:[%s11526_s1 + $0xa8] ss:$16 sps:$4 sm:$0xff]  }
   0x9   :  { %v8682_v24 = vld [vmem:[%s11526_s1 + $0xc4] ss:$16 sps:$4 sm:$0xff]   ;;  %v8689_v25 = vld [vmem:[%s11526_s1 + $0xcc] ss:$16 sps:$4 sm:$0xff]   ;;  %v8694_v26 = vld [vmem:[%s11526_s1 + $0xc0] ss:$16 sps:$4 sm:$0xff]  }
   0xa   :  { %v8699_v27 = vld [vmem:[%s11526_s1 + $0xc8] ss:$16 sps:$4 sm:$0xff]   ;;  %v8706_v28 = vld [vmem:[%s11526_s1 + $0xe4] ss:$16 sps:$4 sm:$0xff]   ;;  %v8713_v29 = vld [vmem:[%s11526_s1 + $0xec] ss:$16 sps:$4 sm:$0xff]  }
   0xb   :  { %1338 = vmatpush1.bf16.msra.mxu0 %v8598_v10  ;;  %1420 = vmatpush1.bf16.msra.mxu1 %v8603_v11  ;;  %v8718_v30 = vld [vmem:[%s11526_s1 + $0xe0] ss:$16 sps:$4 sm:$0xff]   ;;  %v8725_v31 = vld [vmem:[%s11526_s1 + $0xe8] ss:$16 sps:$4 sm:$0xff]   ;;  %v8730_v32 = vld [vmem:[%s11526_s1 + $0x104] ss:$16 sps:$4 sm:$0xff]  }
   0xc   :  { %1339 = vmatprep.subr.bf16.mxu0 %v8610_v12  ;;  %1421 = vmatprep.subr.bf16.mxu1 %v8617_v13  ;;  %v8737_v33 = vld [vmem:[%s11526_s1 + $0x10c] ss:$16 sps:$4 sm:$0xff]   ;;  %v8742_v34 = vld [vmem:[%s11526_s1 + $0x100] ss:$16 sps:$4 sm:$0xff]   ;;  %v8747_v35 = vld [vmem:[%s11526_s1 + $0x108] ss:$16 sps:$4 sm:$0xff]  }
   0xd   :  { %v8754_v36 = vld [vmem:[%s11526_s1 + $0x124] ss:$16 sps:$4 sm:$0xff]   ;;  %v8761_v37 = vld [vmem:[%s11526_s1 + $0x12c] ss:$16 sps:$4 sm:$0xff]   ;;  %v8766_v38 = vld [vmem:[%s11526_s1 + $0x120] ss:$16 sps:$4 sm:$0xff]  }
   0xe   :  { %v8773_v39 = vld [vmem:[%s11526_s1 + $0x128] ss:$16 sps:$4 sm:$0xff]   ;;  %v8778_v40 = vld [vmem:[%s11526_s1 + $0x144] ss:$16 sps:$4 sm:$0xff]   ;;  %v8785_v41 = vld [vmem:[%s11526_s1 + $0x14c] ss:$16 sps:$4 sm:$0xff]  }
   0xf   :  { %1340 = vmatpush1.bf16.msra.mxu0 %v8622_v14  ;;  %1422 = vmatpush1.bf16.msra.mxu1 %v8629_v15  ;;  %v8790_v42 = vld [vmem:[%s11526_s1 + $0x140] ss:$16 sps:$4 sm:$0xff]   ;;  %v8795_v43 = vld [vmem:[%s11526_s1 + $0x148] ss:$16 sps:$4 sm:$0xff]   ;;  %v8802_v44 = vld [vmem:[%s11526_s1 + $0x164] ss:$16 sps:$4 sm:$0xff]  }
  0x10   :  { %1341 = vmatprep.subr.bf16.mxu0 %v8634_v16  ;;  %1423 = vmatprep.subr.bf16.mxu1 %v8641_v17  ;;  %v8809_v45 = vld [vmem:[%s11526_s1 + $0x16c] ss:$16 sps:$4 sm:$0xff]   ;;  %v8817_v47 = vld [vmem:[%s11526_s1 + $0x160] ss:$16 sps:$4 sm:$0xff]   ;;  %v8824_v49 = vld [vmem:[%s11526_s1 + $0x168] ss:$16 sps:$4 sm:$0xff]  }
  0x11   :  { %v34_v46 = vld [vmem:[%s11527_s0 + $0x8] sm:$0x3f]  ;;  %v8831_v50 = vld [vmem:[%s11526_s1 + $0x184] ss:$16 sps:$4 sm:$0xff]   ;;  %v8843_v52 = vld [vmem:[%s11526_s1 + $0x180] ss:$16 sps:$4 sm:$0xff]  }
  0x12   :  { %v774_v48 = vpack.c.bf16 %v34_v46, %v34_v46  ;;  %v8836_v51 = vld [vmem:[%s11526_s1 + $0x18c] ss:$16 sps:$4 sm:$0xff]   ;;  %v8848_v53 = vld [vmem:[%s11526_s1 + $0x188] ss:$16 sps:$4 sm:$0xff]   ;;  %v8855_v54 = vld [vmem:[%s11526_s1 + $0x1a4] ss:$16 sps:$4 sm:$0xff]  }
  0x13   :  { %1342 = vmatpush1.bf16.msra.mxu0 %v8646_v18  ;;  %1424 = vmatpush1.bf16.msra.mxu1 %v8651_v19  ;;  %11598 = vst [vmem:[#allocation2_spill] sm:$0xff] %v8848_v53  ;;  %11599 = vst [vmem:[#allocation3_spill] sm:$0xff] %v8855_v54  ;;  %v8860_v55 = vld [vmem:[%s11526_s1 + $0x1ac] ss:$16 sps:$4 sm:$0xff]   ;;  %v8867_v56 = vld [vmem:[%s11526_s1 + $0x1a0] ss:$16 sps:$4 sm:$0xff]  }
  0x14   :  { %1343 = vmatprep.subr.bf16.mxu0 %v8658_v20  ;;  %1425 = vmatprep.subr.bf16.mxu1 %v8665_v21  ;;  %11600 = vst [vmem:[#allocation4_spill] sm:$0xff] %v8860_v55  ;;  %11601 = vst [vmem:[#allocation5_spill] sm:$0xff] %v8867_v56  ;;  %v8872_v57 = vld [vmem:[%s11526_s1 + $0x1a8] ss:$16 sps:$4 sm:$0xff]   ;;  %v8879_v58 = vld [vmem:[%s11526_s1 + $0x1c4] ss:$16 sps:$4 sm:$0xff]  }
  0x15   :  { %1365 = vmatprep.mubr.bf16.mxu0 %v774_v48  ;;  %1447 = vmatprep.mubr.bf16.mxu1 %v774_v48  ;;  %11602 = vst [vmem:[#allocation6_spill] sm:$0xff] %v8872_v57  ;;  %11603 = vst [vmem:[#allocation7_spill] sm:$0xff] %v8879_v58  ;;  %v8884_v59 = vld [vmem:[%s11526_s1 + $0x1cc] ss:$16 sps:$4 sm:$0xff]   ;;  %v8891_v60 = vld [vmem:[%s11526_s1 + $0x1c0] ss:$16 sps:$4 sm:$0xff]  }
  0x16   :  { %11604 = vst [vmem:[#allocation8_spill] sm:$0xff] %v8884_v59  ;;  %11605 = vst [vmem:[#allocation9_spill] sm:$0xff] %v8891_v60  ;;  %v8896_v61 = vld [vmem:[%s11526_s1 + $0x1c8] ss:$16 sps:$4 sm:$0xff]   ;;  %v8903_v62 = vld [vmem:[%s11526_s1 + $0x1e4] ss:$16 sps:$4 sm:$0xff]  }
  0x17   :  { %1344 = vmatpush1.bf16.msra.mxu0 %v8670_v22  ;;  %1426 = vmatpush1.bf16.msra.mxu1 %v8677_v23  ;;  %11606 = vst [vmem:[#allocation10_spill] sm:$0xff] %v8896_v61  ;;  %11607 = vst [vmem:[#allocation11_spill] sm:$0xff] %v8903_v62  ;;  %v8908_v63 = vld [vmem:[%s11526_s1 + $0x1ec] ss:$16 sps:$4 sm:$0xff]   ;;  %v8913_v46 = vld [vmem:[%s11526_s1 + $0x1e0] ss:$16 sps:$4 sm:$0xff]  }
  0x18   :  { %1345 = vmatprep.subr.bf16.mxu0 %v8682_v24  ;;  %1427 = vmatprep.subr.bf16.mxu1 %v8689_v25  ;;  %11608 = vst [vmem:[#allocation12_spill] sm:$0xff] %v8908_v63  ;;  %11609 = vst [vmem:[#allocation13_spill] sm:$0xff] %v8913_v46  ;;  %v8920_v48 = vld [vmem:[%s11526_s1 + $0x1e8] ss:$16 sps:$4 sm:$0xff]   ;;  %vm1577_vm4 = vcmask 48128   ;;  %vm6498_vm5 = vcmask 381952  }
  0x19   :  { %11610 = vst [vmem:[#allocation14_spill] sm:$0xff] %v8920_v48  ;;  %vm6506_vm6 = vcmask 766976   ;;  %vm6521_vm7 = vcmask 488448  }
  0x1b   :  { %1346 = vmatpush1.bf16.msra.mxu0 %v8694_v26  ;;  %1428 = vmatpush1.bf16.msra.mxu1 %v8699_v27 }
  0x1c   :  { %1347 = vmatprep.subr.bf16.mxu0 %v8706_v28  ;;  %1429 = vmatprep.subr.bf16.mxu1 %v8713_v29 }
  0x1f   :  { %1348 = vmatpush1.bf16.msra.mxu0 %v8718_v30  ;;  %1430 = vmatpush1.bf16.msra.mxu1 %v8725_v31 }
  0x20   :  { %1349 = vmatprep.subr.bf16.mxu0 %v8730_v32  ;;  %1431 = vmatprep.subr.bf16.mxu1 %v8737_v33 }
  0x23   :  { %1350 = vmatpush1.bf16.msra.mxu0 %v8742_v34  ;;  %1432 = vmatpush1.bf16.msra.mxu1 %v8747_v35 }
  0x24   :  { %1351 = vmatprep.subr.bf16.mxu0 %v8754_v36  ;;  %1433 = vmatprep.subr.bf16.mxu1 %v8761_v37 }
  0x27   :  { %1352 = vmatpush1.bf16.msra.mxu0 %v8766_v38  ;;  %1434 = vmatpush1.bf16.msra.mxu1 %v8773_v39 }
  0x28   :  { %1353 = vmatprep.subr.bf16.mxu0 %v8778_v40  ;;  %1435 = vmatprep.subr.bf16.mxu1 %v8785_v41 }
  0x2b   :  { %1354 = vmatpush1.bf16.msra.mxu0 %v8790_v42  ;;  %1436 = vmatpush1.bf16.msra.mxu1 %v8795_v43 }
  0x2c   :  { %1355 = vmatprep.subr.bf16.mxu0 %v8802_v44  ;;  %1437 = vmatprep.subr.bf16.mxu1 %v8809_v45 }
  0x2f   :  { %1356 = vmatpush1.bf16.msra.mxu0 %v8817_v47  ;;  %1438 = vmatpush1.bf16.msra.mxu1 %v8824_v49 }
  0x30   :  { %1357 = vmatprep.subr.bf16.mxu0 %v8831_v50  ;;  %1439 = vmatprep.subr.bf16.mxu1 %v8836_v51 }
  0x33   :  { %1358 = vmatpush1.bf16.msra.mxu0 %v8843_v52  ;;  %1440 = vmatpush1.bf16.msra.mxu1 %v8848_v53 }
  0x34   :  { %1359 = vmatprep.subr.bf16.mxu0 %v8855_v54  ;;  %1441 = vmatprep.subr.bf16.mxu1 %v8860_v55  ;;  %v7634_v55 = vld [vmem:[%s11526_s1 + $0x340] ss:$16 sps:$4 sm:$0xff]  }
  0x37   :  { %1360 = vmatpush1.bf16.msra.mxu0 %v8867_v56  ;;  %1442 = vmatpush1.bf16.msra.mxu1 %v8872_v57  ;;  %v9149_v57 = vld [vmem:[%s11526_s1 + $0x324] ss:$16 sps:$4 sm:$0xff]  }
  0x38   :  { %1361 = vmatprep.subr.bf16.mxu0 %v8879_v58  ;;  %1443 = vmatprep.subr.bf16.mxu1 %v8884_v59  ;;  %v33_v59 = vld [vmem:[%s11527_s0] sm:$0x3f] }
  0x39   :  { %v8930_v58 = vld [vmem:[%s11526_s1 + $0x204] ss:$16 sps:$4 sm:$0xff]  }
  0x3a   :  { %11611 = vst [vmem:[#allocation15_spill] sm:$0xff] %v8930_v58 }
  0x3b   :  { %1362 = vmatpush1.bf16.msra.mxu0 %v8891_v60  ;;  %1444 = vmatpush1.bf16.msra.mxu1 %v8896_v61  ;;  %v8935_v61 = vld [vmem:[%s11526_s1 + $0x20c] ss:$16 sps:$4 sm:$0xff]   ;;  %v773_v60 = vpack.c.bf16 %v33_v59, %v33_v59  ;;  %v8954_v59 = vld [vmem:[%s11526_s1 + $0x224] ss:$16 sps:$4 sm:$0xff]  }
  0x3c   :  { %1363 = vmatprep.subr.bf16.mxu0 %v8903_v62  ;;  %1445 = vmatprep.subr.bf16.mxu1 %v8908_v63  ;;  %11612 = vst [vmem:[#allocation16_spill] sm:$0xff] %v8935_v61  ;;  %v8942_v62 = vld [vmem:[%s11526_s1 + $0x200] ss:$16 sps:$4 sm:$0xff]   ;;  %v8947_v63 = vld [vmem:[%s11526_s1 + $0x208] ss:$16 sps:$4 sm:$0xff]   ;;  %11615 = vst [vmem:[#allocation19_spill] sm:$0xff] %v8954_v59 }
  0x3d   :  { %11613 = vst [vmem:[#allocation17_spill] sm:$0xff] %v8942_v62  ;;  %11614 = vst [vmem:[#allocation18_spill] sm:$0xff] %v8947_v63 }
  0x3f   :  { %1364 = vmatpush1.bf16.msra.mxu0 %v8913_v46  ;;  %1446 = vmatpush1.bf16.msra.mxu1 %v8920_v48  ;;  %v8959_v48 = vld [vmem:[%s11526_s1 + $0x22c] ss:$16 sps:$4 sm:$0xff]  }
  0x40   :  { %1374 = vmatprep.subr.bf16.mxu0 %v8930_v58  ;;  %1456 = vmatprep.subr.bf16.mxu1 %v8935_v61  ;;  %11616 = vst [vmem:[#allocation20_spill] sm:$0xff] %v8959_v48  ;;  %v8966_v61 = vld [vmem:[%s11526_s1 + $0x220] ss:$16 sps:$4 sm:$0xff]   ;;  %v8971_v58 = vld [vmem:[%s11526_s1 + $0x228] ss:$16 sps:$4 sm:$0xff]  }
  0x41   :  { %11617 = vst [vmem:[#allocation21_spill] sm:$0xff] %v8966_v61  ;;  %11618 = vst [vmem:[#allocation22_spill] sm:$0xff] %v8971_v58 }
  0x42   :  { %1366 = vmatmul.mubr.bf16.vlgmr.msra.gmra.mrb[0].mxu0 %v773_v60  ;;  %1448 = vmatmul.mubr.bf16.vlgmr.msra.gmra.mrb[0].mxu1 %v773_v60  ;;  %v8978_v60 = vld [vmem:[%s11526_s1 + $0x244] ss:$16 sps:$4 sm:$0xff]  }
  0x43   :  { %1375 = vmatpush1.bf16.msra.mxu0 %v8942_v62  ;;  %1457 = vmatpush1.bf16.msra.mxu1 %v8947_v63  ;;  %11619 = vst [vmem:[#allocation23_spill] sm:$0xff] %v8978_v60  ;;  %v8983_v63 = vld [vmem:[%s11526_s1 + $0x24c] ss:$16 sps:$4 sm:$0xff]  }
  0x44   :  { %1376 = vmatprep.subr.bf16.mxu0 %v8954_v59  ;;  %1458 = vmatprep.subr.bf16.mxu1 %v8959_v48  ;;  %11620 = vst [vmem:[#allocation24_spill] sm:$0xff] %v8983_v63  ;;  %v8990_v59 = vld [vmem:[%s11526_s1 + $0x240] ss:$16 sps:$4 sm:$0xff]   ;;  %v8995_v48 = vld [vmem:[%s11526_s1 + $0x248] ss:$16 sps:$4 sm:$0xff]  }
  0x45   :  { %11621 = vst [vmem:[#allocation25_spill] sm:$0xff] %v8990_v59  ;;  %11622 = vst [vmem:[#allocation26_spill] sm:$0xff] %v8995_v48  ;;  %v36_v62 = vld [vmem:[%s11527_s0 + $0x18] sm:$0x3f] }
  0x46   :  { %v776_v46 = vpack.c.bf16 %v36_v62, %v36_v62  ;;  %v9031_v62 = vld [vmem:[%s11526_s1 + $0x284] ss:$16 sps:$4 sm:$0xff]  }
  0x47   :  { %1377 = vmatpush1.bf16.msra.mxu0 %v8966_v61  ;;  %1459 = vmatpush1.bf16.msra.mxu1 %v8971_v58  ;;  %v9005_v58 = vld [vmem:[%s11526_s1 + $0x264] ss:$16 sps:$4 sm:$0xff]   ;;  %v9010_v61 = vld [vmem:[%s11526_s1 + $0x26c] ss:$16 sps:$4 sm:$0xff]   ;;  %11627 = vst [vmem:[#allocation31_spill] sm:$0xff] %v9031_v62 }
  0x48   :  { %1378 = vmatprep.subr.bf16.mxu0 %v8978_v60  ;;  %1460 = vmatprep.subr.bf16.mxu1 %v8983_v63  ;;  %11623 = vst [vmem:[#allocation27_spill] sm:$0xff] %v9005_v58  ;;  %11624 = vst [vmem:[#allocation28_spill] sm:$0xff] %v9010_v61  ;;  %v9019_v63 = vld [vmem:[%s11526_s1 + $0x260] ss:$16 sps:$4 sm:$0xff]   ;;  %v9024_v60 = vld [vmem:[%s11526_s1 + $0x268] ss:$16 sps:$4 sm:$0xff]  }
  0x49   :  { %6643 = vmatprep.mubr.msk.bf16.mxu0 %vm1313_vm0, %v776_v46  ;;  %6644 = vmatprep.mubr.msk.bf16.mxu1 %vm1313_vm0, %v776_v46  ;;  %11625 = vst [vmem:[#allocation29_spill] sm:$0xff] %v9019_v63  ;;  %11626 = vst [vmem:[#allocation30_spill] sm:$0xff] %v9024_v60  ;;  %v9036_v46 = vld [vmem:[%s11526_s1 + $0x28c] ss:$16 sps:$4 sm:$0xff]  }
  0x4a   :  { %11628 = vst [vmem:[#allocation32_spill] sm:$0xff] %v9036_v46 }
  0x4b   :  { %1379 = vmatpush1.bf16.msra.mxu0 %v8990_v59  ;;  %1461 = vmatpush1.bf16.msra.mxu1 %v8995_v48  ;;  %v9043_v48 = vld [vmem:[%s11526_s1 + $0x280] ss:$16 sps:$4 sm:$0xff]  }
  0x4c   :  { %1380 = vmatprep.subr.bf16.mxu0 %v9005_v58  ;;  %1462 = vmatprep.subr.bf16.mxu1 %v9010_v61  ;;  %11629 = vst [vmem:[#allocation33_spill] sm:$0xff] %v9043_v48  ;;  %v9048_v61 = vld [vmem:[%s11526_s1 + $0x288] ss:$16 sps:$4 sm:$0xff]   ;;  %v8481_v58 = vmov 65535  }
  0x4d   :  { %11630 = vst [vmem:[#allocation34_spill] sm:$0xff] %v9048_v61  ;;  %v1319_v59 = vsel %vm1317_vm1, 4294967295, %v8481_v58  ;;  %v9156_v58 = vld [vmem:[%s11526_s1 + $0x32c] ss:$16 sps:$4 sm:$0xff]  }
  0x4e   :  { %11647 = vst [vmem:[#allocation51_spill] sm:$0xff] %v9156_v58  ;;  %v9164_v56 = vsel %vm1318_vm2, %v1319_v59, 0  ;;  %v7637_v59 = vld [vmem:[%s11526_s1 + $0x348] ss:$16 sps:$4 sm:$0xff]  }
  0x4f   :  { %1381 = vmatpush1.bf16.msra.mxu0 %v9019_v63  ;;  %1463 = vmatpush1.bf16.msra.mxu1 %v9024_v60  ;;  %v9055_v63 = vld [vmem:[%s11526_s1 + $0x2a4] ss:$16 sps:$4 sm:$0xff]   ;;  %v9060_v60 = vld [vmem:[%s11526_s1 + $0x2ac] ss:$16 sps:$4 sm:$0xff]   ;;  %11648 = vst [vmem:[#allocation52_spill] sm:$0xff] %v9164_v56  ;;  %v9195_v54 = vand.u32 %v7634_v55, %v9164_v56  ;;  %v9198_v53 = vand.u32 %v7637_v59, %v9164_v56  ;;  %v11587_v55 = vmov 0.0  }
  0x50   :  { %1382 = vmatprep.subr.bf16.mxu0 %v9031_v62  ;;  %1464 = vmatprep.subr.bf16.mxu1 %v9036_v46  ;;  %11631 = vst [vmem:[#allocation35_spill] sm:$0xff] %v9055_v63  ;;  %11632 = vst [vmem:[#allocation36_spill] sm:$0xff] %v9060_v60  ;;  %v9067_v62 = vld [vmem:[%s11526_s1 + $0x2a0] ss:$16 sps:$4 sm:$0xff]   ;;  %v9072_v46 = vld [vmem:[%s11526_s1 + $0x2a8] ss:$16 sps:$4 sm:$0xff]  }
  0x51   :  { %11633 = vst [vmem:[#allocation37_spill] sm:$0xff] %v9067_v62  ;;  %11634 = vst [vmem:[#allocation38_spill] sm:$0xff] %v9072_v46  ;;  %v161_v59 = vld [vmem:[%s11528_s3] sm:$0xff] }
  0x52   :  { %11652 = vst [vmem:[#allocation56_spill] sm:$0xff] %v9195_v54  ;;  %11653 = vst [vmem:[#allocation57_spill] sm:$0xff] %v9198_v53 }
  0x53   :  { %1383 = vmatpush1.bf16.msra.mxu0 %v9043_v48  ;;  %1465 = vmatpush1.bf16.msra.mxu1 %v9048_v61  ;;  %v9079_v48 = vld [vmem:[%s11526_s1 + $0x2c4] ss:$16 sps:$4 sm:$0xff]   ;;  %v9084_v61 = vld [vmem:[%s11526_s1 + $0x2cc] ss:$16 sps:$4 sm:$0xff]  }
  0x54   :  { %1384 = vmatprep.subr.bf16.mxu0 %v9055_v63  ;;  %1466 = vmatprep.subr.bf16.mxu1 %v9060_v60  ;;  %11635 = vst [vmem:[#allocation39_spill] sm:$0xff] %v9079_v48  ;;  %11636 = vst [vmem:[#allocation40_spill] sm:$0xff] %v9084_v61  ;;  %v9091_v63 = vld [vmem:[%s11526_s1 + $0x2c0] ss:$16 sps:$4 sm:$0xff]   ;;  %v9096_v60 = vld [vmem:[%s11526_s1 + $0x2c8] ss:$16 sps:$4 sm:$0xff]  }
  0x55   :  { %11637 = vst [vmem:[#allocation41_spill] sm:$0xff] %v9091_v63  ;;  %11638 = vst [vmem:[#allocation42_spill] sm:$0xff] %v9096_v60 }
  0x57   :  { %1385 = vmatpush1.bf16.msra.mxu0 %v9067_v62  ;;  %1467 = vmatpush1.bf16.msra.mxu1 %v9072_v46  ;;  %v9103_v62 = vld [vmem:[%s11526_s1 + $0x2e4] ss:$16 sps:$4 sm:$0xff]   ;;  %v9108_v46 = vld [vmem:[%s11526_s1 + $0x2ec] ss:$16 sps:$4 sm:$0xff]  }
  0x58   :  { %1386 = vmatprep.subr.bf16.mxu0 %v9079_v48  ;;  %1468 = vmatprep.subr.bf16.mxu1 %v9084_v61  ;;  %11639 = vst [vmem:[#allocation43_spill] sm:$0xff] %v9103_v62  ;;  %11640 = vst [vmem:[#allocation44_spill] sm:$0xff] %v9108_v46  ;;  %v9115_v48 = vld [vmem:[%s11526_s1 + $0x2e0] ss:$16 sps:$4 sm:$0xff]   ;;  %v9120_v61 = vld [vmem:[%s11526_s1 + $0x2e8] ss:$16 sps:$4 sm:$0xff]  }
  0x59   :  { %11641 = vst [vmem:[#allocation45_spill] sm:$0xff] %v9115_v48  ;;  %11642 = vst [vmem:[#allocation46_spill] sm:$0xff] %v9120_v61 }
  0x5b   :  { %1387 = vmatpush1.bf16.msra.mxu0 %v9091_v63  ;;  %1469 = vmatpush1.bf16.msra.mxu1 %v9096_v60  ;;  %v9127_v63 = vld [vmem:[%s11526_s1 + $0x304] ss:$16 sps:$4 sm:$0xff]   ;;  %v9132_v60 = vld [vmem:[%s11526_s1 + $0x30c] ss:$16 sps:$4 sm:$0xff]  }
  0x5c   :  { %1388 = vmatprep.subr.bf16.mxu0 %v9103_v62  ;;  %1470 = vmatprep.subr.bf16.mxu1 %v9108_v46  ;;  %11643 = vst [vmem:[#allocation47_spill] sm:$0xff] %v9127_v63  ;;  %11644 = vst [vmem:[#allocation48_spill] sm:$0xff] %v9132_v60  ;;  %v9139_v46 = vld [vmem:[%s11526_s1 + $0x300] ss:$16 sps:$4 sm:$0xff]   ;;  %v9144_v62 = vld [vmem:[%s11526_s1 + $0x308] ss:$16 sps:$4 sm:$0xff]  }
  0x5d   :  { %11645 = vst [vmem:[#allocation49_spill] sm:$0xff] %v9139_v46  ;;  %11646 = vst [vmem:[#allocation50_spill] sm:$0xff] %v9144_v62 }
  0x5f   :  { %1389 = vmatpush1.bf16.msra.mxu0 %v9115_v48  ;;  %1471 = vmatpush1.bf16.msra.mxu1 %v9120_v61  ;;  %v7636_v61 = vld [vmem:[%s11526_s1 + $0x344] ss:$16 sps:$4 sm:$0xff]   ;;  %v7639_v48 = vld [vmem:[%s11526_s1 + $0x34c] ss:$16 sps:$4 sm:$0xff]  }
  0x60   :  { %1390 = vmatprep.subr.bf16.mxu0 %v9127_v63  ;;  %1472 = vmatprep.subr.bf16.mxu1 %v9132_v60  ;;  %v9169_v63 = vld [vmem:[%s11526_s1 + $0x320] ss:$16 sps:$4 sm:$0xff]   ;;  %v9176_v60 = vld [vmem:[%s11526_s1 + $0x328] ss:$16 sps:$4 sm:$0xff]  }
  0x61   :  { %11649 = vst [vmem:[#allocation53_spill] sm:$0xff] %v9176_v60 }
  0x63   :  { %1391 = vmatpush1.bf16.msra.mxu0 %v9139_v46  ;;  %1473 = vmatpush1.bf16.msra.mxu1 %v9144_v62  ;;  %v9187_v46 = vand.u32 %v7636_v61, %v9164_v56  ;;  %v9190_v62 = vand.u32 %v7639_v48, %v9164_v56  ;;  %v11589_v48 = vmov 0   ;;  %v166_v56 = vld [vmem:[%s11528_s3 + $0x28] sm:$0xff] }
  0x64   :  { %1392 = vmatprep.subr.bf16.mxu0 %v9149_v57  ;;  %1474 = vmatprep.subr.bf16.mxu1 %v9156_v58  ;;  %v35_v58 = vld [vmem:[%s11527_s0 + $0x10] sm:$0x3f] }
  0x65   :  { %11650 = vst [vmem:[#allocation54_spill] sm:$0xff] %v9187_v46  ;;  %11651 = vst [vmem:[#allocation55_spill] sm:$0xff] %v9190_v62  ;;  %v775_v61 = vpack.c.bf16 %v35_v58, %v35_v58  ;;  %7476 = vset.pattern.permute.xlu0 %v11589_v48  ;;  %7477 = vset.pattern.permute.xlu1 %v11589_v48  ;;  %v162_v58 = vld [vmem:[%s11528_s3 + $0x8] sm:$0xff]  ;;  %v167_v48 = vld [vmem:[%s11528_s3 + $0x30] sm:$0xff] }
  0x66   :  { %1499 = vperm.xlu0 %7476, %v161_v59   ;;  %v164_v59 = vld [vmem:[%s11528_s3 + $0x18] sm:$0xff] }
  0x67   :  { %1393 = vmatpush1.bf16.msra.mxu0 %v9169_v63  ;;  %1475 = vmatpush1.bf16.msra.mxu1 %v9176_v60  ;;  %v146_v60 = vld [vmem:[%s11530_s2 + $0x8] sm:$0xff] }
  0x68   :  { %1394 = vmatprep.subr.bf16.mxu0 %v9187_v46  ;;  %1476 = vmatprep.subr.bf16.mxu1 %v9190_v62 }
  0x6a   :  { %1504 = vperm.xlu0 %7476, %v162_v58   ;;  %v169_v58 = vld [vmem:[%s11528_s3 + $0x40] sm:$0xff] }
  0x6b   :  { %1395 = vmatpush1.bf16.msra.mxu0 %v9195_v54  ;;  %1477 = vmatpush1.bf16.msra.mxu1 %v9198_v53  ;;  %v145_v54 = vld [vmem:[%s11530_s2] sm:$0xff] }
  0x6e   :  { %1407 = vmatmul.mubr.bf16.vlgmr.msra.gmra.mrb[0].mxu0 %v775_v61  ;;  %1489 = vmatmul.mubr.bf16.vlgmr.msra.gmra.mrb[0].mxu1 %v775_v61  ;;  %v165_v61 = vld [vmem:[%s11528_s3 + $0x20] sm:$0xff] }
  0x6f   :  { %1703 = vmatprep.mubr.f32.mxu0 %v11587_v55  ;;  %1864 = vmatprep.mubr.f32.mxu1 %v11587_v55  ;;  %v163_v55 = vld [vmem:[%s11528_s3 + $0x10] sm:$0xff] }
  0x70   :  { %1519 = vperm.xlu0 %7476, %v165_v61   ;;  %1509 = vperm.xlu1 %7477, %v163_v55   ;;  %v171_v55 = vld [vmem:[%s11528_s3 + $0x50] sm:$0xff]  ;;  %v168_v61 = vld [vmem:[%s11528_s3 + $0x38] sm:$0xff] }
  0x74   :  { %1529 = vperm.xlu0 %7476, %v167_v48   ;;  %1514 = vperm.xlu1 %7477, %v164_v59   ;;  %v173_v48 = vld [vmem:[%s11528_s3 + $0x60] sm:$0xff]  ;;  %v170_v59 = vld [vmem:[%s11528_s3 + $0x48] sm:$0xff] }
  0x78   :  { %1539 = vperm.xlu0 %7476, %v169_v58   ;;  %1524 = vperm.xlu1 %7477, %v166_v56   ;;  %v175_v56 = vld [vmem:[%s11528_s3 + $0x70] sm:$0xff]  ;;  %v172_v58 = vld [vmem:[%s11528_s3 + $0x58] sm:$0xff] }
  0x7c   :  { %1549 = vperm.xlu0 %7476, %v171_v55   ;;  %1534 = vperm.xlu1 %7477, %v168_v61   ;;  %v178_v55 = vld [vmem:[%s11529_s5] sm:$0x3f]  ;;  %v174_v61 = vld [vmem:[%s11528_s3 + $0x68] sm:$0xff] }
  0x80   :  { %1559 = vperm.xlu0 %7476, %v173_v48   ;;  %1544 = vperm.xlu1 %7477, %v170_v59   ;;  %v176_v48 = vld [vmem:[%s11528_s3 + $0x78] sm:$0xff] }
  0x84   :  { %1569 = vperm.xlu0 %7476, %v175_v56   ;;  %1554 = vperm.xlu1 %7477, %v172_v58  }
  0x88   :  { %2535 = vperm.xlu0 %7476, %v178_v55   ;;  %1564 = vperm.xlu1 %7477, %v174_v61  }
  0x8c   :  { %1574 = vperm.xlu1 %7477, %v176_v48   ;;  %v11654_v48 = vmov 0.0  }
 0x141   :  { %v1408_v59 = vpop.f32.mrb[0].mxu0  ;;  %v1490_v53 = vpop.f32.mrb[0].mxu1 }
 0x142   :  { %v1410_v56 = vpop.f32.mrb[1].mxu0  ;;  %v1492_v58 = vpop.f32.mrb[1].mxu1 }
 0x143   :  { %v1412_v62 = vpop.f32.mrb[2].mxu0  ;;  %6645 = vmatprep.subr.msk.mxu0 %vm1626_vm3, %v1410_v56  ;;  %6663 = vmatprep.subr.msk.mxu1 %vm1626_vm3, %v1492_v58  ;;  %v1494_v55 = vpop.f32.mrb[2].mxu1 }
 0x144   :  { %v1413_v61 = vpop.f32.mrb[3].mxu0  ;;  %6646 = vmatpush1.msk.msra.mxu0 %vm1626_vm3, %v1408_v59  ;;  %6664 = vmatpush1.msk.msra.mxu1 %vm1626_vm3, %v1490_v53  ;;  %v1495_v46 = vpop.f32.mrb[3].mxu1  ;;  %v147_v53 = vld [vmem:[%s11530_s2 + $0x10] sm:$0xff] }
 0x145   :  { %6647 = vmatmul.mubr.msk.f32.vlgmr.msra.gmra.mrb[4].mxu0 %vm1577_vm4, %v145_v54  ;;  %6665 = vmatmul.mubr.msk.f32.vlgmr.msra.gmra.mrb[4].mxu1 %vm1577_vm4, %v145_v54 }
 0x146   :  { %1709 = vmatprep.mubr.f32.mxu0 %v11654_v48  ;;  %1870 = vmatprep.mubr.f32.mxu1 %v11654_v48 }
 0x147   :  { %2081 = vmatprep.subr.bf16.mxu0 %v8542_v0  ;;  %2307 = vmatprep.subr.bf16.mxu1 %v8547_v1  ;;  %v148_v0 = vld [vmem:[%s11530_s2 + $0x18] sm:$0xff]  ;;  %v149_v1 = vld [vmem:[%s11530_s2 + $0x20] sm:$0xff] }
 0x148   :  { %2082 = vmatpush1.bf16.msra.mxu0 %v8553_v2  ;;  %2308 = vmatpush1.bf16.msra.mxu1 %v8558_v3  ;;  %v150_v2 = vld [vmem:[%s11530_s2 + $0x28] sm:$0xff]  ;;  %v151_v3 = vld [vmem:[%s11530_s2 + $0x30] sm:$0xff] }
 0x149   :  { %6648 = vmatmul.mubr.msk.f32.gmra.mrb[6].mxu0 %vm1577_vm4, %v146_v60  ;;  %6666 = vmatmul.mubr.msk.f32.gmra.mrb[6].mxu1 %vm1577_vm4, %v146_v60 }
 0x14a   :  { %1715 = vmatprep.mubr.f32.mxu0 %v11654_v48  ;;  %1876 = vmatprep.mubr.f32.mxu1 %v11654_v48 }
 0x14b   :  { %2083 = vmatprep.subr.bf16.mxu0 %v8564_v4  ;;  %2309 = vmatprep.subr.bf16.mxu1 %v8571_v5  ;;  %v152_v4 = vld [vmem:[%s11530_s2 + $0x38] sm:$0xff]  ;;  %v153_v5 = vld [vmem:[%s11530_s2 + $0x40] sm:$0xff] }
 0x14c   :  { %2084 = vmatpush1.bf16.msra.mxu0 %v8576_v6  ;;  %2310 = vmatpush1.bf16.msra.mxu1 %v8582_v7  ;;  %v154_v6 = vld [vmem:[%s11530_s2 + $0x48] sm:$0xff]  ;;  %v155_v7 = vld [vmem:[%s11530_s2 + $0x50] sm:$0xff] }
 0x14d   :  { %6649 = vmatmul.mubr.msk.f32.gmra.mrb[8].mxu0 %vm1577_vm4, %v147_v53  ;;  %6667 = vmatmul.mubr.msk.f32.gmra.mrb[8].mxu1 %vm1577_vm4, %v147_v53 }
 0x14e   :  { %1721 = vmatprep.mubr.f32.mxu0 %v11654_v48  ;;  %1882 = vmatprep.mubr.f32.mxu1 %v11654_v48 }
 0x14f   :  { %2085 = vmatprep.subr.bf16.mxu0 %v8588_v8  ;;  %2311 = vmatprep.subr.bf16.mxu1 %v8593_v9  ;;  %v156_v8 = vld [vmem:[%s11530_s2 + $0x58] sm:$0xff]  ;;  %v157_v9 = vld [vmem:[%s11530_s2 + $0x60] sm:$0xff] }
 0x150   :  { %2086 = vmatpush1.bf16.msra.mxu0 %v8598_v10  ;;  %2312 = vmatpush1.bf16.msra.mxu1 %v8603_v11  ;;  %v158_v10 = vld [vmem:[%s11530_s2 + $0x68] sm:$0xff]  ;;  %v11655_v11 = vld [vmem:[#allocation2_spill] sm:$0xff] }
 0x151   :  { %6650 = vmatmul.mubr.msk.f32.gmra.mrb[10].mxu0 %vm1577_vm4, %v148_v0  ;;  %6668 = vmatmul.mubr.msk.f32.gmra.mrb[10].mxu1 %vm1577_vm4, %v148_v0 }
 0x152   :  { %1727 = vmatprep.mubr.f32.mxu0 %v11654_v48  ;;  %1888 = vmatprep.mubr.f32.mxu1 %v11654_v48 }
 0x153   :  { %2087 = vmatprep.subr.bf16.mxu0 %v8610_v12  ;;  %2313 = vmatprep.subr.bf16.mxu1 %v8617_v13  ;;  %v159_v12 = vld [vmem:[%s11530_s2 + $0x70] sm:$0xff]  ;;  %v11656_v13 = vld [vmem:[#allocation3_spill] sm:$0xff] }
 0x154   :  { %2088 = vmatpush1.bf16.msra.mxu0 %v8622_v14  ;;  %2314 = vmatpush1.bf16.msra.mxu1 %v8629_v15  ;;  %v11657_v14 = vld [vmem:[#allocation4_spill] sm:$0xff]  ;;  %v11658_v15 = vld [vmem:[#allocation5_spill] sm:$0xff] }
 0x155   :  { %6651 = vmatmul.mubr.msk.f32.gmra.mrb[12].mxu0 %vm1577_vm4, %v149_v1  ;;  %6669 = vmatmul.mubr.msk.f32.gmra.mrb[12].mxu1 %vm1577_vm4, %v149_v1 }
 0x156   :  { %1733 = vmatprep.mubr.f32.mxu0 %v11654_v48  ;;  %1894 = vmatprep.mubr.f32.mxu1 %v11654_v48 }
 0x157   :  { %2089 = vmatprep.subr.bf16.mxu0 %v8634_v16  ;;  %2315 = vmatprep.subr.bf16.mxu1 %v8641_v17  ;;  %v11659_v16 = vld [vmem:[#allocation6_spill] sm:$0xff]  ;;  %v160_v17 = vld [vmem:[%s11530_s2 + $0x78] sm:$0xff] }
 0x158   :  { %2090 = vmatpush1.bf16.msra.mxu0 %v8646_v18  ;;  %2316 = vmatpush1.bf16.msra.mxu1 %v8651_v19  ;;  %v11660_v18 = vld [vmem:[#allocation7_spill] sm:$0xff]  ;;  %v11661_v19 = vld [vmem:[#allocation8_spill] sm:$0xff] }
 0x159   :  { %6652 = vmatmul.mubr.msk.f32.gmra.mrb[14].mxu0 %vm1577_vm4, %v150_v2  ;;  %6670 = vmatmul.mubr.msk.f32.gmra.mrb[14].mxu1 %vm1577_vm4, %v150_v2 }
 0x15a   :  { %1739 = vmatprep.mubr.f32.mxu0 %v11654_v48  ;;  %1900 = vmatprep.mubr.f32.mxu1 %v11654_v48 }
 0x15b   :  { %2091 = vmatprep.subr.bf16.mxu0 %v8658_v20  ;;  %2317 = vmatprep.subr.bf16.mxu1 %v8665_v21  ;;  %v11662_v20 = vld [vmem:[#allocation9_spill] sm:$0xff]  ;;  %v11663_v21 = vld [vmem:[#allocation10_spill] sm:$0xff] }
 0x15c   :  { %2092 = vmatpush1.bf16.msra.mxu0 %v8670_v22  ;;  %2318 = vmatpush1.bf16.msra.mxu1 %v8677_v23  ;;  %v11664_v22 = vld [vmem:[#allocation11_spill] sm:$0xff]  ;;  %v11665_v23 = vld [vmem:[#allocation12_spill] sm:$0xff] }
 0x15d   :  { %6653 = vmatmul.mubr.msk.f32.gmra.mrb[16].mxu0 %vm1577_vm4, %v151_v3  ;;  %6671 = vmatmul.mubr.msk.f32.gmra.mrb[16].mxu1 %vm1577_vm4, %v151_v3 }
 0x15e   :  { %1745 = vmatprep.mubr.f32.mxu0 %v11654_v48  ;;  %1906 = vmatprep.mubr.f32.mxu1 %v11654_v48 }
 0x15f   :  { %2093 = vmatprep.subr.bf16.mxu0 %v8682_v24  ;;  %2319 = vmatprep.subr.bf16.mxu1 %v8689_v25  ;;  %v11666_v24 = vld [vmem:[#allocation13_spill] sm:$0xff]  ;;  %v11667_v25 = vld [vmem:[#allocation14_spill] sm:$0xff] }
 0x160   :  { %2094 = vmatpush1.bf16.msra.mxu0 %v8694_v26  ;;  %2320 = vmatpush1.bf16.msra.mxu1 %v8699_v27  ;;  %v11668_v26 = vld [vmem:[#allocation15_spill] sm:$0xff]  ;;  %v11669_v27 = vld [vmem:[#allocation16_spill] sm:$0xff] }
 0x161   :  { %6654 = vmatmul.mubr.msk.f32.gmra.mrb[18].mxu0 %vm1577_vm4, %v152_v4  ;;  %6672 = vmatmul.mubr.msk.f32.gmra.mrb[18].mxu1 %vm1577_vm4, %v152_v4 }
 0x162   :  { %1751 = vmatprep.mubr.f32.mxu0 %v11654_v48  ;;  %1912 = vmatprep.mubr.f32.mxu1 %v11654_v48 }
 0x163   :  { %2095 = vmatprep.subr.bf16.mxu0 %v8706_v28  ;;  %2321 = vmatprep.subr.bf16.mxu1 %v8713_v29  ;;  %v1500_v28 = vpop.permute.xlu0 %1499 }
 0x164   :  { %2096 = vmatpush1.bf16.msra.mxu0 %v8718_v30  ;;  %2322 = vmatpush1.bf16.msra.mxu1 %v8725_v31 }
 0x165   :  { %6655 = vmatmul.mubr.msk.f32.gmra.mrb[20].mxu0 %vm1577_vm4, %v153_v5  ;;  %6673 = vmatmul.mubr.msk.f32.gmra.mrb[20].mxu1 %vm1577_vm4, %v153_v5 }
 0x166   :  { %1757 = vmatprep.mubr.f32.mxu0 %v11654_v48  ;;  %1918 = vmatprep.mubr.f32.mxu1 %v11654_v48 }
 0x167   :  { %2097 = vmatprep.subr.bf16.mxu0 %v8730_v32  ;;  %2323 = vmatprep.subr.bf16.mxu1 %v8737_v33  ;;  %v1505_v33 = vpop.permute.xlu0 %1504 }
 0x168   :  { %2098 = vmatpush1.bf16.msra.mxu0 %v8742_v34  ;;  %2324 = vmatpush1.bf16.msra.mxu1 %v8747_v35  ;;  %v1510_v34 = vpop.permute.xlu1 %1509 }
 0x169   :  { %6656 = vmatmul.mubr.msk.f32.gmra.mrb[22].mxu0 %vm1577_vm4, %v154_v6  ;;  %6674 = vmatmul.mubr.msk.f32.gmra.mrb[22].mxu1 %vm1577_vm4, %v154_v6 }
 0x16a   :  { %1763 = vmatprep.mubr.f32.mxu0 %v11654_v48  ;;  %1924 = vmatprep.mubr.f32.mxu1 %v11654_v48 }
 0x16b   :  { %2099 = vmatprep.subr.bf16.mxu0 %v8754_v36  ;;  %2325 = vmatprep.subr.bf16.mxu1 %v8761_v37 }
 0x16c   :  { %2100 = vmatpush1.bf16.msra.mxu0 %v8766_v38  ;;  %2326 = vmatpush1.bf16.msra.mxu1 %v8773_v39  ;;  %v1515_v2 = vpop.permute.xlu1 %1514 }
 0x16d   :  { %6657 = vmatmul.mubr.msk.f32.gmra.mrb[24].mxu0 %vm1577_vm4, %v155_v7  ;;  %6675 = vmatmul.mubr.msk.f32.gmra.mrb[24].mxu1 %vm1577_vm4, %v155_v7 }
 0x16e   :  { %1769 = vmatprep.mubr.f32.mxu0 %v11654_v48  ;;  %1930 = vmatprep.mubr.f32.mxu1 %v11654_v48 }
 0x16f   :  { %2101 = vmatprep.subr.bf16.mxu0 %v8778_v40  ;;  %2327 = vmatprep.subr.bf16.mxu1 %v8785_v41 }
 0x170   :  { %2102 = vmatpush1.bf16.msra.mxu0 %v8790_v42  ;;  %2328 = vmatpush1.bf16.msra.mxu1 %v8795_v43 }
 0x171   :  { %6658 = vmatmul.mubr.msk.f32.gmra.mrb[26].mxu0 %vm1577_vm4, %v156_v8  ;;  %6676 = vmatmul.mubr.msk.f32.gmra.mrb[26].mxu1 %vm1577_vm4, %v156_v8 }
 0x172   :  { %1775 = vmatprep.mubr.f32.mxu0 %v11654_v48  ;;  %1936 = vmatprep.mubr.f32.mxu1 %v11654_v48 }
 0x173   :  { %2103 = vmatprep.subr.bf16.mxu0 %v8802_v44  ;;  %2329 = vmatprep.subr.bf16.mxu1 %v8809_v45 }
 0x174   :  { %2104 = vmatpush1.bf16.msra.mxu0 %v8817_v47  ;;  %2330 = vmatpush1.bf16.msra.mxu1 %v8824_v49 }
 0x175   :  { %6659 = vmatmul.mubr.msk.f32.gmra.mrb[28].mxu0 %vm1577_vm4, %v157_v9  ;;  %6677 = vmatmul.mubr.msk.f32.gmra.mrb[28].mxu1 %vm1577_vm4, %v157_v9 }
 0x176   :  { %1781 = vmatprep.mubr.f32.mxu0 %v11654_v48  ;;  %1942 = vmatprep.mubr.f32.mxu1 %v11654_v48 }
 0x177   :  { %2105 = vmatprep.subr.bf16.mxu0 %v8831_v50  ;;  %2331 = vmatprep.subr.bf16.mxu1 %v8836_v51 }
 0x178   :  { %2106 = vmatpush1.bf16.msra.mxu0 %v8843_v52  ;;  %2332 = vmatpush1.bf16.msra.mxu1 %v11655_v11 }
 0x179   :  { %6660 = vmatmul.mubr.msk.f32.gmra.mrb[30].mxu0 %vm1577_vm4, %v158_v10  ;;  %6678 = vmatmul.mubr.msk.f32.gmra.mrb[30].mxu1 %vm1577_vm4, %v158_v10 }
 0x17a   :  { %1787 = vmatprep.mubr.f32.mxu0 %v11654_v48  ;;  %1948 = vmatprep.mubr.f32.mxu1 %v11654_v48 }
 0x17b   :  { %2107 = vmatprep.subr.bf16.mxu0 %v11656_v13  ;;  %2333 = vmatprep.subr.bf16.mxu1 %v11657_v14 }
 0x17c   :  { %2108 = vmatpush1.bf16.msra.mxu0 %v11658_v15  ;;  %2334 = vmatpush1.bf16.msra.mxu1 %v11659_v16  ;;  %v11670_v15 = vld [vmem:[#allocation17_spill] sm:$0xff]  ;;  %v11671_v16 = vld [vmem:[#allocation18_spill] sm:$0xff] }
 0x17d   :  { %6661 = vmatmul.mubr.msk.f32.gmra.mrb[32].mxu0 %vm1577_vm4, %v159_v12  ;;  %6679 = vmatmul.mubr.msk.f32.gmra.mrb[32].mxu1 %vm1577_vm4, %v159_v12 }
 0x17e   :  { %1793 = vmatprep.mubr.f32.mxu0 %v11654_v48  ;;  %1954 = vmatprep.mubr.f32.mxu1 %v11654_v48 }
 0x17f   :  { %2109 = vmatprep.subr.bf16.mxu0 %v11660_v18  ;;  %2335 = vmatprep.subr.bf16.mxu1 %v11661_v19 }
 0x180   :  { %2110 = vmatpush1.bf16.msra.mxu0 %v11662_v20  ;;  %2336 = vmatpush1.bf16.msra.mxu1 %v11663_v21  ;;  %v11672_v21 = vld [vmem:[#allocation19_spill] sm:$0xff] }
 0x181   :  { %6662 = vmatmul.mubr.msk.f32.gmra.mrb[34].mxu0 %vm1577_vm4, %v160_v17  ;;  %6680 = vmatmul.mubr.msk.f32.gmra.mrb[34].mxu1 %vm1577_vm4, %v160_v17 }
 0x182   :  { %2111 = vmatprep.subr.bf16.mxu0 %v11664_v22  ;;  %2337 = vmatprep.subr.bf16.mxu1 %v11665_v23  ;;  %v11673_v22 = vld [vmem:[#allocation20_spill] sm:$0xff] }
 0x184   :  { %2112 = vmatpush1.bf16.msra.mxu0 %v11666_v24  ;;  %2338 = vmatpush1.bf16.msra.mxu1 %v11667_v25 }
 0x185   :  { %2194 = vmatprep.subr.bf16.mxu0 %v11668_v26  ;;  %2420 = vmatprep.subr.bf16.mxu1 %v11669_v27 }
 0x218   :  { %v1705_v29 = vpop.f32.mrb[4].mxu0  ;;  %v1866_v30 = vpop.f32.mrb[4].mxu1 }
 0x219   :  { %v1707_v31 = vpop.f32.mrb[5].mxu0  ;;  %v1868_v32 = vpop.f32.mrb[5].mxu1  ;;  %v1706_v35 = vadd.f32 %v1705_v29, %v1500_v28  ;;  %v1867_v36 = vadd.f32 %v1866_v30, %v1500_v28 }
 0x21a   :  { %v1708_v37 = vadd.f32 %v1707_v31, %v1500_v28  ;;  %v1869_v38 = vadd.f32 %v1868_v32, %v1500_v28 }
 0x21b   :  { %v1961_v49 = vmax.f32 %v1706_v35, 0.0  ;;  %v1963_v50 = vmax.f32 %v1867_v36, 0.0  ;;  %v11674_v36 = vld [vmem:[#allocation21_spill] sm:$0xff] }
 0x21c   :  { %v1711_v39 = vpop.f32.mrb[6].mxu0  ;;  %v1872_v40 = vpop.f32.mrb[6].mxu1  ;;  %v1962_v54 = vmax.f32 %v1708_v37, 0.0  ;;  %v1964_v60 = vmax.f32 %v1869_v38, 0.0 }
 0x21d   :  { %v1712_v41 = vadd.f32 %v1711_v39, %v1505_v33  ;;  %v1873_v42 = vadd.f32 %v1872_v40, %v1505_v33  ;;  %v1713_v43 = vpop.f32.mrb[7].mxu0  ;;  %v1874_v44 = vpop.f32.mrb[7].mxu1  ;;  %v11675_v40 = vld [vmem:[#allocation23_spill] sm:$0xff] }
 0x21e   :  { %v1714_v45 = vadd.f32 %v1713_v43, %v1505_v33  ;;  %v1875_v47 = vadd.f32 %v1874_v44, %v1505_v33  ;;  %v1520_v33 = vpop.permute.xlu0 %1519  ;;  %v1525_v37 = vpop.permute.xlu1 %1524 }
 0x21f   :  { %v1965_v51 = vmax.f32 %v1712_v41, 0.0  ;;  %v1967_v52 = vmax.f32 %v1873_v42, 0.0  ;;  %v11676_v41 = vld [vmem:[#allocation22_spill] sm:$0xff] }
 0x220   :  { %v1966_v62 = vmax.f32 %v1714_v45, 0.0  ;;  %v1968_v46 = vmax.f32 %v1875_v47, 0.0  ;;  %v1717_v59 = vpop.f32.mrb[8].mxu0  ;;  %v1878_v56 = vpop.f32.mrb[8].mxu1 }
 0x221   :  { %v2025_v58 = vpack.c.bf16 %v1965_v51, %v1961_v49  ;;  %v9438_v55 = vpack.c.bf16 %v1967_v52, %v1963_v50  ;;  %v1719_v61 = vpop.f32.mrb[9].mxu0  ;;  %v1880_v53 = vpop.f32.mrb[9].mxu1  ;;  %v1718_v3 = vadd.f32 %v1717_v59, %v1510_v34  ;;  %v1879_v4 = vadd.f32 %v1878_v56, %v1510_v34 }
 0x222   :  { %v2026_v0 = vpack.c.bf16 %v1966_v62, %v1962_v54  ;;  %v9440_v1 = vpack.c.bf16 %v1968_v46, %v1964_v60  ;;  %v1720_v5 = vadd.f32 %v1719_v61, %v1510_v34  ;;  %v1881_v6 = vadd.f32 %v1880_v53, %v1510_v34  ;;  %v11677_v60 = vld [vmem:[#allocation25_spill] sm:$0xff]  ;;  %v11678_v62 = vld [vmem:[#allocation24_spill] sm:$0xff]  ;;  %v11679_v61 = vld [vmem:[#allocation27_spill] sm:$0xff] }
 0x223   :  { %v1969_v17 = vmax.f32 %v1718_v3, 0.0  ;;  %v1971_v18 = vmax.f32 %v1879_v4, 0.0  ;;  %v11680_v53 = vld [vmem:[#allocation26_spill] sm:$0xff] }
 0x224   :  { %v1723_v7 = vpop.f32.mrb[10].mxu0  ;;  %v1884_v8 = vpop.f32.mrb[10].mxu1  ;;  %2113 = vmatprep.mubr.bf16.mxu0 %v2026_v0  ;;  %2339 = vmatprep.mubr.bf16.mxu1 %v2026_v0  ;;  %v1970_v23 = vmax.f32 %v1720_v5, 0.0  ;;  %v1972_v24 = vmax.f32 %v1881_v6, 0.0 }
 0x225   :  { %v1724_v9 = vadd.f32 %v1723_v7, %v1515_v2  ;;  %v1885_v10 = vadd.f32 %v1884_v8, %v1515_v2  ;;  %v1725_v11 = vpop.f32.mrb[11].mxu0  ;;  %v1886_v12 = vpop.f32.mrb[11].mxu1  ;;  %2114 = vmatmul.mubr.bf16.vlgmr.msra.gmra.mrb[36].mxu0 %v2025_v58  ;;  %2340 = vmatmul.mubr.bf16.vlgmr.msra.gmra.mrb[36].mxu1 %v2025_v58  ;;  %v11681_v7 = vld [vmem:[#allocation28_spill] sm:$0xff] }
 0x226   :  { %v1726_v13 = vadd.f32 %v1725_v11, %v1515_v2  ;;  %v1887_v14 = vadd.f32 %v1886_v12, %v1515_v2  ;;  %2195 = vmatpush1.bf16.msra.mxu0 %v11670_v15  ;;  %2421 = vmatpush1.bf16.msra.mxu1 %v11671_v16  ;;  %v1530_v12 = vpop.permute.xlu0 %1529  ;;  %v11682_v15 = vld [vmem:[#allocation29_spill] sm:$0xff]  ;;  %v1535_v16 = vpop.permute.xlu1 %1534 }
 0x227   :  { %v1973_v19 = vmax.f32 %v1724_v9, 0.0  ;;  %v1975_v20 = vmax.f32 %v1885_v10, 0.0  ;;  %2196 = vmatprep.subr.bf16.mxu0 %v11672_v21  ;;  %2422 = vmatprep.subr.bf16.mxu1 %v11673_v22 }
 0x228   :  { %v1974_v25 = vmax.f32 %v1726_v13, 0.0  ;;  %v1976_v26 = vmax.f32 %v1887_v14, 0.0  ;;  %v1729_v27 = vpop.f32.mrb[12].mxu0  ;;  %v1890_v28 = vpop.f32.mrb[12].mxu1 }
 0x229   :  { %v2029_v29 = vpack.c.bf16 %v1973_v19, %v1969_v17  ;;  %v9446_v30 = vpack.c.bf16 %v1975_v20, %v1971_v18  ;;  %v1731_v31 = vpop.f32.mrb[13].mxu0  ;;  %v1892_v32 = vpop.f32.mrb[13].mxu1  ;;  %v1730_v38 = vadd.f32 %v1729_v27, %v1520_v33  ;;  %v1891_v39 = vadd.f32 %v1890_v28, %v1520_v33  ;;  %v11683_v19 = vld [vmem:[#allocation31_spill] sm:$0xff]  ;;  %v11684_v20 = vld [vmem:[#allocation30_spill] sm:$0xff] }
 0x22a   :  { %v2030_v34 = vpack.c.bf16 %v1974_v25, %v1970_v23  ;;  %v9448_v35 = vpack.c.bf16 %v1976_v26, %v1972_v24  ;;  %2197 = vmatpush1.bf16.msra.mxu0 %v11674_v36  ;;  %2423 = vmatpush1.bf16.msra.mxu1 %v11676_v41  ;;  %v1732_v42 = vadd.f32 %v1731_v31, %v1520_v33 }
 0x22b   :  { %2198 = vmatprep.subr.bf16.mxu0 %v11675_v40  ;;  %v1893_v43 = vadd.f32 %v1892_v32, %v1520_v33  ;;  %2424 = vmatprep.subr.bf16.mxu1 %v11678_v62  ;;  %v1977_v46 = vmax.f32 %v1730_v38, 0.0  ;;  %v1979_v59 = vmax.f32 %v1891_v39, 0.0  ;;  %v11685_v32 = vld [vmem:[#allocation33_spill] sm:$0xff]  ;;  %v11686_v33 = vld [vmem:[#allocation32_spill] sm:$0xff]  ;;  %v11687_v39 = vld [vmem:[#allocation35_spill] sm:$0xff] }
 0x22c   :  { %v1735_v44 = vpop.f32.mrb[14].mxu0  ;;  %v1896_v45 = vpop.f32.mrb[14].mxu1  ;;  %2123 = vmatprep.mubr.bf16.mxu0 %v2030_v34  ;;  %2349 = vmatprep.mubr.bf16.mxu1 %v2030_v34  ;;  %v1978_v0 = vmax.f32 %v1732_v42, 0.0  ;;  %v11688_v40 = vld [vmem:[#allocation34_spill] sm:$0xff] }
 0x22d   :  { %v1736_v47 = vadd.f32 %v1735_v44, %v1525_v37  ;;  %v1897_v49 = vadd.f32 %v1896_v45, %v1525_v37  ;;  %v1737_v50 = vpop.f32.mrb[15].mxu0  ;;  %v1898_v51 = vpop.f32.mrb[15].mxu1  ;;  %2124 = vmatmul.mubr.bf16.gmra.mrb[40].mxu0 %v2029_v29  ;;  %2350 = vmatmul.mubr.bf16.gmra.mrb[40].mxu1 %v2029_v29  ;;  %v1980_v2 = vmax.f32 %v1893_v43, 0.0 }
 0x22e   :  { %v1738_v52 = vadd.f32 %v1737_v50, %v1525_v37  ;;  %v1899_v54 = vadd.f32 %v1898_v51, %v1525_v37  ;;  %2199 = vmatpush1.bf16.msra.mxu0 %v11677_v60  ;;  %2425 = vmatpush1.bf16.msra.mxu1 %v11680_v53  ;;  %v1540_v60 = vpop.permute.xlu0 %1539  ;;  %v11691_v53 = vld [vmem:[#allocation39_spill] sm:$0xff] }
 0x22f   :  { %v1981_v56 = vmax.f32 %v1736_v47, 0.0  ;;  %v1983_v58 = vmax.f32 %v1897_v49, 0.0  ;;  %2200 = vmatprep.subr.bf16.mxu0 %v11679_v61  ;;  %2426 = vmatprep.subr.bf16.mxu1 %v11681_v7  ;;  %v11689_v49 = vld [vmem:[#allocation36_spill] sm:$0xff] }
 0x230   :  { %v1982_v3 = vmax.f32 %v1738_v52, 0.0  ;;  %v1984_v4 = vmax.f32 %v1899_v54, 0.0  ;;  %v1741_v5 = vpop.f32.mrb[16].mxu0  ;;  %v1902_v6 = vpop.f32.mrb[16].mxu1 }
 0x231   :  { %v2033_v8 = vpack.c.bf16 %v1981_v56, %v1977_v46  ;;  %v9458_v9 = vpack.c.bf16 %v1983_v58, %v1979_v59  ;;  %v1743_v10 = vpop.f32.mrb[17].mxu0  ;;  %v1904_v11 = vpop.f32.mrb[17].mxu1  ;;  %v1742_v17 = vadd.f32 %v1741_v5, %v1530_v12  ;;  %v1903_v18 = vadd.f32 %v1902_v6, %v1530_v12  ;;  %v11690_v59 = vld [vmem:[#allocation37_spill] sm:$0xff] }
 0x232   :  { %v2034_v13 = vpack.c.bf16 %v1982_v3, %v1978_v0  ;;  %v9460_v14 = vpack.c.bf16 %v1984_v4, %v1980_v2  ;;  %2201 = vmatpush1.bf16.msra.mxu0 %v11682_v15  ;;  %2427 = vmatpush1.bf16.msra.mxu1 %v11684_v20  ;;  %v1744_v21 = vadd.f32 %v1743_v10, %v1530_v12  ;;  %v1545_v56 = vpop.permute.xlu1 %1544  ;;  %v11692_v0 = vld [vmem:[#allocation38_spill] sm:$0xff]  ;;  %v11694_v15 = vld [vmem:[#allocation40_spill] sm:$0xff] }
 0x233   :  { %2202 = vmatprep.subr.bf16.mxu0 %v11683_v19  ;;  %v1905_v22 = vadd.f32 %v1904_v11, %v1530_v12  ;;  %2428 = vmatprep.subr.bf16.mxu1 %v11686_v33  ;;  %v1985_v34 = vmax.f32 %v1742_v17, 0.0  ;;  %v1987_v36 = vmax.f32 %v1903_v18, 0.0  ;;  %v11695_v20 = vld [vmem:[#allocation42_spill] sm:$0xff] }
 0x234   :  { %v1747_v23 = vpop.f32.mrb[18].mxu0  ;;  %v1908_v24 = vpop.f32.mrb[18].mxu1  ;;  %2133 = vmatprep.mubr.bf16.mxu0 %v2034_v13  ;;  %2359 = vmatprep.mubr.bf16.mxu1 %v2034_v13  ;;  %v1986_v41 = vmax.f32 %v1744_v21, 0.0  ;;  %v11693_v13 = vld [vmem:[#allocation41_spill] sm:$0xff]  ;;  %v11696_v21 = vld [vmem:[#allocation43_spill] sm:$0xff] }
 0x235   :  { %v1748_v25 = vadd.f32 %v1747_v23, %v1535_v16  ;;  %v1909_v26 = vadd.f32 %v1908_v24, %v1535_v16  ;;  %v1749_v27 = vpop.f32.mrb[19].mxu0  ;;  %v1910_v28 = vpop.f32.mrb[19].mxu1  ;;  %2134 = vmatmul.mubr.bf16.gmra.mrb[44].mxu0 %v2033_v8  ;;  %2360 = vmatmul.mubr.bf16.gmra.mrb[44].mxu1 %v2033_v8  ;;  %v1988_v42 = vmax.f32 %v1905_v22, 0.0 }
 0x236   :  { %v1750_v29 = vadd.f32 %v1749_v27, %v1535_v16  ;;  %v1911_v31 = vadd.f32 %v1910_v28, %v1535_v16  ;;  %2203 = vmatpush1.bf16.msra.mxu0 %v11685_v32  ;;  %2429 = vmatpush1.bf16.msra.mxu1 %v11688_v40  ;;  %v11697_v28 = vld [vmem:[#allocation44_spill] sm:$0xff] }
 0x237   :  { %v1989_v37 = vmax.f32 %v1748_v25, 0.0  ;;  %v1991_v38 = vmax.f32 %v1909_v26, 0.0  ;;  %2204 = vmatprep.subr.bf16.mxu0 %v11687_v39  ;;  %2430 = vmatprep.subr.bf16.mxu1 %v11689_v49  ;;  %v1555_v39 = vpop.permute.xlu1 %1554 }
 0x238   :  { %v1990_v43 = vmax.f32 %v1750_v29, 0.0  ;;  %v1992_v44 = vmax.f32 %v1911_v31, 0.0  ;;  %v1753_v45 = vpop.f32.mrb[20].mxu0  ;;  %v1914_v47 = vpop.f32.mrb[20].mxu1 }
 0x239   :  { %v2037_v50 = vpack.c.bf16 %v1989_v37, %v1985_v34  ;;  %v9470_v51 = vpack.c.bf16 %v1991_v38, %v1987_v36  ;;  %v1755_v52 = vpop.f32.mrb[21].mxu0  ;;  %v1916_v54 = vpop.f32.mrb[21].mxu1  ;;  %v1754_v58 = vadd.f32 %v1753_v45, %v1540_v60  ;;  %v1915_v61 = vadd.f32 %v1914_v47, %v1540_v60  ;;  %v11698_v38 = vld [vmem:[#allocation45_spill] sm:$0xff] }
 0x23a   :  { %v2038_v62 = vpack.c.bf16 %v1990_v43, %v1986_v41  ;;  %v9472_v46 = vpack.c.bf16 %v1992_v44, %v1988_v42  ;;  %2205 = vmatpush1.bf16.msra.mxu0 %v11690_v59  ;;  %2431 = vmatpush1.bf16.msra.mxu1 %v11692_v0  ;;  %v1756_v2 = vadd.f32 %v1755_v52, %v1540_v60  ;;  %v1550_v34 = vpop.permute.xlu0 %1549  ;;  %v11699_v42 = vld [vmem:[#allocation46_spill] sm:$0xff]  ;;  %v11700_v43 = vld [vmem:[#allocation47_spill] sm:$0xff] }
 0x23b   :  { %2206 = vmatprep.subr.bf16.mxu0 %v11691_v53  ;;  %v1917_v3 = vadd.f32 %v1916_v54, %v1540_v60  ;;  %2432 = vmatprep.subr.bf16.mxu1 %v11694_v15  ;;  %v1993_v16 = vmax.f32 %v1754_v58, 0.0  ;;  %v1995_v17 = vmax.f32 %v1915_v61, 0.0  ;;  %v11702_v58 = vld [vmem:[#allocation49_spill] sm:$0xff] }
 0x23c   :  { %v1759_v4 = vpop.f32.mrb[22].mxu0  ;;  %v1920_v5 = vpop.f32.mrb[22].mxu1  ;;  %2143 = vmatprep.mubr.bf16.mxu0 %v2038_v62  ;;  %2369 = vmatprep.mubr.bf16.mxu1 %v2038_v62  ;;  %v1994_v22 = vmax.f32 %v1756_v2, 0.0 }
 0x23d   :  { %v1760_v6 = vadd.f32 %v1759_v4, %v1545_v56  ;;  %v1921_v7 = vadd.f32 %v1920_v5, %v1545_v56  ;;  %v1761_v8 = vpop.f32.mrb[23].mxu0  ;;  %v1922_v10 = vpop.f32.mrb[23].mxu1  ;;  %2144 = vmatmul.mubr.bf16.gmra.mrb[48].mxu0 %v2037_v50  ;;  %2370 = vmatmul.mubr.bf16.gmra.mrb[48].mxu1 %v2037_v50  ;;  %v1996_v23 = vmax.f32 %v1917_v3, 0.0  ;;  %v11703_v3 = vld [vmem:[#allocation50_spill] sm:$0xff] }
 0x23e   :  { %v1762_v11 = vadd.f32 %v1761_v8, %v1545_v56  ;;  %v1923_v12 = vadd.f32 %v1922_v10, %v1545_v56  ;;  %2207 = vmatpush1.bf16.msra.mxu0 %v11693_v13  ;;  %2433 = vmatpush1.bf16.msra.mxu1 %v11695_v20  ;;  %v11701_v56 = vld [vmem:[#allocation48_spill] sm:$0xff] }
 0x23f   :  { %v1997_v18 = vmax.f32 %v1760_v6, 0.0  ;;  %v1999_v19 = vmax.f32 %v1921_v7, 0.0  ;;  %2208 = vmatprep.subr.bf16.mxu0 %v11696_v21  ;;  %2434 = vmatprep.subr.bf16.mxu1 %v11697_v28 }
 0x240   :  { %v1998_v24 = vmax.f32 %v1762_v11, 0.0  ;;  %v2000_v25 = vmax.f32 %v1923_v12, 0.0  ;;  %v1765_v26 = vpop.f32.mrb[24].mxu0  ;;  %v1926_v27 = vpop.f32.mrb[24].mxu1  ;;  %v11704_v11 = vld [vmem:[#allocation51_spill] sm:$0xff] }
 0x241   :  { %v2041_v29 = vpack.c.bf16 %v1997_v18, %v1993_v16  ;;  %v9482_v31 = vpack.c.bf16 %v1999_v19, %v1995_v17  ;;  %v1767_v32 = vpop.f32.mrb[25].mxu0  ;;  %v1928_v33 = vpop.f32.mrb[25].mxu1  ;;  %v1766_v40 = vadd.f32 %v1765_v26, %v1550_v34  ;;  %v1927_v41 = vadd.f32 %v1926_v27, %v1550_v34 }
 0x242   :  { %v2042_v36 = vpack.c.bf16 %v1998_v24, %v1994_v22  ;;  %v9484_v37 = vpack.c.bf16 %v2000_v25, %v1996_v23  ;;  %2209 = vmatpush1.bf16.msra.mxu0 %v11698_v38  ;;  %2435 = vmatpush1.bf16.msra.mxu1 %v11699_v42  ;;  %v1768_v44 = vadd.f32 %v1767_v32, %v1550_v34  ;;  %v1560_v17 = vpop.permute.xlu0 %1559  ;;  %v11705_v22 = vld [vmem:[#allocation53_spill] sm:$0xff]  ;;  %v11706_v23 = vld [vmem:[#allocation54_spill] sm:$0xff]  ;;  %v11708_v38 = vld [vmem:[#allocation56_spill] sm:$0xff] }
 0x243   :  { %2210 = vmatprep.subr.bf16.mxu0 %v11700_v43  ;;  %v1929_v45 = vadd.f32 %v1928_v33, %v1550_v34  ;;  %2436 = vmatprep.subr.bf16.mxu1 %v11701_v56  ;;  %v2001_v61 = vmax.f32 %v1766_v40, 0.0  ;;  %v2003_v53 = vmax.f32 %v1927_v41, 0.0  ;;  %v11709_v43 = vld [vmem:[#allocation57_spill] sm:$0xff] }
 0x244   :  { %v1771_v47 = vpop.f32.mrb[26].mxu0  ;;  %v1932_v49 = vpop.f32.mrb[26].mxu1  ;;  %2153 = vmatprep.mubr.bf16.mxu0 %v2042_v36  ;;  %2379 = vmatprep.mubr.bf16.mxu1 %v2042_v36  ;;  %v2002_v4 = vmax.f32 %v1768_v44, 0.0  ;;  %v11707_v36 = vld [vmem:[#allocation55_spill] sm:$0xff] }
 0x245   :  { %v1772_v50 = vadd.f32 %v1771_v47, %v1555_v39  ;;  %v1933_v52 = vadd.f32 %v1932_v49, %v1555_v39  ;;  %v1773_v54 = vpop.f32.mrb[27].mxu0  ;;  %v1934_v60 = vpop.f32.mrb[27].mxu1  ;;  %2154 = vmatmul.mubr.bf16.gmra.mrb[52].mxu0 %v2041_v29  ;;  %2380 = vmatmul.mubr.bf16.gmra.mrb[52].mxu1 %v2041_v29  ;;  %v2004_v5 = vmax.f32 %v1929_v45, 0.0 }
 0x246   :  { %v1774_v62 = vadd.f32 %v1773_v54, %v1555_v39  ;;  %v1935_v59 = vadd.f32 %v1934_v60, %v1555_v39  ;;  %2211 = vmatpush1.bf16.msra.mxu0 %v11702_v58  ;;  %2437 = vmatpush1.bf16.msra.mxu1 %v11703_v3  ;;  %v1570_v56 = vpop.permute.xlu0 %1569 }
 0x247   :  { %v2005_v0 = vmax.f32 %v1772_v50, 0.0  ;;  %v2007_v2 = vmax.f32 %v1933_v52, 0.0  ;;  %2212 = vmatprep.subr.bf16.mxu0 %v9149_v57  ;;  %2438 = vmatprep.subr.bf16.mxu1 %v11704_v11  ;;  %v1565_v57 = vpop.permute.xlu1 %1564 }
 0x248   :  { %v2006_v6 = vmax.f32 %v1774_v62, 0.0  ;;  %v2008_v7 = vmax.f32 %v1935_v59, 0.0  ;;  %v1777_v8 = vpop.f32.mrb[28].mxu0  ;;  %v1938_v10 = vpop.f32.mrb[28].mxu1 }
 0x249   :  { %v2045_v12 = vpack.c.bf16 %v2005_v0, %v2001_v61  ;;  %v9494_v13 = vpack.c.bf16 %v2007_v2, %v2003_v53  ;;  %v1779_v15 = vpop.f32.mrb[29].mxu0  ;;  %v1940_v16 = vpop.f32.mrb[29].mxu1  ;;  %v1778_v20 = vadd.f32 %v1777_v8, %v1560_v17  ;;  %v1939_v21 = vadd.f32 %v1938_v10, %v1560_v17 }
 0x24a   :  { %v2046_v18 = vpack.c.bf16 %v2006_v6, %v2002_v4  ;;  %v9496_v19 = vpack.c.bf16 %v2008_v7, %v2004_v5  ;;  %2213 = vmatpush1.bf16.msra.mxu0 %v9169_v63  ;;  %2439 = vmatpush1.bf16.msra.mxu1 %v11705_v22  ;;  %v1780_v24 = vadd.f32 %v1779_v15, %v1560_v17 }
 0x24b   :  { %2214 = vmatprep.subr.bf16.mxu0 %v11706_v23  ;;  %v1941_v25 = vadd.f32 %v1940_v16, %v1560_v17  ;;  %2440 = vmatprep.subr.bf16.mxu1 %v11707_v36  ;;  %v2009_v39 = vmax.f32 %v1778_v20, 0.0  ;;  %v2011_v40 = vmax.f32 %v1939_v21, 0.0  ;;  %v1575_v53 = vpop.permute.xlu1 %1574  ;;  %v7693_v36 = vld [vmem:[%s11531_s6 + $0x1cc] ss:$28 sps:$4 sm:$0xff]  }
 0x24c   :  { %v1783_v26 = vpop.f32.mrb[30].mxu0  ;;  %v1944_v27 = vpop.f32.mrb[30].mxu1  ;;  %2163 = vmatprep.mubr.bf16.mxu0 %v2046_v18  ;;  %2389 = vmatprep.mubr.bf16.mxu1 %v2046_v18  ;;  %v2010_v44 = vmax.f32 %v1780_v24, 0.0 }
 0x24d   :  { %v1784_v28 = vadd.f32 %v1783_v26, %v1565_v57  ;;  %v1945_v29 = vadd.f32 %v1944_v27, %v1565_v57  ;;  %v1785_v32 = vpop.f32.mrb[31].mxu0  ;;  %v1946_v33 = vpop.f32.mrb[31].mxu1  ;;  %2164 = vmatmul.mubr.bf16.gmra.mrb[56].mxu0 %v2045_v12  ;;  %2390 = vmatmul.mubr.bf16.gmra.mrb[56].mxu1 %v2045_v12  ;;  %v2012_v45 = vmax.f32 %v1941_v25, 0.0 }
 0x24e   :  { %v1786_v63 = vadd.f32 %v1785_v32, %v1565_v57  ;;  %v1947_v34 = vadd.f32 %v1946_v33, %v1565_v57  ;;  %2215 = vmatpush1.bf16.msra.mxu0 %v11708_v38  ;;  %2441 = vmatpush1.bf16.msra.mxu1 %v11709_v43  ;;  %v7687_v32 = vld [vmem:[%s11531_s6 + $0x194] ss:$28 sps:$4 sm:$0xff]  }
 0x24f   :  { %v2013_v41 = vmax.f32 %v1784_v28, 0.0  ;;  %v2015_v42 = vmax.f32 %v1945_v29, 0.0  ;;  %v7681_v28 = vld [vmem:[%s11531_s6 + $0x15c] ss:$28 sps:$4 sm:$0xff]  }
 0x250   :  { %v2014_v47 = vmax.f32 %v1786_v63, 0.0  ;;  %v2016_v49 = vmax.f32 %v1947_v34, 0.0  ;;  %v1789_v50 = vpop.f32.mrb[32].mxu0  ;;  %v1950_v52 = vpop.f32.mrb[32].mxu1  ;;  %v7679_v29 = vld [vmem:[%s11531_s6 + $0x158] ss:$28 sps:$4 sm:$0xff]  }
 0x251   :  { %v2049_v54 = vpack.c.bf16 %v2013_v41, %v2009_v39  ;;  %v9504_v60 = vpack.c.bf16 %v2015_v42, %v2011_v40  ;;  %v1791_v62 = vpop.f32.mrb[33].mxu0  ;;  %v1952_v59 = vpop.f32.mrb[33].mxu1  ;;  %v1790_v0 = vadd.f32 %v1789_v50, %v1570_v56  ;;  %v1951_v2 = vadd.f32 %v1950_v52, %v1570_v56  ;;  %v7685_v34 = vld [vmem:[%s11531_s6 + $0x190] ss:$28 sps:$4 sm:$0xff]   ;;  %v7691_v50 = vld [vmem:[%s11531_s6 + $0x1c8] ss:$28 sps:$4 sm:$0xff]  }
 0x252   :  { %v2050_v58 = vpack.c.bf16 %v2014_v47, %v2010_v44  ;;  %v2052_v61 = vpack.c.bf16 %v2016_v49, %v2012_v45  ;;  %v1792_v3 = vadd.f32 %v1791_v62, %v1570_v56  ;;  %v1953_v4 = vadd.f32 %v1952_v59, %v1570_v56  ;;  %v7699_v52 = vld [vmem:[%s11531_s6 + $0x204] ss:$28 sps:$4 sm:$0xff]   ;;  %v7705_v59 = vld [vmem:[%s11531_s6 + $0x23c] ss:$28 sps:$4 sm:$0xff]  }
 0x253   :  { %v2017_v16 = vmax.f32 %v1790_v0, 0.0  ;;  %v2019_v17 = vmax.f32 %v1951_v2, 0.0  ;;  %v7697_v62 = vld [vmem:[%s11531_s6 + $0x200] ss:$28 sps:$4 sm:$0xff]  }
 0x254   :  { %v1795_v5 = vpop.f32.mrb[34].mxu0  ;;  %v1956_v6 = vpop.f32.mrb[34].mxu1  ;;  %2173 = vmatprep.mubr.bf16.mxu0 %v2050_v58  ;;  %2399 = vmatprep.mubr.bf16.mxu1 %v2050_v58  ;;  %v2018_v20 = vmax.f32 %v1792_v3, 0.0  ;;  %v2020_v21 = vmax.f32 %v1953_v4, 0.0 }
 0x255   :  { %v1796_v7 = vadd.f32 %v1795_v5, %v1575_v53  ;;  %v1957_v8 = vadd.f32 %v1956_v6, %v1575_v53  ;;  %v1797_v10 = vpop.f32.mrb[35].mxu0  ;;  %v1958_v11 = vpop.f32.mrb[35].mxu1  ;;  %2174 = vmatmul.mubr.bf16.gmra.mrb[60].mxu0 %v2049_v54  ;;  %2400 = vmatmul.mubr.bf16.gmra.mrb[60].mxu1 %v2049_v54 }
 0x256   :  { %v1798_v12 = vadd.f32 %v1797_v10, %v1575_v53  ;;  %v1959_v15 = vadd.f32 %v1958_v11, %v1575_v53 }
 0x257   :  { %v2021_v18 = vmax.f32 %v1796_v7, 0.0  ;;  %v2023_v57 = vmax.f32 %v1957_v8, 0.0  ;;  %v7703_v7 = vld [vmem:[%s11531_s6 + $0x238] ss:$28 sps:$4 sm:$0xff]  }
 0x258   :  { %v2022_v22 = vmax.f32 %v1798_v12, 0.0  ;;  %v2024_v23 = vmax.f32 %v1959_v15, 0.0  ;;  %v7711_v8 = vld [vmem:[%s11531_s6 + $0x274] ss:$28 sps:$4 sm:$0xff]   ;;  %v7717_v15 = vld [vmem:[%s11531_s6 + $0x2ac] ss:$28 sps:$4 sm:$0xff]  }
 0x259   :  { %v2053_v24 = vpack.c.bf16 %v2021_v18, %v2017_v16  ;;  %v2055_v25 = vpack.c.bf16 %v2023_v57, %v2019_v17  ;;  %v7709_v12 = vld [vmem:[%s11531_s6 + $0x270] ss:$28 sps:$4 sm:$0xff]  }
 0x25a   :  { %v2054_v26 = vpack.c.bf16 %v2022_v22, %v2018_v20  ;;  %v2056_v27 = vpack.c.bf16 %v2024_v23, %v2020_v21 }
 0x25c   :  { %2183 = vmatprep.mubr.bf16.mxu0 %v2054_v26  ;;  %2409 = vmatprep.mubr.bf16.mxu1 %v2054_v26  ;;  %v7715_v26 = vld [vmem:[%s11531_s6 + $0x2a8] ss:$28 sps:$4 sm:$0xff]  }
 0x25d   :  { %2184 = vmatmul.mubr.bf16.gmra.mrb[64].mxu0 %v2053_v24  ;;  %2410 = vmatmul.mubr.bf16.gmra.mrb[64].mxu1 %v2053_v24 }
 0x25e   :  { %6681 = vmatprep.mubr.msk.bf16.mxu0 %vm1313_vm0, %v9440_v1  ;;  %6689 = vmatprep.mubr.msk.bf16.mxu1 %vm1313_vm0, %v9440_v1  ;;  %v7645_v1 = vld [vmem:[%s11531_s6 + $0xc] ss:$28 sps:$4 sm:$0xff]  }
 0x25f   :  { %3759 = vmatprep.subr.bf16.mxu1 %v7645_v1 }
 0x265   :  { %2227 = vmatmul.mubr.bf16.vlgmr.msra.gmra.mrb[36].mxu0 %v9438_v55  ;;  %2453 = vmatmul.mubr.bf16.vlgmr.msra.gmra.mrb[36].mxu1 %v9438_v55  ;;  %v7643_v55 = vld [vmem:[%s11531_s6 + $0x8] ss:$28 sps:$4 sm:$0xff]  }
 0x266   :  { %6682 = vmatprep.mubr.msk.bf16.mxu0 %vm1313_vm0, %v9448_v35  ;;  %6690 = vmatprep.mubr.msk.bf16.mxu1 %vm1313_vm0, %v9448_v35  ;;  %v7651_v35 = vld [vmem:[%s11531_s6 + $0x44] ss:$28 sps:$4 sm:$0xff]  }
 0x267   :  { %3760 = vmatpush1.bf16.msra.mxu1 %v7643_v55  ;;  %v7721_v55 = vld [vmem:[%s11531_s6 + $0x2e0] ss:$28 sps:$4 sm:$0xff]  }
 0x268   :  { %3761 = vmatprep.subr.bf16.mxu1 %v7651_v35 }
 0x26d   :  { %2237 = vmatmul.mubr.bf16.gmra.mrb[40].mxu0 %v9446_v30  ;;  %2463 = vmatmul.mubr.bf16.gmra.mrb[40].mxu1 %v9446_v30  ;;  %v7649_v30 = vld [vmem:[%s11531_s6 + $0x40] ss:$28 sps:$4 sm:$0xff]  }
 0x26e   :  { %6683 = vmatprep.mubr.msk.bf16.mxu0 %vm1313_vm0, %v9460_v14  ;;  %6691 = vmatprep.mubr.msk.bf16.mxu1 %vm1313_vm0, %v9460_v14  ;;  %v7655_v14 = vld [vmem:[%s11531_s6 + $0x78] ss:$28 sps:$4 sm:$0xff]  }
 0x26f   :  { %3762 = vmatpush1.bf16.msra.mxu1 %v7649_v30 }
 0x275   :  { %2247 = vmatmul.mubr.bf16.gmra.mrb[44].mxu0 %v9458_v9  ;;  %2473 = vmatmul.mubr.bf16.gmra.mrb[44].mxu1 %v9458_v9  ;;  %v7657_v9 = vld [vmem:[%s11531_s6 + $0x7c] ss:$28 sps:$4 sm:$0xff]  }
 0x276   :  { %6684 = vmatprep.mubr.msk.bf16.mxu0 %vm1313_vm0, %v9472_v46  ;;  %6692 = vmatprep.mubr.msk.bf16.mxu1 %vm1313_vm0, %v9472_v46  ;;  %v7661_v46 = vld [vmem:[%s11531_s6 + $0xb0] ss:$28 sps:$4 sm:$0xff]  }
 0x277   :  { %3763 = vmatprep.subr.bf16.mxu1 %v7657_v9 }
 0x278   :  { %3764 = vmatpush1.bf16.msra.mxu1 %v7655_v14 }
 0x27d   :  { %2257 = vmatmul.mubr.bf16.gmra.mrb[48].mxu0 %v9470_v51  ;;  %2483 = vmatmul.mubr.bf16.gmra.mrb[48].mxu1 %v9470_v51  ;;  %v7663_v51 = vld [vmem:[%s11531_s6 + $0xb4] ss:$28 sps:$4 sm:$0xff]  }
 0x27e   :  { %6685 = vmatprep.mubr.msk.bf16.mxu0 %vm1313_vm0, %v9484_v37  ;;  %6693 = vmatprep.mubr.msk.bf16.mxu1 %vm1313_vm0, %v9484_v37  ;;  %v7667_v37 = vld [vmem:[%s11531_s6 + $0xe8] ss:$28 sps:$4 sm:$0xff]  }
 0x27f   :  { %3765 = vmatprep.subr.bf16.mxu1 %v7663_v51 }
 0x280   :  { %3766 = vmatpush1.bf16.msra.mxu1 %v7661_v46 }
 0x285   :  { %2267 = vmatmul.mubr.bf16.gmra.mrb[52].mxu0 %v9482_v31  ;;  %2493 = vmatmul.mubr.bf16.gmra.mrb[52].mxu1 %v9482_v31  ;;  %v7669_v31 = vld [vmem:[%s11531_s6 + $0xec] ss:$28 sps:$4 sm:$0xff]  }
 0x286   :  { %6686 = vmatprep.mubr.msk.bf16.mxu0 %vm1313_vm0, %v9496_v19  ;;  %6694 = vmatprep.mubr.msk.bf16.mxu1 %vm1313_vm0, %v9496_v19  ;;  %v7673_v19 = vld [vmem:[%s11531_s6 + $0x120] ss:$28 sps:$4 sm:$0xff]  }
 0x287   :  { %3767 = vmatprep.subr.bf16.mxu1 %v7669_v31 }
 0x288   :  { %3768 = vmatpush1.bf16.msra.mxu1 %v7667_v37 }
 0x28d   :  { %2277 = vmatmul.mubr.bf16.gmra.mrb[56].mxu0 %v9494_v13  ;;  %2503 = vmatmul.mubr.bf16.gmra.mrb[56].mxu1 %v9494_v13  ;;  %v7675_v13 = vld [vmem:[%s11531_s6 + $0x124] ss:$28 sps:$4 sm:$0xff]  }
 0x28e   :  { %6687 = vmatprep.mubr.msk.bf16.mxu0 %vm1313_vm0, %v2052_v61  ;;  %6695 = vmatprep.mubr.msk.bf16.mxu1 %vm1313_vm0, %v2052_v61 }
 0x28f   :  { %3769 = vmatprep.subr.bf16.mxu1 %v7675_v13 }
 0x290   :  { %3770 = vmatpush1.bf16.msra.mxu1 %v7673_v19 }
 0x291   :  { %3771 = vmatprep.subr.bf16.mxu1 %v7681_v28 }
 0x294   :  { %3772 = vmatpush1.bf16.msra.mxu1 %v7679_v29 }
 0x295   :  { %2287 = vmatmul.mubr.bf16.gmra.mrb[60].mxu0 %v9504_v60  ;;  %2513 = vmatmul.mubr.bf16.gmra.mrb[60].mxu1 %v9504_v60 }
 0x296   :  { %6688 = vmatprep.mubr.msk.bf16.mxu0 %vm1313_vm0, %v2056_v27  ;;  %6696 = vmatprep.mubr.msk.bf16.mxu1 %vm1313_vm0, %v2056_v27  ;;  %v7723_v27 = vld [vmem:[%s11531_s6 + $0x2e4] ss:$28 sps:$4 sm:$0xff]  }
 0x297   :  { %3773 = vmatprep.subr.bf16.mxu1 %v7687_v32 }
 0x298   :  { %3774 = vmatpush1.bf16.msra.mxu1 %v7685_v34 }
 0x299   :  { %3775 = vmatprep.subr.bf16.mxu1 %v7693_v36 }
 0x29c   :  { %3776 = vmatpush1.bf16.msra.mxu1 %v7691_v50 }
 0x29d   :  { %2297 = vmatmul.mubr.bf16.gmra.mrb[64].mxu0 %v2055_v25  ;;  %2523 = vmatmul.mubr.bf16.gmra.mrb[64].mxu1 %v2055_v25 }
 0x29e   :  { %2602 = vmatprep.mubr.f32.mxu0 %v11654_v48  ;;  %3777 = vmatprep.subr.bf16.mxu1 %v7699_v52 }
 0x2a0   :  { %3778 = vmatpush1.bf16.msra.mxu1 %v7697_v62 }
 0x2a1   :  { %3779 = vmatprep.subr.bf16.mxu1 %v7705_v59 }
 0x2a4   :  { %3780 = vmatpush1.bf16.msra.mxu1 %v7703_v7 }
 0x2a5   :  { %3781 = vmatprep.subr.bf16.mxu1 %v7711_v8 }
 0x2a8   :  { %3782 = vmatpush1.bf16.msra.mxu1 %v7709_v12 }
 0x2a9   :  { %3783 = vmatprep.subr.bf16.mxu1 %v7717_v15 }
 0x2ac   :  { %3784 = vmatpush1.bf16.msra.mxu1 %v7715_v26 }
 0x2ad   :  { %3785 = vmatprep.subr.bf16.mxu1 %v7723_v27 }
 0x2b0   :  { %3786 = vmatpush1.bf16.msra.mxu1 %v7721_v55 }
 0x338   :  { %v2228_v33 = vpop.f32.mrb[36].mxu0  ;;  %v9594_v63 = vpop.f32.mrb[36].mxu1 }
 0x339   :  { %v2230_v38 = vpop.f32.mrb[37].mxu0  ;;  %v9602_v39 = vpop.f32.mrb[37].mxu1 }
 0x33a   :  { %v2232_v40 = vpop.f32.mrb[38].mxu0  ;;  %v9604_v41 = vpop.f32.mrb[38].mxu1 }
 0x33b   :  { %v7299_v42 = vpack.c.bf16 %v2232_v40, %v2228_v33  ;;  %v7331_v43 = vpack.c.bf16 %v9604_v41, %v9594_v63  ;;  %v2234_v44 = vpop.f32.mrb[39].mxu0  ;;  %v9608_v45 = vpop.f32.mrb[39].mxu1  ;;  %v7640_v63 = vld [vmem:[%s11531_s6] ss:$28 sps:$4 sm:$0xff]   ;;  %v7646_v41 = vld [vmem:[%s11531_s6 + $0x38] ss:$28 sps:$4 sm:$0xff]  }
 0x33c   :  { %v7297_v47 = vpack.c.bf16 %v2234_v44, %v2230_v38  ;;  %v7329_v49 = vpack.c.bf16 %v9608_v45, %v9602_v39  ;;  %v7648_v39 = vld [vmem:[%s11531_s6 + $0x3c] ss:$28 sps:$4 sm:$0xff]   ;;  %v7652_v45 = vld [vmem:[%s11531_s6 + $0x70] ss:$28 sps:$4 sm:$0xff]  }
 0x33e   :  { %7298 = vmatprep.subr.bf16.mxu0 %v7297_v47 }
 0x33f   :  { %7300 = vmatpush1.bf16.msra.mxu0 %v7299_v42 }
 0x340   :  { %v2238_v54 = vpop.f32.mrb[40].mxu0  ;;  %v9618_v60 = vpop.f32.mrb[40].mxu1 }
 0x341   :  { %v2240_v56 = vpop.f32.mrb[41].mxu0  ;;  %v9626_v58 = vpop.f32.mrb[41].mxu1 }
 0x342   :  { %v2242_v61 = vpop.f32.mrb[42].mxu0  ;;  %v9628_v53 = vpop.f32.mrb[42].mxu1 }
 0x343   :  { %v7303_v0 = vpack.c.bf16 %v2242_v61, %v2238_v54  ;;  %v7335_v2 = vpack.c.bf16 %v9628_v53, %v9618_v60  ;;  %v2244_v3 = vpop.f32.mrb[43].mxu0  ;;  %v9632_v4 = vpop.f32.mrb[43].mxu1  ;;  %v7658_v60 = vld [vmem:[%s11531_s6 + $0xa8] ss:$28 sps:$4 sm:$0xff]   ;;  %v7664_v53 = vld [vmem:[%s11531_s6 + $0xe0] ss:$28 sps:$4 sm:$0xff]  }
 0x344   :  { %v7301_v5 = vpack.c.bf16 %v2244_v3, %v2240_v56  ;;  %v7333_v6 = vpack.c.bf16 %v9632_v4, %v9626_v58  ;;  %v7666_v58 = vld [vmem:[%s11531_s6 + $0xe4] ss:$28 sps:$4 sm:$0xff]   ;;  %v7670_v4 = vld [vmem:[%s11531_s6 + $0x118] ss:$28 sps:$4 sm:$0xff]  }
 0x346   :  { %7302 = vmatprep.subr.bf16.mxu0 %v7301_v5 }
 0x347   :  { %7304 = vmatpush1.bf16.msra.mxu0 %v7303_v0 }
 0x348   :  { %v2248_v10 = vpop.f32.mrb[44].mxu0  ;;  %v9642_v11 = vpop.f32.mrb[44].mxu1 }
 0x349   :  { %v2250_v16 = vpop.f32.mrb[45].mxu0  ;;  %v9650_v17 = vpop.f32.mrb[45].mxu1 }
 0x34a   :  { %v2252_v18 = vpop.f32.mrb[46].mxu0  ;;  %v9652_v57 = vpop.f32.mrb[46].mxu1 }
 0x34b   :  { %v7307_v20 = vpack.c.bf16 %v2252_v18, %v2248_v10  ;;  %v7339_v21 = vpack.c.bf16 %v9652_v57, %v9642_v11  ;;  %v2254_v22 = vpop.f32.mrb[47].mxu0  ;;  %v9656_v23 = vpop.f32.mrb[47].mxu1  ;;  %v7676_v11 = vld [vmem:[%s11531_s6 + $0x150] ss:$28 sps:$4 sm:$0xff]   ;;  %v7682_v57 = vld [vmem:[%s11531_s6 + $0x188] ss:$28 sps:$4 sm:$0xff]  }
 0x34c   :  { %v7305_v24 = vpack.c.bf16 %v2254_v22, %v2250_v16  ;;  %v7337_v25 = vpack.c.bf16 %v9656_v23, %v9650_v17  ;;  %v7684_v17 = vld [vmem:[%s11531_s6 + $0x18c] ss:$28 sps:$4 sm:$0xff]   ;;  %v7688_v23 = vld [vmem:[%s11531_s6 + $0x1c0] ss:$28 sps:$4 sm:$0xff]  }
 0x34e   :  { %7306 = vmatprep.subr.bf16.mxu0 %v7305_v24 }
 0x34f   :  { %7308 = vmatpush1.bf16.msra.mxu0 %v7307_v20 }
 0x350   :  { %v2258_v1 = vpop.f32.mrb[48].mxu0  ;;  %v9669_v30 = vpop.f32.mrb[48].mxu1 }
 0x351   :  { %v2260_v35 = vpop.f32.mrb[49].mxu0  ;;  %v9671_v9 = vpop.f32.mrb[49].mxu1 }
 0x352   :  { %v2262_v14 = vpop.f32.mrb[50].mxu0  ;;  %v9673_v51 = vpop.f32.mrb[50].mxu1 }
 0x353   :  { %v7311_v46 = vpack.c.bf16 %v2262_v14, %v2258_v1  ;;  %v7343_v31 = vpack.c.bf16 %v9673_v51, %v9669_v30  ;;  %v2264_v37 = vpop.f32.mrb[51].mxu0  ;;  %v9677_v13 = vpop.f32.mrb[51].mxu1  ;;  %v7694_v30 = vld [vmem:[%s11531_s6 + $0x1f8] ss:$28 sps:$4 sm:$0xff]   ;;  %v7700_v51 = vld [vmem:[%s11531_s6 + $0x230] ss:$28 sps:$4 sm:$0xff]  }
 0x354   :  { %v7309_v19 = vpack.c.bf16 %v2264_v37, %v2260_v35  ;;  %v7341_v28 = vpack.c.bf16 %v9677_v13, %v9671_v9  ;;  %v7702_v9 = vld [vmem:[%s11531_s6 + $0x234] ss:$28 sps:$4 sm:$0xff]   ;;  %v7706_v13 = vld [vmem:[%s11531_s6 + $0x268] ss:$28 sps:$4 sm:$0xff]  }
 0x356   :  { %7310 = vmatprep.subr.bf16.mxu0 %v7309_v19 }
 0x357   :  { %7312 = vmatpush1.bf16.msra.mxu0 %v7311_v46 }
 0x358   :  { %v2268_v29 = vpop.f32.mrb[52].mxu0  ;;  %v9681_v32 = vpop.f32.mrb[52].mxu1 }
 0x359   :  { %v2270_v33 = vpop.f32.mrb[53].mxu0  ;;  %v9683_v34 = vpop.f32.mrb[53].mxu1 }
 0x35a   :  { %v2272_v36 = vpop.f32.mrb[54].mxu0  ;;  %v9685_v38 = vpop.f32.mrb[54].mxu1 }
 0x35b   :  { %v7315_v40 = vpack.c.bf16 %v2272_v36, %v2268_v29  ;;  %v7347_v42 = vpack.c.bf16 %v9685_v38, %v9681_v32  ;;  %v2274_v44 = vpop.f32.mrb[55].mxu0  ;;  %v2500_v47 = vpop.f32.mrb[55].mxu1 }
 0x35c   :  { %v7313_v50 = vpack.c.bf16 %v2274_v44, %v2270_v33  ;;  %v7345_v52 = vpack.c.bf16 %v2500_v47, %v9683_v34 }
 0x35e   :  { %7314 = vmatprep.subr.bf16.mxu0 %v7313_v50  ;;  %v177_v50 = vld [vmem:[%s11532_s4] sm:$0x3f] }
 0x35f   :  { %7316 = vmatpush1.bf16.msra.mxu0 %v7315_v40 }
 0x360   :  { %v2278_v54 = vpop.f32.mrb[56].mxu0  ;;  %v2504_v62 = vpop.f32.mrb[56].mxu1 }
 0x361   :  { %v2280_v59 = vpop.f32.mrb[57].mxu0  ;;  %v2506_v56 = vpop.f32.mrb[57].mxu1 }
 0x362   :  { %v2282_v61 = vpop.f32.mrb[58].mxu0  ;;  %v2508_v0 = vpop.f32.mrb[58].mxu1 }
 0x363   :  { %v7319_v3 = vpack.c.bf16 %v2282_v61, %v2278_v54  ;;  %v7351_v5 = vpack.c.bf16 %v2508_v0, %v2504_v62  ;;  %v2284_v7 = vpop.f32.mrb[59].mxu0  ;;  %v2510_v8 = vpop.f32.mrb[59].mxu1  ;;  %v7718_v54 = vld [vmem:[%s11531_s6 + $0x2d8] ss:$28 sps:$4 sm:$0xff]   ;;  %v7724_v61 = vld [vmem:[%s11531_s6 + $0x310] ss:$28 sps:$4 sm:$0xff]  }
 0x364   :  { %v7317_v10 = vpack.c.bf16 %v2284_v7, %v2280_v59  ;;  %v7349_v12 = vpack.c.bf16 %v2510_v8, %v2506_v56  ;;  %v7729_v62 = vld [vmem:[%s11531_s6 + $0x31c] ss:$28 sps:$4 sm:$0xff]   ;;  %v7726_v59 = vld [vmem:[%s11531_s6 + $0x314] ss:$28 sps:$4 sm:$0xff]   ;;  %v7730_v7 = vld [vmem:[%s11531_s6 + $0x348] ss:$28 sps:$4 sm:$0xff]  }
 0x365   :  { %v7727_v56 = vld [vmem:[%s11531_s6 + $0x318] ss:$28 sps:$4 sm:$0xff]   ;;  %3787 = vmatprep.subr.bf16.mxu1 %v7729_v62  ;;  %v7741_v8 = vld [vmem:[%s11531_s6 + $0x38c] ss:$28 sps:$4 sm:$0xff]   ;;  %v7795_v62 = vld [vmem:[%s11531_s6 + $0x584] ss:$28 sps:$4 sm:$0xff]  }
 0x366   :  { %7318 = vmatprep.subr.bf16.mxu0 %v7317_v10  ;;  %3788 = vmatpush1.bf16.msra.mxu1 %v7727_v56  ;;  %v7735_v0 = vld [vmem:[%s11531_s6 + $0x354] ss:$28 sps:$4 sm:$0xff]   ;;  %v7738_v10 = vld [vmem:[%s11531_s6 + $0x384] ss:$28 sps:$4 sm:$0xff]  }
 0x367   :  { %7320 = vmatpush1.bf16.msra.mxu0 %v7319_v3  ;;  %v7732_v3 = vld [vmem:[%s11531_s6 + $0x34c] ss:$28 sps:$4 sm:$0xff]   ;;  %3789 = vmatprep.subr.bf16.mxu1 %v7735_v0  ;;  %v7798_v56 = vld [vmem:[%s11531_s6 + $0x5b4] ss:$28 sps:$4 sm:$0xff]  }
 0x368   :  { %v2288_v15 = vpop.f32.mrb[60].mxu0  ;;  %v2514_v16 = vpop.f32.mrb[60].mxu1  ;;  %v7790_v0 = vld [vmem:[%s11531_s6 + $0x578] ss:$28 sps:$4 sm:$0xff]  }
 0x369   :  { %v2290_v18 = vpop.f32.mrb[61].mxu0  ;;  %v2516_v20 = vpop.f32.mrb[61].mxu1 }
 0x36a   :  { %v2292_v22 = vpop.f32.mrb[62].mxu0  ;;  %v2518_v24 = vpop.f32.mrb[62].mxu1 }
 0x36b   :  { %v7323_v26 = vpack.c.bf16 %v2292_v22, %v2288_v15  ;;  %v7355_v27 = vpack.c.bf16 %v2518_v24, %v2514_v16  ;;  %v2294_v55 = vpop.f32.mrb[63].mxu0  ;;  %v2520_v1 = vpop.f32.mrb[63].mxu1  ;;  %v8477_v22 = vld [vmem:[%s11527_s0] sm:$0x3f] }
 0x36c   :  { %v7321_v35 = vpack.c.bf16 %v2294_v55, %v2290_v18  ;;  %v7353_v14 = vpack.c.bf16 %v2520_v1, %v2516_v20  ;;  %v7736_v55 = vld [vmem:[%s11531_s6 + $0x380] ss:$28 sps:$4 sm:$0xff]   ;;  %v7739_v1 = vld [vmem:[%s11531_s6 + $0x388] ss:$28 sps:$4 sm:$0xff]  }
 0x36e   :  { %7322 = vmatprep.subr.bf16.mxu0 %v7321_v35 }
 0x36f   :  { %7324 = vmatpush1.bf16.msra.mxu0 %v7323_v26  ;;  %v8478_v26 = vld [vmem:[%s11527_s0 + $0x8] sm:$0x3f] }
 0x370   :  { %v2298_v46 = vpop.f32.mrb[64].mxu0  ;;  %v2524_v37 = vpop.f32.mrb[64].mxu1 }
 0x371   :  { %v2300_v19 = vpop.f32.mrb[65].mxu0  ;;  %v2526_v29 = vpop.f32.mrb[65].mxu1 }
 0x372   :  { %v2302_v32 = vpop.f32.mrb[66].mxu0  ;;  %v2528_v33 = vpop.f32.mrb[66].mxu1 }
 0x373   :  { %v7327_v34 = vpack.c.bf16 %v2302_v32, %v2298_v46  ;;  %v7359_v36 = vpack.c.bf16 %v2528_v33, %v2524_v37  ;;  %v2304_v38 = vpop.f32.mrb[67].mxu0  ;;  %v2530_v40 = vpop.f32.mrb[67].mxu1  ;;  %v7744_v46 = vld [vmem:[%s11531_s6 + $0x3bc] ss:$28 sps:$4 sm:$0xff]   ;;  %v7747_v37 = vld [vmem:[%s11531_s6 + $0x3c4] ss:$28 sps:$4 sm:$0xff]  }
 0x374   :  { %v7325_v44 = vpack.c.bf16 %v2304_v38, %v2300_v19  ;;  %v7357_v47 = vpack.c.bf16 %v2530_v40, %v2526_v29  ;;  %v7742_v19 = vld [vmem:[%s11531_s6 + $0x3b8] ss:$28 sps:$4 sm:$0xff]   ;;  %v7745_v29 = vld [vmem:[%s11531_s6 + $0x3c0] ss:$28 sps:$4 sm:$0xff]   ;;  %v7756_v38 = vld [vmem:[%s11531_s6 + $0x42c] ss:$28 sps:$4 sm:$0xff]  }
 0x375   :  { %v7750_v32 = vld [vmem:[%s11531_s6 + $0x3f4] ss:$28 sps:$4 sm:$0xff]   ;;  %v7753_v33 = vld [vmem:[%s11531_s6 + $0x3fc] ss:$28 sps:$4 sm:$0xff]  }
 0x376   :  { %7326 = vmatprep.subr.bf16.mxu0 %v7325_v44  ;;  %v7759_v40 = vld [vmem:[%s11531_s6 + $0x434] ss:$28 sps:$4 sm:$0xff]   ;;  %v7754_v44 = vld [vmem:[%s11531_s6 + $0x428] ss:$28 sps:$4 sm:$0xff]  }
 0x377   :  { %7328 = vmatpush1.bf16.msra.mxu0 %v7327_v34  ;;  %v7748_v34 = vld [vmem:[%s11531_s6 + $0x3f0] ss:$28 sps:$4 sm:$0xff]  }
 0x378   :  { %7330 = vmatprep.subr.bf16.mxu0 %v7329_v49  ;;  %v7660_v49 = vld [vmem:[%s11531_s6 + $0xac] ss:$28 sps:$4 sm:$0xff]  }
 0x37a   :  { %2603 = vmatmul.mubr.f32.vlgmr.msra.gmra.mrb[68].mxu0 %v177_v50 }
 0x37b   :  { %7332 = vmatpush1.bf16.msra.mxu0 %v7331_v43  ;;  %2673 = vmatprep.mubr.f32.mxu0 %v11654_v48  ;;  %v7642_v48 = vld [vmem:[%s11531_s6 + $0x4] ss:$28 sps:$4 sm:$0xff]   ;;  %v7654_v43 = vld [vmem:[%s11531_s6 + $0x74] ss:$28 sps:$4 sm:$0xff]  }
 0x37c   :  { %7334 = vmatprep.subr.bf16.mxu0 %v7333_v6  ;;  %v7678_v6 = vld [vmem:[%s11531_s6 + $0x154] ss:$28 sps:$4 sm:$0xff]  }
 0x37f   :  { %7336 = vmatpush1.bf16.msra.mxu0 %v7335_v2  ;;  %v7672_v2 = vld [vmem:[%s11531_s6 + $0x11c] ss:$28 sps:$4 sm:$0xff]  }
 0x380   :  { %7338 = vmatprep.subr.bf16.mxu0 %v7337_v25  ;;  %v7696_v25 = vld [vmem:[%s11531_s6 + $0x1fc] ss:$28 sps:$4 sm:$0xff]  }
 0x383   :  { %7340 = vmatpush1.bf16.msra.mxu0 %v7339_v21  ;;  %v7690_v21 = vld [vmem:[%s11531_s6 + $0x1c4] ss:$28 sps:$4 sm:$0xff]  }
 0x384   :  { %7342 = vmatprep.subr.bf16.mxu0 %v7341_v28  ;;  %v7714_v28 = vld [vmem:[%s11531_s6 + $0x2a4] ss:$28 sps:$4 sm:$0xff]  }
 0x387   :  { %7344 = vmatpush1.bf16.msra.mxu0 %v7343_v31  ;;  %v7708_v31 = vld [vmem:[%s11531_s6 + $0x26c] ss:$28 sps:$4 sm:$0xff]  }
 0x388   :  { %7346 = vmatprep.subr.bf16.mxu0 %v7345_v52  ;;  %v7720_v52 = vld [vmem:[%s11531_s6 + $0x2dc] ss:$28 sps:$4 sm:$0xff]  }
 0x38b   :  { %7348 = vmatpush1.bf16.msra.mxu0 %v7347_v42  ;;  %v7712_v42 = vld [vmem:[%s11531_s6 + $0x2a0] ss:$28 sps:$4 sm:$0xff]  }
 0x38c   :  { %7350 = vmatprep.subr.bf16.mxu0 %v7349_v12  ;;  %v9832_v12 = vpop.permute.xlu0 %2535 }
 0x38f   :  { %7352 = vmatpush1.bf16.msra.mxu0 %v7351_v5  ;;  %v7733_v5 = vld [vmem:[%s11531_s6 + $0x350] ss:$28 sps:$4 sm:$0xff]  }
 0x390   :  { %7354 = vmatprep.subr.bf16.mxu0 %v7353_v14  ;;  %3790 = vmatpush1.bf16.msra.mxu1 %v7733_v5  ;;  %v7796_v5 = vld [vmem:[%s11531_s6 + $0x5b0] ss:$28 sps:$4 sm:$0xff]  }
 0x391   :  { %3800 = vmatprep.subr.bf16.mxu1 %v7741_v8  ;;  %v11710_v8 = vld [vmem:[#allocation52_spill] sm:$0xff] }
 0x393   :  { %7356 = vmatpush1.bf16.msra.mxu0 %v7355_v27 }
 0x394   :  { %7358 = vmatprep.subr.bf16.mxu0 %v7357_v47  ;;  %v7757_v47 = vld [vmem:[%s11531_s6 + $0x430] ss:$28 sps:$4 sm:$0xff]  }
 0x397   :  { %7360 = vmatpush1.bf16.msra.mxu0 %v7359_v36  ;;  %v7751_v36 = vld [vmem:[%s11531_s6 + $0x3f8] ss:$28 sps:$4 sm:$0xff]  }
 0x398   :  { %3677 = vmatprep.subr.bf16.mxu0 %v7642_v48  ;;  %v7765_v48 = vld [vmem:[%s11531_s6 + $0x46c] ss:$28 sps:$4 sm:$0xff]  }
 0x39a   :  { %2674 = vmatmul.mubr.f32.vlgmr.msra.gmra.mrb[70].mxu0 %v177_v50  ;;  %v7762_v50 = vld [vmem:[%s11531_s6 + $0x464] ss:$28 sps:$4 sm:$0xff]  }
 0x39b   :  { %3678 = vmatpush1.bf16.msra.mxu0 %v7640_v63  ;;  %v7760_v63 = vld [vmem:[%s11531_s6 + $0x460] ss:$28 sps:$4 sm:$0xff]  }
 0x39c   :  { %3679 = vmatprep.subr.bf16.mxu0 %v7648_v39  ;;  %v7763_v39 = vld [vmem:[%s11531_s6 + $0x468] ss:$28 sps:$4 sm:$0xff]  }
 0x39f   :  { %3680 = vmatpush1.bf16.msra.mxu0 %v7646_v41  ;;  %v7768_v41 = vld [vmem:[%s11531_s6 + $0x49c] ss:$28 sps:$4 sm:$0xff]  }
 0x3a0   :  { %3681 = vmatprep.subr.bf16.mxu0 %v7654_v43  ;;  %v7771_v43 = vld [vmem:[%s11531_s6 + $0x4a4] ss:$28 sps:$4 sm:$0xff]  }
 0x3a3   :  { %3682 = vmatpush1.bf16.msra.mxu0 %v7652_v45  ;;  %v7766_v45 = vld [vmem:[%s11531_s6 + $0x498] ss:$28 sps:$4 sm:$0xff]  }
 0x3a4   :  { %3683 = vmatprep.subr.bf16.mxu0 %v7660_v49  ;;  %v7769_v49 = vld [vmem:[%s11531_s6 + $0x4a0] ss:$28 sps:$4 sm:$0xff]  }
 0x3a7   :  { %3684 = vmatpush1.bf16.msra.mxu0 %v7658_v60  ;;  %v7774_v60 = vld [vmem:[%s11531_s6 + $0x4d4] ss:$28 sps:$4 sm:$0xff]  }
 0x3a8   :  { %3685 = vmatprep.subr.bf16.mxu0 %v7666_v58  ;;  %v7777_v58 = vld [vmem:[%s11531_s6 + $0x4dc] ss:$28 sps:$4 sm:$0xff]  }
 0x3ab   :  { %3686 = vmatpush1.bf16.msra.mxu0 %v7664_v53  ;;  %v7772_v53 = vld [vmem:[%s11531_s6 + $0x4d0] ss:$28 sps:$4 sm:$0xff]  }
 0x3ac   :  { %3687 = vmatprep.subr.bf16.mxu0 %v7672_v2  ;;  %v7775_v2 = vld [vmem:[%s11531_s6 + $0x4d8] ss:$28 sps:$4 sm:$0xff]  }
 0x3af   :  { %3688 = vmatpush1.bf16.msra.mxu0 %v7670_v4  ;;  %v7780_v4 = vld [vmem:[%s11531_s6 + $0x50c] ss:$28 sps:$4 sm:$0xff]  }
 0x3b0   :  { %3689 = vmatprep.subr.bf16.mxu0 %v7678_v6  ;;  %v7783_v6 = vld [vmem:[%s11531_s6 + $0x514] ss:$28 sps:$4 sm:$0xff]  }
 0x3b3   :  { %3690 = vmatpush1.bf16.msra.mxu0 %v7676_v11 }
 0x3b4   :  { %3691 = vmatprep.subr.bf16.mxu0 %v7684_v17 }
 0x3b7   :  { %3692 = vmatpush1.bf16.msra.mxu0 %v7682_v57 }
 0x3b8   :  { %3693 = vmatprep.subr.bf16.mxu0 %v7690_v21  ;;  %v7778_v21 = vld [vmem:[%s11531_s6 + $0x508] ss:$28 sps:$4 sm:$0xff]  }
 0x3bb   :  { %3694 = vmatpush1.bf16.msra.mxu0 %v7688_v23  ;;  %v7781_v23 = vld [vmem:[%s11531_s6 + $0x510] ss:$28 sps:$4 sm:$0xff]  }
 0x3bc   :  { %3695 = vmatprep.subr.bf16.mxu0 %v7696_v25 }
 0x3bf   :  { %3696 = vmatpush1.bf16.msra.mxu0 %v7694_v30  ;;  %v8479_v30 = vld [vmem:[%s11527_s0 + $0x10] sm:$0x3f] }
 0x3c0   :  { %3697 = vmatprep.subr.bf16.mxu0 %v7702_v9 }
 0x3c3   :  { %3698 = vmatpush1.bf16.msra.mxu0 %v7700_v51  ;;  %v7786_v51 = vld [vmem:[%s11531_s6 + $0x544] ss:$28 sps:$4 sm:$0xff]  }
 0x3c4   :  { %3699 = vmatprep.subr.bf16.mxu0 %v7708_v31  ;;  %v7789_v31 = vld [vmem:[%s11531_s6 + $0x54c] ss:$28 sps:$4 sm:$0xff]  }
 0x3c7   :  { %3700 = vmatpush1.bf16.msra.mxu0 %v7706_v13  ;;  %v8480_v13 = vld [vmem:[%s11527_s0 + $0x18] sm:$0x3f] }
 0x3c8   :  { %3701 = vmatprep.subr.bf16.mxu0 %v7714_v28 }
 0x3cb   :  { %3702 = vmatpush1.bf16.msra.mxu0 %v7712_v42  ;;  %v7784_v42 = vld [vmem:[%s11531_s6 + $0x540] ss:$28 sps:$4 sm:$0xff]  }
 0x3cc   :  { %3703 = vmatprep.subr.bf16.mxu0 %v7720_v52  ;;  %v7787_v52 = vld [vmem:[%s11531_s6 + $0x548] ss:$28 sps:$4 sm:$0xff]  }
 0x3cf   :  { %3704 = vmatpush1.bf16.msra.mxu0 %v7718_v54  ;;  %v7792_v54 = vld [vmem:[%s11531_s6 + $0x57c] ss:$28 sps:$4 sm:$0xff]  }
 0x3d0   :  { %3705 = vmatprep.subr.bf16.mxu0 %v7726_v59 }
 0x3d3   :  { %3706 = vmatpush1.bf16.msra.mxu0 %v7724_v61  ;;  %v7801_v61 = vld [vmem:[%s11531_s6 + $0x5bc] ss:$28 sps:$4 sm:$0xff]  }
 0x3d4   :  { %3707 = vmatprep.subr.bf16.mxu0 %v7732_v3  ;;  %v7793_v3 = vld [vmem:[%s11531_s6 + $0x580] ss:$28 sps:$4 sm:$0xff]  }
 0x3d7   :  { %3708 = vmatpush1.bf16.msra.mxu0 %v7730_v7  ;;  %v7799_v7 = vld [vmem:[%s11531_s6 + $0x5b8] ss:$28 sps:$4 sm:$0xff]  }
 0x3d8   :  { %3718 = vmatprep.subr.bf16.mxu0 %v7738_v10  ;;  %v3660_v10 = vand.u32 %v7798_v56, %v11710_v8  ;;  %v7862_v56 = vld [vmem:[%s11531_s6 + $0x2e8] ss:$28 sps:$4 sm:$0xff]  }
 0x44d   :  { %v2604_v15 = vpop.f32.mrb[68].mxu0 }
 0x44e   :  { %v2605_v16 = vadd.f32 %v2604_v15, %v9832_v12  ;;  %v2606_v18 = vpop.f32.mrb[69].mxu0  ;;  %v3657_v15 = vand.u32 %v7796_v5, %v11710_v8  ;;  %v7869_v5 = vld [vmem:[%s11531_s6 + $0x4e8] ss:$28 sps:$4 sm:$0xff]  }
 0x44f   :  { %v2607_v20 = vadd.f32 %v2606_v18, %v9832_v12  ;;  %v7804_v18 = vld [vmem:[%s11531_s6 + $0x14] ss:$28 sps:$4 sm:$0xff]  }
 0x450   :  { %v2680_v24 = vadd.f32 %v8477_v22, %v2605_v16  ;;  %v3663_v16 = vand.u32 %v7799_v7, %v11710_v8  ;;  %v7802_v22 = vld [vmem:[%s11531_s6 + $0x10] ss:$28 sps:$4 sm:$0xff]   ;;  %v7872_v7 = vld [vmem:[%s11531_s6 + $0x35c] ss:$28 sps:$4 sm:$0xff]  }
 0x451   :  { %v2681_v27 = vadd.f32 %v8478_v26, %v2607_v20  ;;  %v7805_v20 = vld [vmem:[%s11531_s6 + $0x1d8] ss:$28 sps:$4 sm:$0xff]  }
 0x452   :  { %6495 = vst [vmem:[%s11534_s8] sm:$0x3f] %v2680_v24  ;;  %v9856_v14 = vpack.c.bf16 %v2680_v24, %v2680_v24  ;;  %v7806_v26 = vld [vmem:[%s11531_s6 + $0x18] ss:$28 sps:$4 sm:$0xff]  }
 0x453   :  { %v9851_v35 = vpack.c.bf16 %v2681_v27, %v2681_v27  ;;  %6496 = vst [vmem:[%s11534_s8 + $0x8] sm:$0x3f] %v2681_v27  ;;  %v7807_v27 = vld [vmem:[%s11531_s6 + $0x48] ss:$28 sps:$4 sm:$0xff]  }
 0x455   :  { %3709 = vmatprep.mubr.bf16.mxu0 %v9851_v35  ;;  %3791 = vmatprep.mubr.bf16.mxu1 %v9851_v35 }
 0x456   :  { %3710 = vmatmul.mubr.bf16.vlgmr.msra.gmra.mrb[72].mxu0 %v9856_v14  ;;  %3792 = vmatmul.mubr.bf16.vlgmr.msra.gmra.mrb[68].mxu1 %v9856_v14 }
 0x457   :  { %3719 = vmatpush1.bf16.msra.mxu0 %v7736_v55  ;;  %3801 = vmatpush1.bf16.msra.mxu1 %v7739_v1  ;;  %v7809_v55 = vld [vmem:[%s11531_s6 + $0x4c] ss:$28 sps:$4 sm:$0xff]  }
 0x458   :  { %3720 = vmatprep.subr.bf16.mxu0 %v7744_v46  ;;  %3802 = vmatprep.subr.bf16.mxu1 %v7747_v37  ;;  %v7810_v1 = vld [vmem:[%s11531_s6 + $0x210] ss:$28 sps:$4 sm:$0xff]   ;;  %v7814_v37 = vld [vmem:[%s11531_s6 + $0x84] ss:$28 sps:$4 sm:$0xff]  }
 0x459   :  { %v7811_v46 = vld [vmem:[%s11531_s6 + $0x50] ss:$28 sps:$4 sm:$0xff]  }
 0x45b   :  { %3721 = vmatpush1.bf16.msra.mxu0 %v7742_v19  ;;  %3803 = vmatpush1.bf16.msra.mxu1 %v7745_v29  ;;  %v7812_v19 = vld [vmem:[%s11531_s6 + $0x80] ss:$28 sps:$4 sm:$0xff]   ;;  %v7815_v29 = vld [vmem:[%s11531_s6 + $0x248] ss:$28 sps:$4 sm:$0xff]  }
 0x45c   :  { %3722 = vmatprep.subr.bf16.mxu0 %v7750_v32  ;;  %3804 = vmatprep.subr.bf16.mxu1 %v7753_v33  ;;  %v7816_v32 = vld [vmem:[%s11531_s6 + $0x88] ss:$28 sps:$4 sm:$0xff]   ;;  %v7819_v33 = vld [vmem:[%s11531_s6 + $0xbc] ss:$28 sps:$4 sm:$0xff]  }
 0x45f   :  { %3723 = vmatpush1.bf16.msra.mxu0 %v7748_v34  ;;  %3805 = vmatpush1.bf16.msra.mxu1 %v7751_v36  ;;  %v7817_v34 = vld [vmem:[%s11531_s6 + $0xb8] ss:$28 sps:$4 sm:$0xff]   ;;  %v7820_v36 = vld [vmem:[%s11531_s6 + $0x280] ss:$28 sps:$4 sm:$0xff]  }
 0x460   :  { %3724 = vmatprep.subr.bf16.mxu0 %v7756_v38  ;;  %3806 = vmatprep.subr.bf16.mxu1 %v7759_v40  ;;  %v7821_v38 = vld [vmem:[%s11531_s6 + $0xc0] ss:$28 sps:$4 sm:$0xff]   ;;  %v7824_v40 = vld [vmem:[%s11531_s6 + $0xf4] ss:$28 sps:$4 sm:$0xff]  }
 0x463   :  { %3725 = vmatpush1.bf16.msra.mxu0 %v7754_v44  ;;  %3807 = vmatpush1.bf16.msra.mxu1 %v7757_v47  ;;  %v7825_v44 = vld [vmem:[%s11531_s6 + $0x2b8] ss:$28 sps:$4 sm:$0xff]   ;;  %v7822_v47 = vld [vmem:[%s11531_s6 + $0xf0] ss:$28 sps:$4 sm:$0xff]  }
 0x464   :  { %3726 = vmatprep.subr.bf16.mxu0 %v7762_v50  ;;  %3808 = vmatprep.subr.bf16.mxu1 %v7765_v48  ;;  %v7826_v50 = vld [vmem:[%s11531_s6 + $0xf8] ss:$28 sps:$4 sm:$0xff]   ;;  %v7829_v48 = vld [vmem:[%s11531_s6 + $0x12c] ss:$28 sps:$4 sm:$0xff]  }
 0x467   :  { %3727 = vmatpush1.bf16.msra.mxu0 %v7760_v63  ;;  %3809 = vmatpush1.bf16.msra.mxu1 %v7763_v39  ;;  %v7827_v63 = vld [vmem:[%s11531_s6 + $0x128] ss:$28 sps:$4 sm:$0xff]   ;;  %v7830_v39 = vld [vmem:[%s11531_s6 + $0x2f0] ss:$28 sps:$4 sm:$0xff]  }
 0x468   :  { %3728 = vmatprep.subr.bf16.mxu0 %v7768_v41  ;;  %3810 = vmatprep.subr.bf16.mxu1 %v7771_v43  ;;  %v7831_v41 = vld [vmem:[%s11531_s6 + $0x130] ss:$28 sps:$4 sm:$0xff]   ;;  %v7834_v43 = vld [vmem:[%s11531_s6 + $0x164] ss:$28 sps:$4 sm:$0xff]  }
 0x46b   :  { %3729 = vmatpush1.bf16.msra.mxu0 %v7766_v45  ;;  %3811 = vmatpush1.bf16.msra.mxu1 %v7769_v49  ;;  %v7832_v45 = vld [vmem:[%s11531_s6 + $0x160] ss:$28 sps:$4 sm:$0xff]   ;;  %v7835_v49 = vld [vmem:[%s11531_s6 + $0x328] ss:$28 sps:$4 sm:$0xff]  }
 0x46c   :  { %3730 = vmatprep.subr.bf16.mxu0 %v7774_v60  ;;  %3812 = vmatprep.subr.bf16.mxu1 %v7777_v58  ;;  %v7836_v60 = vld [vmem:[%s11531_s6 + $0x168] ss:$28 sps:$4 sm:$0xff]   ;;  %v7839_v58 = vld [vmem:[%s11531_s6 + $0x19c] ss:$28 sps:$4 sm:$0xff]  }
 0x46d   :  { %v2675_v11 = vpop.f32.mrb[70].mxu0 }
 0x46e   :  { %v2676_v17 = vadd.f32 %v2675_v11, %v9832_v12  ;;  %v2677_v57 = vpop.f32.mrb[71].mxu0  ;;  %v7842_v11 = vld [vmem:[%s11531_s6 + $0x1d0] ss:$28 sps:$4 sm:$0xff]  }
 0x46f   :  { %v2678_v25 = vadd.f32 %v2677_v57, %v9832_v12  ;;  %3731 = vmatpush1.bf16.msra.mxu0 %v7772_v53  ;;  %3813 = vmatpush1.bf16.msra.mxu1 %v7775_v2  ;;  %v3666_v12 = vand.u32 %v7801_v61, %v11710_v8  ;;  %v7837_v53 = vld [vmem:[%s11531_s6 + $0x198] ss:$28 sps:$4 sm:$0xff]   ;;  %v7840_v2 = vld [vmem:[%s11531_s6 + $0x360] ss:$28 sps:$4 sm:$0xff]   ;;  %v11711_v57 = vmov 0  }
 0x470   :  { %v2682_v9 = vadd.f32 %v8479_v30, %v2676_v17  ;;  %3732 = vmatprep.subr.bf16.mxu0 %v7780_v4  ;;  %3814 = vmatprep.subr.bf16.mxu1 %v7783_v6  ;;  %v7841_v4 = vld [vmem:[%s11531_s6 + $0x1a0] ss:$28 sps:$4 sm:$0xff]   ;;  %v7844_v6 = vld [vmem:[%s11531_s6 + $0x1d4] ss:$28 sps:$4 sm:$0xff]  }
 0x471   :  { %v2683_v28 = vadd.f32 %v8480_v13, %v2678_v25  ;;  %v7845_v17 = vld [vmem:[%s11531_s6 + $0x398] ss:$28 sps:$4 sm:$0xff]   ;;  %v7849_v25 = vld [vmem:[%s11531_s6 + $0x3d0] ss:$28 sps:$4 sm:$0xff]   ;;  %v7852_v30 = vld [vmem:[%s11531_s6 + $0x244] ss:$28 sps:$4 sm:$0xff]  }
 0x472   :  { %6497 = vst [vmem:[%s11534_s8 + $0x10] sm:$0x3f] %v2682_v9  ;;  %v10015_v24 = vpack.c.bf16 %v2682_v9, %v2682_v9  ;;  %v7850_v9 = vld [vmem:[%s11531_s6 + $0x240] ss:$28 sps:$4 sm:$0xff]   ;;  %v7854_v13 = vld [vmem:[%s11531_s6 + $0x278] ss:$28 sps:$4 sm:$0xff]  }
 0x473   :  { %v9975_v59 = vpack.c.bf16 %v2683_v28, %v2683_v28  ;;  %6499 = vst.msk [vmem:[%s11534_s8 + $0x18] sm:$0x3f] %vm6498_vm5, %v2683_v28  ;;  %3733 = vmatpush1.bf16.msra.mxu0 %v7778_v21  ;;  %3815 = vmatpush1.bf16.msra.mxu1 %v7781_v23  ;;  %v7846_v21 = vld [vmem:[%s11531_s6 + $0x208] ss:$28 sps:$4 sm:$0xff]   ;;  %v7857_v28 = vld [vmem:[%s11531_s6 + $0x440] ss:$28 sps:$4 sm:$0xff]  }
 0x474   :  { %3734 = vmatprep.subr.bf16.mxu0 %v7786_v51  ;;  %3816 = vmatprep.subr.bf16.mxu1 %v7789_v31  ;;  %v7848_v23 = vld [vmem:[%s11531_s6 + $0x20c] ss:$28 sps:$4 sm:$0xff]   ;;  %v7856_v31 = vld [vmem:[%s11531_s6 + $0x27c] ss:$28 sps:$4 sm:$0xff]  }
 0x475   :  { %6886 = vmatprep.mubr.msk.bf16.mxu0 %vm1313_vm0, %v9975_v59  ;;  %6887 = vmatprep.mubr.msk.bf16.mxu1 %vm1313_vm0, %v9975_v59  ;;  %v7853_v51 = vld [vmem:[%s11531_s6 + $0x408] ss:$28 sps:$4 sm:$0xff]   ;;  %v7865_v61 = vld [vmem:[%s11531_s6 + $0x4b0] ss:$28 sps:$4 sm:$0xff]  }
 0x477   :  { %3735 = vmatpush1.bf16.msra.mxu0 %v7784_v42  ;;  %3817 = vmatpush1.bf16.msra.mxu1 %v7787_v52  ;;  %v7860_v42 = vld [vmem:[%s11531_s6 + $0x2b4] ss:$28 sps:$4 sm:$0xff]  }
 0x478   :  { %3736 = vmatprep.subr.bf16.mxu0 %v7792_v54  ;;  %3818 = vmatprep.subr.bf16.mxu1 %v7795_v62  ;;  %v7858_v52 = vld [vmem:[%s11531_s6 + $0x2b0] ss:$28 sps:$4 sm:$0xff]   ;;  %v7861_v54 = vld [vmem:[%s11531_s6 + $0x478] ss:$28 sps:$4 sm:$0xff]  }
 0x479   :  { %v7864_v62 = vld [vmem:[%s11531_s6 + $0x2ec] ss:$28 sps:$4 sm:$0xff]  }
 0x47b   :  { %3737 = vmatpush1.bf16.msra.mxu0 %v7790_v0  ;;  %3819 = vmatpush1.bf16.msra.mxu1 %v7793_v3  ;;  %v7868_v0 = vld [vmem:[%s11531_s6 + $0x324] ss:$28 sps:$4 sm:$0xff]  }
 0x47c   :  { %3738 = vmatprep.subr.bf16.mxu0 %v3660_v10  ;;  %3820 = vmatprep.subr.bf16.mxu1 %v3666_v12  ;;  %v7866_v3 = vld [vmem:[%s11531_s6 + $0x320] ss:$28 sps:$4 sm:$0xff]   ;;  %v7870_v10 = vld [vmem:[%s11531_s6 + $0x358] ss:$28 sps:$4 sm:$0xff]  }
 0x47d   :  { %v7873_v12 = vld [vmem:[%s11531_s6 + $0x520] ss:$28 sps:$4 sm:$0xff]  }
 0x47f   :  { %3739 = vmatpush1.bf16.msra.mxu0 %v3657_v15  ;;  %3821 = vmatpush1.bf16.msra.mxu1 %v3663_v16  ;;  %v7876_v15 = vld [vmem:[%s11531_s6 + $0x394] ss:$28 sps:$4 sm:$0xff]  }
 0x480   :  { %3841 = vmatprep.subr.bf16.mxu0 %v7804_v18  ;;  %7275 = vmatprep.subr.bf16.mxu1 %v7805_v20  ;;  %v7874_v16 = vld [vmem:[%s11531_s6 + $0x390] ss:$28 sps:$4 sm:$0xff]   ;;  %v7877_v18 = vld [vmem:[%s11531_s6 + $0x558] ss:$28 sps:$4 sm:$0xff]  }
 0x481   :  { %v7880_v20 = vld [vmem:[%s11531_s6 + $0x3cc] ss:$28 sps:$4 sm:$0xff]  }
 0x482   :  { %3751 = vmatmul.mubr.bf16.vlgmr.msra.gmra.mrb[72].mxu0 %v10015_v24  ;;  %3833 = vmatmul.mubr.bf16.vlgmr.msra.gmra.mrb[68].mxu1 %v10015_v24 }
 0x483   :  { %3842 = vmatpush1.bf16.msra.mxu0 %v7802_v22  ;;  %3873 = vmatprep.mubr.bf16.mxu0 %v9851_v35  ;;  %v7878_v22 = vld [vmem:[%s11531_s6 + $0x3c8] ss:$28 sps:$4 sm:$0xff]  }
 0x484   :  { %7276 = vmatpush3.bf16.msra.mxu1 %v7806_v26  ;;  %3955 = vmatprep.mubr.bf16.mxu1 %v9851_v35  ;;  %v7881_v26 = vld [vmem:[%s11531_s6 + $0x590] ss:$28 sps:$4 sm:$0xff]  }
 0x485   :  { %3843 = vmatprep.subr.bf16.mxu0 %v7809_v55  ;;  %7277 = vmatprep.subr.bf16.mxu1 %v7810_v1  ;;  %v7885_v55 = vld [vmem:[%s11531_s6 + $0x5c8] ss:$28 sps:$4 sm:$0xff]   ;;  %v7882_v1 = vld [vmem:[%s11531_s6 + $0x400] ss:$28 sps:$4 sm:$0xff]  }
 0x487   :  { %3844 = vmatpush1.bf16.msra.mxu0 %v7807_v27  ;;  %v7884_v27 = vld [vmem:[%s11531_s6 + $0x404] ss:$28 sps:$4 sm:$0xff]  }
 0x488   :  { %7278 = vmatpush3.bf16.msra.mxu1 %v7811_v46  ;;  %3845 = vmatprep.subr.bf16.mxu0 %v7814_v37  ;;  %v3675_v46 = vand.u32 %v7885_v55, %v11710_v8  ;;  %v7888_v37 = vld [vmem:[%s11531_s6 + $0x43c] ss:$28 sps:$4 sm:$0xff]  }
 0x489   :  { %7279 = vmatprep.subr.bf16.mxu1 %v7815_v29  ;;  %v7891_v29 = vld [vmem:[%s11533_s7 + $0x4] ss:$56 sps:$4 sm:$0xff]   ;;  %v7967_v55 = vld [vmem:[%s11533_s7 + $0x238] ss:$56 sps:$4 sm:$0xff]  }
 0x48b   :  { %3846 = vmatpush1.bf16.msra.mxu0 %v7812_v19  ;;  %v7886_v19 = vld [vmem:[%s11531_s6 + $0x438] ss:$28 sps:$4 sm:$0xff]  }
 0x48c   :  { %7280 = vmatpush3.bf16.msra.mxu1 %v7816_v32  ;;  %3847 = vmatprep.subr.bf16.mxu0 %v7819_v33  ;;  %v7889_v32 = vld [vmem:[%s11533_s7] ss:$56 sps:$4 sm:$0xff]   ;;  %v7894_v33 = vld [vmem:[%s11531_s6 + $0x474] ss:$28 sps:$4 sm:$0xff]  }
 0x48d   :  { %7281 = vmatprep.subr.bf16.mxu1 %v7820_v36  ;;  %v7897_v36 = vld [vmem:[%s11533_s7 + $0x74] ss:$56 sps:$4 sm:$0xff]  }
 0x48f   :  { %3848 = vmatpush1.bf16.msra.mxu0 %v7817_v34  ;;  %v7892_v34 = vld [vmem:[%s11531_s6 + $0x470] ss:$28 sps:$4 sm:$0xff]  }
 0x490   :  { %7282 = vmatpush3.bf16.msra.mxu1 %v7821_v38  ;;  %3849 = vmatprep.subr.bf16.mxu0 %v7824_v40  ;;  %v7895_v38 = vld [vmem:[%s11533_s7 + $0x70] ss:$56 sps:$4 sm:$0xff]  }
 0x491   :  { %7283 = vmatprep.subr.bf16.mxu1 %v7825_v44  ;;  %v7900_v40 = vld [vmem:[%s11531_s6 + $0x4ac] ss:$28 sps:$4 sm:$0xff]  }
 0x492   :  { %v7898_v44 = vld [vmem:[%s11531_s6 + $0x4a8] ss:$28 sps:$4 sm:$0xff]  }
 0x493   :  { %3850 = vmatpush1.bf16.msra.mxu0 %v7822_v47  ;;  %v7903_v47 = vld [vmem:[%s11533_s7 + $0xe4] ss:$56 sps:$4 sm:$0xff]  }
 0x494   :  { %7284 = vmatpush3.bf16.msra.mxu1 %v7826_v50  ;;  %3851 = vmatprep.subr.bf16.mxu0 %v7829_v48  ;;  %v7901_v50 = vld [vmem:[%s11533_s7 + $0xe0] ss:$56 sps:$4 sm:$0xff]  }
 0x495   :  { %7285 = vmatprep.subr.bf16.mxu1 %v7830_v39  ;;  %v7906_v48 = vld [vmem:[%s11531_s6 + $0x4e4] ss:$28 sps:$4 sm:$0xff]   ;;  %v7909_v39 = vld [vmem:[%s11533_s7 + $0x154] ss:$56 sps:$4 sm:$0xff]  }
 0x497   :  { %3852 = vmatpush1.bf16.msra.mxu0 %v7827_v63  ;;  %v7904_v63 = vld [vmem:[%s11531_s6 + $0x4e0] ss:$28 sps:$4 sm:$0xff]  }
 0x498   :  { %7286 = vmatpush3.bf16.msra.mxu1 %v7831_v41  ;;  %3853 = vmatprep.subr.bf16.mxu0 %v7834_v43  ;;  %v7907_v41 = vld [vmem:[%s11533_s7 + $0x150] ss:$56 sps:$4 sm:$0xff]   ;;  %v7912_v43 = vld [vmem:[%s11531_s6 + $0x51c] ss:$28 sps:$4 sm:$0xff]  }
 0x499   :  { %7287 = vmatprep.subr.bf16.mxu1 %v7835_v49  ;;  %v7910_v49 = vld [vmem:[%s11531_s6 + $0x518] ss:$28 sps:$4 sm:$0xff]  }
 0x49b   :  { %3854 = vmatpush1.bf16.msra.mxu0 %v7832_v45  ;;  %v7915_v45 = vld [vmem:[%s11533_s7 + $0x1c4] ss:$56 sps:$4 sm:$0xff]  }
 0x49c   :  { %7288 = vmatpush3.bf16.msra.mxu1 %v7836_v60  ;;  %3855 = vmatprep.subr.bf16.mxu0 %v7839_v58  ;;  %v7913_v60 = vld [vmem:[%s11533_s7 + $0x1c0] ss:$56 sps:$4 sm:$0xff]   ;;  %v7918_v58 = vld [vmem:[%s11531_s6 + $0x554] ss:$28 sps:$4 sm:$0xff]  }
 0x49d   :  { %7289 = vmatprep.subr.bf16.mxu1 %v7840_v2  ;;  %v7921_v2 = vld [vmem:[%s11533_s7 + $0x234] ss:$56 sps:$4 sm:$0xff]  }
 0x49f   :  { %3856 = vmatpush1.bf16.msra.mxu0 %v7837_v53  ;;  %v7916_v53 = vld [vmem:[%s11531_s6 + $0x550] ss:$28 sps:$4 sm:$0xff]  }
 0x4a0   :  { %7290 = vmatpush3.bf16.msra.mxu1 %v7841_v4  ;;  %3857 = vmatprep.subr.bf16.mxu0 %v7844_v6  ;;  %v7919_v4 = vld [vmem:[%s11533_s7 + $0x230] ss:$56 sps:$4 sm:$0xff]  }
 0x4a1   :  { %3963 = vmatprep.subr.bf16.mxu1 %v11711_v57  ;;  %v7924_v6 = vld [vmem:[%s11531_s6 + $0x58c] ss:$28 sps:$4 sm:$0xff]  }
 0x4a3   :  { %3956 = vmatmul.mubr.bf16.vlgmr.msra.gmra.mrb[72].mxu1 %v9856_v14  ;;  %3858 = vmatpush1.bf16.msra.mxu0 %v7842_v11  ;;  %v7930_v11 = vld [vmem:[%s11531_s6 + $0x5c4] ss:$28 sps:$4 sm:$0xff]  }
 0x4a4   :  { %3964 = vmatpush1.bf16.msra.mxu1 %v7845_v17  ;;  %6889 = vmatprep.mubr.msk.bf16.mxu1 %vm1313_vm0, %v9975_v59  ;;  %v7922_v17 = vld [vmem:[%s11531_s6 + $0x588] ss:$28 sps:$4 sm:$0xff]  }
 0x4a5   :  { %3859 = vmatprep.subr.bf16.mxu0 %v7848_v23  ;;  %3965 = vmatprep.subr.bf16.mxu1 %v11711_v57  ;;  %v7925_v23 = vld [vmem:[%s11533_s7 + $0x2a0] ss:$56 sps:$4 sm:$0xff]  }
 0x4a7   :  { %3860 = vmatpush1.bf16.msra.mxu0 %v7846_v21  ;;  %v7928_v21 = vld [vmem:[%s11531_s6 + $0x5c0] ss:$28 sps:$4 sm:$0xff]  }
 0x4a8   :  { %3966 = vmatpush1.bf16.msra.mxu1 %v7849_v25  ;;  %3861 = vmatprep.subr.bf16.mxu0 %v7852_v30  ;;  %v3672_v25 = vand.u32 %v7930_v11, %v11710_v8  ;;  %v7933_v30 = vld [vmem:[%s11533_s7 + $0x314] ss:$56 sps:$4 sm:$0xff]   ;;  %v8009_v11 = vld [vmem:[%s11533_s7 + $0x548] ss:$56 sps:$4 sm:$0xff]  }
 0x4a9   :  { %3967 = vmatprep.subr.bf16.mxu1 %v11711_v57 }
 0x4ab   :  { %3862 = vmatpush1.bf16.msra.mxu0 %v7850_v9  ;;  %v3669_v9 = vand.u32 %v7928_v21, %v11710_v8  ;;  %v8014_v21 = vld [vmem:[%s11533_s7 + $0x934] ss:$56 sps:$4 sm:$0xff]  }
 0x4ac   :  { %3968 = vmatpush1.bf16.msra.mxu1 %v7853_v51  ;;  %3863 = vmatprep.subr.bf16.mxu0 %v7856_v31  ;;  %v7931_v51 = vld [vmem:[%s11533_s7 + $0x310] ss:$56 sps:$4 sm:$0xff]   ;;  %v7939_v31 = vld [vmem:[%s11533_s7 + $0xc] ss:$56 sps:$4 sm:$0xff]  }
 0x4ad   :  { %3969 = vmatprep.subr.bf16.mxu1 %v11711_v57 }
 0x4af   :  { %3864 = vmatpush1.bf16.msra.mxu0 %v7854_v13  ;;  %v7936_v13 = vld [vmem:[%s11533_s7 + $0x384] ss:$56 sps:$4 sm:$0xff]  }
 0x4b0   :  { %3970 = vmatpush1.bf16.msra.mxu1 %v7857_v28  ;;  %3865 = vmatprep.subr.bf16.mxu0 %v7860_v42  ;;  %v7937_v28 = vld [vmem:[%s11533_s7 + $0x8] ss:$56 sps:$4 sm:$0xff]  }
 0x4b1   :  { %3971 = vmatprep.subr.bf16.mxu1 %v11711_v57  ;;  %v7934_v42 = vld [vmem:[%s11533_s7 + $0x380] ss:$56 sps:$4 sm:$0xff]  }
 0x4b3   :  { %3866 = vmatpush1.bf16.msra.mxu0 %v7858_v52  ;;  %v7945_v52 = vld [vmem:[%s11533_s7 + $0x7c] ss:$56 sps:$4 sm:$0xff]  }
 0x4b4   :  { %3972 = vmatpush1.bf16.msra.mxu1 %v7861_v54  ;;  %3867 = vmatprep.subr.bf16.mxu0 %v7864_v62  ;;  %v7942_v54 = vld [vmem:[%s11533_s7 + $0x3f4] ss:$56 sps:$4 sm:$0xff]   ;;  %v7943_v62 = vld [vmem:[%s11533_s7 + $0x78] ss:$56 sps:$4 sm:$0xff]  }
 0x4b5   :  { %3973 = vmatprep.subr.bf16.mxu1 %v11711_v57 }
 0x4b7   :  { %3868 = vmatpush1.bf16.msra.mxu0 %v7862_v56  ;;  %v7940_v56 = vld [vmem:[%s11533_s7 + $0x3f0] ss:$56 sps:$4 sm:$0xff]  }
 0x4b8   :  { %3974 = vmatpush1.bf16.msra.mxu1 %v7865_v61  ;;  %3869 = vmatprep.subr.bf16.mxu0 %v7868_v0  ;;  %v7951_v61 = vld [vmem:[%s11533_s7 + $0xec] ss:$56 sps:$4 sm:$0xff]  }
 0x4b9   :  { %3975 = vmatprep.subr.bf16.mxu1 %v11711_v57  ;;  %v7948_v0 = vld [vmem:[%s11533_s7 + $0x464] ss:$56 sps:$4 sm:$0xff]  }
 0x4bb   :  { %3870 = vmatpush1.bf16.msra.mxu0 %v7866_v3  ;;  %v7949_v3 = vld [vmem:[%s11533_s7 + $0xe8] ss:$56 sps:$4 sm:$0xff]  }
 0x4bc   :  { %3976 = vmatpush1.bf16.msra.mxu1 %v7869_v5  ;;  %3871 = vmatprep.subr.bf16.mxu0 %v7872_v7  ;;  %v7946_v5 = vld [vmem:[%s11533_s7 + $0x460] ss:$56 sps:$4 sm:$0xff]   ;;  %v7957_v7 = vld [vmem:[%s11533_s7 + $0x15c] ss:$56 sps:$4 sm:$0xff]  }
 0x4bd   :  { %3977 = vmatprep.subr.bf16.mxu1 %v11711_v57 }
 0x4bf   :  { %3872 = vmatpush1.bf16.msra.mxu0 %v7870_v10  ;;  %v7954_v10 = vld [vmem:[%s11533_s7 + $0x4d4] ss:$56 sps:$4 sm:$0xff]  }
 0x4c0   :  { %3978 = vmatpush1.bf16.msra.mxu1 %v7873_v12  ;;  %3882 = vmatprep.subr.bf16.mxu0 %v7876_v15  ;;  %v7952_v12 = vld [vmem:[%s11533_s7 + $0x4d0] ss:$56 sps:$4 sm:$0xff]  }
 0x4c1   :  { %3979 = vmatprep.subr.bf16.mxu1 %v11711_v57  ;;  %v7955_v15 = vld [vmem:[%s11533_s7 + $0x158] ss:$56 sps:$4 sm:$0xff]  }
 0x4c2   :  { %3874 = vmatmul.mubr.bf16.vlgmr.msra.gmra.mrb[76].mxu0 %v9856_v14 }
 0x4c3   :  { %3883 = vmatpush1.bf16.msra.mxu0 %v7874_v16  ;;  %6888 = vmatprep.mubr.msk.bf16.mxu0 %vm1313_vm0, %v9975_v59  ;;  %v7963_v16 = vld [vmem:[%s11533_s7 + $0x1cc] ss:$56 sps:$4 sm:$0xff]  }
 0x4c4   :  { %3980 = vmatpush1.bf16.msra.mxu1 %v7877_v18  ;;  %3884 = vmatprep.subr.bf16.mxu0 %v7880_v20  ;;  %v7960_v18 = vld [vmem:[%s11533_s7 + $0x544] ss:$56 sps:$4 sm:$0xff]   ;;  %v7961_v20 = vld [vmem:[%s11533_s7 + $0x1c8] ss:$56 sps:$4 sm:$0xff]  }
 0x4c5   :  { %3981 = vmatprep.subr.bf16.mxu1 %v11711_v57 }
 0x4c7   :  { %3885 = vmatpush1.bf16.msra.mxu0 %v7878_v22  ;;  %v7958_v22 = vld [vmem:[%s11533_s7 + $0x540] ss:$56 sps:$4 sm:$0xff]  }
 0x4c8   :  { %3982 = vmatpush1.bf16.msra.mxu1 %v7881_v26  ;;  %3886 = vmatprep.subr.bf16.mxu0 %v7884_v27  ;;  %v7969_v26 = vld [vmem:[%s11533_s7 + $0x23c] ss:$56 sps:$4 sm:$0xff]  }
 0x4c9   :  { %3983 = vmatprep.subr.bf16.mxu1 %v11711_v57  ;;  %v7927_v57 = vld [vmem:[%s11533_s7 + $0x2a4] ss:$56 sps:$4 sm:$0xff]   ;;  %v7966_v27 = vld [vmem:[%s11533_s7 + $0x5b4] ss:$56 sps:$4 sm:$0xff]  }
 0x4cb   :  { %3887 = vmatpush1.bf16.msra.mxu0 %v7882_v1  ;;  %v7964_v1 = vld [vmem:[%s11533_s7 + $0x5b0] ss:$56 sps:$4 sm:$0xff]  }
 0x4cc   :  { %3984 = vmatpush1.bf16.msra.mxu1 %v3675_v46  ;;  %3888 = vmatprep.subr.bf16.mxu0 %v7888_v37  ;;  %v7975_v46 = vld [vmem:[%s11533_s7 + $0x2ac] ss:$56 sps:$4 sm:$0xff]  }
 0x4cd   :  { %5921 = vmatprep.subr.bf16.mxu1 %v7891_v29  ;;  %v7972_v37 = vld [vmem:[%s11533_s7 + $0x624] ss:$56 sps:$4 sm:$0xff]   ;;  %v7970_v29 = vld [vmem:[%s11533_s7 + $0x620] ss:$56 sps:$4 sm:$0xff]  }
 0x4cf   :  { %3996 = vmatmul.mubr.bf16.vlgmr.msra.gmra.mrb[76].mxu1 %v10015_v24  ;;  %3889 = vmatpush1.bf16.msra.mxu0 %v7886_v19  ;;  %v7973_v19 = vld [vmem:[%s11533_s7 + $0x2a8] ss:$56 sps:$4 sm:$0xff]  }
 0x4d0   :  { %5922 = vmatpush1.bf16.msra.mxu1 %v7889_v32  ;;  %5953 = vmatprep.mubr.bf16.mxu1 %v9851_v35  ;;  %v7981_v32 = vld [vmem:[%s11533_s7 + $0x31c] ss:$56 sps:$4 sm:$0xff]  }
 0x4d1   :  { %3890 = vmatprep.subr.bf16.mxu0 %v7894_v33  ;;  %5923 = vmatprep.subr.bf16.mxu1 %v7897_v36  ;;  %v7978_v33 = vld [vmem:[%s11533_s7 + $0x694] ss:$56 sps:$4 sm:$0xff]   ;;  %v7976_v36 = vld [vmem:[%s11533_s7 + $0x690] ss:$56 sps:$4 sm:$0xff]  }
 0x4d3   :  { %3891 = vmatpush1.bf16.msra.mxu0 %v7892_v34  ;;  %v7979_v34 = vld [vmem:[%s11533_s7 + $0x318] ss:$56 sps:$4 sm:$0xff]  }
 0x4d4   :  { %5924 = vmatpush1.bf16.msra.mxu1 %v7895_v38  ;;  %3892 = vmatprep.subr.bf16.mxu0 %v7900_v40  ;;  %v7987_v38 = vld [vmem:[%s11533_s7 + $0x38c] ss:$56 sps:$4 sm:$0xff]  }
 0x4d5   :  { %5925 = vmatprep.subr.bf16.mxu1 %v7903_v47  ;;  %v7984_v40 = vld [vmem:[%s11533_s7 + $0x704] ss:$56 sps:$4 sm:$0xff]   ;;  %v7982_v47 = vld [vmem:[%s11533_s7 + $0x700] ss:$56 sps:$4 sm:$0xff]  }
 0x4d7   :  { %3893 = vmatpush1.bf16.msra.mxu0 %v7898_v44  ;;  %v7985_v44 = vld [vmem:[%s11533_s7 + $0x388] ss:$56 sps:$4 sm:$0xff]  }
 0x4d8   :  { %5926 = vmatpush1.bf16.msra.mxu1 %v7901_v50  ;;  %3894 = vmatprep.subr.bf16.mxu0 %v7906_v48  ;;  %v7990_v50 = vld [vmem:[%s11533_s7 + $0x774] ss:$56 sps:$4 sm:$0xff]  }
 0x4d9   :  { %5927 = vmatprep.subr.bf16.mxu1 %v7909_v39  ;;  %v7993_v48 = vld [vmem:[%s11533_s7 + $0x3fc] ss:$56 sps:$4 sm:$0xff]   ;;  %v7988_v39 = vld [vmem:[%s11533_s7 + $0x770] ss:$56 sps:$4 sm:$0xff]  }
 0x4db   :  { %3895 = vmatpush1.bf16.msra.mxu0 %v7904_v63  ;;  %v7991_v63 = vld [vmem:[%s11533_s7 + $0x3f8] ss:$56 sps:$4 sm:$0xff]  }
 0x4dc   :  { %5928 = vmatpush1.bf16.msra.mxu1 %v7907_v41  ;;  %3896 = vmatprep.subr.bf16.mxu0 %v7912_v43  ;;  %v7999_v41 = vld [vmem:[%s11533_s7 + $0x46c] ss:$56 sps:$4 sm:$0xff]  }
 0x4dd   :  { %5929 = vmatprep.subr.bf16.mxu1 %v7915_v45  ;;  %v7996_v43 = vld [vmem:[%s11533_s7 + $0x7e4] ss:$56 sps:$4 sm:$0xff]   ;;  %v7997_v45 = vld [vmem:[%s11533_s7 + $0x468] ss:$56 sps:$4 sm:$0xff]  }
 0x4df   :  { %3897 = vmatpush1.bf16.msra.mxu0 %v7910_v49  ;;  %v7994_v49 = vld [vmem:[%s11533_s7 + $0x7e0] ss:$56 sps:$4 sm:$0xff]  }
 0x4e0   :  { %5930 = vmatpush1.bf16.msra.mxu1 %v7913_v60  ;;  %3898 = vmatprep.subr.bf16.mxu0 %v7918_v58  ;;  %v8005_v60 = vld [vmem:[%s11533_s7 + $0x4dc] ss:$56 sps:$4 sm:$0xff]  }
 0x4e1   :  { %5931 = vmatprep.subr.bf16.mxu1 %v7921_v2  ;;  %v8002_v58 = vld [vmem:[%s11533_s7 + $0x854] ss:$56 sps:$4 sm:$0xff]   ;;  %v8000_v2 = vld [vmem:[%s11533_s7 + $0x850] ss:$56 sps:$4 sm:$0xff]  }
 0x4e3   :  { %3899 = vmatpush1.bf16.msra.mxu0 %v7916_v53  ;;  %v8003_v53 = vld [vmem:[%s11533_s7 + $0x4d8] ss:$56 sps:$4 sm:$0xff]  }
 0x4e4   :  { %5932 = vmatpush1.bf16.msra.mxu1 %v7919_v4  ;;  %3900 = vmatprep.subr.bf16.mxu0 %v7924_v6  ;;  %v8011_v4 = vld [vmem:[%s11533_s7 + $0x54c] ss:$56 sps:$4 sm:$0xff]  }
 0x4e5   :  { %5933 = vmatprep.subr.bf16.mxu1 %v7927_v57  ;;  %v8008_v6 = vld [vmem:[%s11533_s7 + $0x8c4] ss:$56 sps:$4 sm:$0xff]  }
 0x4e6   :  { %v8017_v57 = vld [vmem:[%s11533_s7 + $0x5bc] ss:$56 sps:$4 sm:$0xff]  }
 0x4e7   :  { %3901 = vmatpush1.bf16.msra.mxu0 %v7922_v17  ;;  %v8006_v17 = vld [vmem:[%s11533_s7 + $0x8c0] ss:$56 sps:$4 sm:$0xff]  }
 0x4e8   :  { %5934 = vmatpush1.bf16.msra.mxu1 %v7925_v23  ;;  %3902 = vmatprep.subr.bf16.mxu0 %v3672_v25  ;;  %v8015_v23 = vld [vmem:[%s11533_s7 + $0x5b8] ss:$56 sps:$4 sm:$0xff]  }
 0x4e9   :  { %5935 = vmatprep.subr.bf16.mxu1 %v7933_v30  ;;  %v8012_v25 = vld [vmem:[%s11533_s7 + $0x930] ss:$56 sps:$4 sm:$0xff]   ;;  %v8023_v30 = vld [vmem:[%s11533_s7 + $0x62c] ss:$56 sps:$4 sm:$0xff]  }
 0x4eb   :  { %3903 = vmatpush1.bf16.msra.mxu0 %v3669_v9  ;;  %v8020_v9 = vld [vmem:[%s11533_s7 + $0x9a4] ss:$56 sps:$4 sm:$0xff]  }
 0x4ec   :  { %5936 = vmatpush1.bf16.msra.mxu1 %v7931_v51  ;;  %6003 = vmatprep.subr.bf16.mxu0 %v7939_v31  ;;  %v8021_v51 = vld [vmem:[%s11533_s7 + $0x628] ss:$56 sps:$4 sm:$0xff]  }
 0x4ed   :  { %5937 = vmatprep.subr.bf16.mxu1 %v7936_v13  ;;  %v8018_v31 = vld [vmem:[%s11533_s7 + $0x9a0] ss:$56 sps:$4 sm:$0xff]   ;;  %v8029_v13 = vld [vmem:[%s11533_s7 + $0x69c] ss:$56 sps:$4 sm:$0xff]  }
 0x4ee   :  { %3915 = vmatmul.mubr.bf16.vlgmr.msra.gmra.mrb[76].mxu0 %v10015_v24 }
 0x4ef   :  { %6004 = vmatpush1.bf16.msra.mxu0 %v7937_v28  ;;  %6035 = vmatprep.mubr.bf16.mxu0 %v9851_v35  ;;  %v8026_v28 = vld [vmem:[%s11533_s7 + $0xa14] ss:$56 sps:$4 sm:$0xff]  }
 0x4f0   :  { %5938 = vmatpush1.bf16.msra.mxu1 %v7934_v42  ;;  %6005 = vmatprep.subr.bf16.mxu0 %v7945_v52  ;;  %v8027_v42 = vld [vmem:[%s11533_s7 + $0x698] ss:$56 sps:$4 sm:$0xff]  }
 0x4f1   :  { %5939 = vmatprep.subr.bf16.mxu1 %v7942_v54  ;;  %v8024_v52 = vld [vmem:[%s11533_s7 + $0xa10] ss:$56 sps:$4 sm:$0xff]   ;;  %v8035_v54 = vld [vmem:[%s11533_s7 + $0x70c] ss:$56 sps:$4 sm:$0xff]  }
 0x4f3   :  { %6006 = vmatpush1.bf16.msra.mxu0 %v7943_v62  ;;  %v8032_v62 = vld [vmem:[%s11533_s7 + $0xa84] ss:$56 sps:$4 sm:$0xff]  }
 0x4f4   :  { %5940 = vmatpush1.bf16.msra.mxu1 %v7940_v56  ;;  %6007 = vmatprep.subr.bf16.mxu0 %v7951_v61  ;;  %v8033_v56 = vld [vmem:[%s11533_s7 + $0x708] ss:$56 sps:$4 sm:$0xff]  }
 0x4f5   :  { %5941 = vmatprep.subr.bf16.mxu1 %v7948_v0  ;;  %v8030_v61 = vld [vmem:[%s11533_s7 + $0xa80] ss:$56 sps:$4 sm:$0xff]   ;;  %v8041_v0 = vld [vmem:[%s11533_s7 + $0x77c] ss:$56 sps:$4 sm:$0xff]  }
 0x4f7   :  { %6008 = vmatpush1.bf16.msra.mxu0 %v7949_v3  ;;  %v8038_v3 = vld [vmem:[%s11533_s7 + $0xaf4] ss:$56 sps:$4 sm:$0xff]  }
 0x4f8   :  { %5942 = vmatpush1.bf16.msra.mxu1 %v7946_v5  ;;  %6009 = vmatprep.subr.bf16.mxu0 %v7957_v7  ;;  %v8044_v5 = vld [vmem:[%s11533_s7 + $0xb64] ss:$56 sps:$4 sm:$0xff]   ;;  %v8039_v7 = vld [vmem:[%s11533_s7 + $0x778] ss:$56 sps:$4 sm:$0xff]  }
 0x4f9   :  { %5943 = vmatprep.subr.bf16.mxu1 %v7954_v10  ;;  %v8036_v10 = vld [vmem:[%s11533_s7 + $0xaf0] ss:$56 sps:$4 sm:$0xff]  }
 0x4fb   :  { %6010 = vmatpush1.bf16.msra.mxu0 %v7955_v15  ;;  %v8047_v15 = vld [vmem:[%s11533_s7 + $0x7ec] ss:$56 sps:$4 sm:$0xff]  }
 0x4fc   :  { %5944 = vmatpush1.bf16.msra.mxu1 %v7952_v12  ;;  %6011 = vmatprep.subr.bf16.mxu0 %v7963_v16  ;;  %v8042_v12 = vld [vmem:[%s11533_s7 + $0xb60] ss:$56 sps:$4 sm:$0xff]   ;;  %v5883_v16 = vand.u32 %v8044_v5, %v11710_v8  ;;  %v8110_v5 = vld [vmem:[%s11533_s7 + $0x474] ss:$56 sps:$4 sm:$0xff]  }
 0x4fd   :  { %5945 = vmatprep.subr.bf16.mxu1 %v7960_v18  ;;  %v8045_v18 = vld [vmem:[%s11533_s7 + $0x7e8] ss:$56 sps:$4 sm:$0xff]  }
 0x4ff   :  { %6012 = vmatpush1.bf16.msra.mxu0 %v7961_v20  ;;  %v5880_v20 = vand.u32 %v8042_v12, %v11710_v8  ;;  %v8119_v12 = vld [vmem:[%s11533_s7 + $0x16c] ss:$56 sps:$4 sm:$0xff]  }
 0x500   :  { %5946 = vmatpush1.bf16.msra.mxu1 %v7958_v22  ;;  %6013 = vmatprep.subr.bf16.mxu0 %v7969_v26  ;;  %v8050_v22 = vld [vmem:[%s11533_s7 + $0x85c] ss:$56 sps:$4 sm:$0xff]  }
 0x501   :  { %5947 = vmatprep.subr.bf16.mxu1 %v7966_v27  ;;  %v8053_v26 = vld [vmem:[%s11533_s7 + $0x14] ss:$56 sps:$4 sm:$0xff]   ;;  %v8048_v27 = vld [vmem:[%s11533_s7 + $0x858] ss:$56 sps:$4 sm:$0xff]  }
 0x503   :  { %6014 = vmatpush1.bf16.msra.mxu0 %v7967_v55  ;;  %v8051_v55 = vld [vmem:[%s11533_s7 + $0x10] ss:$56 sps:$4 sm:$0xff]  }
 0x504   :  { %5948 = vmatpush1.bf16.msra.mxu1 %v7964_v1  ;;  %6015 = vmatprep.subr.bf16.mxu0 %v7975_v46  ;;  %v8056_v1 = vld [vmem:[%s11533_s7 + $0x8cc] ss:$56 sps:$4 sm:$0xff]  }
 0x505   :  { %5949 = vmatprep.subr.bf16.mxu1 %v7972_v37  ;;  %v8059_v46 = vld [vmem:[%s11533_s7 + $0x84] ss:$56 sps:$4 sm:$0xff]   ;;  %v8054_v37 = vld [vmem:[%s11533_s7 + $0x8c8] ss:$56 sps:$4 sm:$0xff]  }
 0x507   :  { %6016 = vmatpush1.bf16.msra.mxu0 %v7973_v19  ;;  %v8057_v19 = vld [vmem:[%s11533_s7 + $0x80] ss:$56 sps:$4 sm:$0xff]  }
 0x508   :  { %5950 = vmatpush1.bf16.msra.mxu1 %v7970_v29  ;;  %6017 = vmatprep.subr.bf16.mxu0 %v7981_v32  ;;  %v8062_v29 = vld [vmem:[%s11533_s7 + $0x93c] ss:$56 sps:$4 sm:$0xff]  }
 0x509   :  { %5951 = vmatprep.subr.bf16.mxu1 %v7978_v33  ;;  %v8065_v32 = vld [vmem:[%s11533_s7 + $0xf4] ss:$56 sps:$4 sm:$0xff]   ;;  %v8060_v33 = vld [vmem:[%s11533_s7 + $0x938] ss:$56 sps:$4 sm:$0xff]  }
 0x50b   :  { %6018 = vmatpush1.bf16.msra.mxu0 %v7979_v34  ;;  %v8063_v34 = vld [vmem:[%s11533_s7 + $0xf0] ss:$56 sps:$4 sm:$0xff]  }
 0x50c   :  { %5952 = vmatpush1.bf16.msra.mxu1 %v7976_v36  ;;  %6019 = vmatprep.subr.bf16.mxu0 %v7987_v38  ;;  %v8068_v36 = vld [vmem:[%s11533_s7 + $0x9ac] ss:$56 sps:$4 sm:$0xff]  }
 0x50d   :  { %5962 = vmatprep.subr.bf16.mxu1 %v7984_v40  ;;  %v8071_v38 = vld [vmem:[%s11533_s7 + $0x164] ss:$56 sps:$4 sm:$0xff]   ;;  %v8066_v40 = vld [vmem:[%s11533_s7 + $0x9a8] ss:$56 sps:$4 sm:$0xff]  }
 0x50f   :  { %5954 = vmatmul.mubr.bf16.vlgmr.msra.gmra.mrb[80].mxu1 %v9856_v14  ;;  %6020 = vmatpush1.bf16.msra.mxu0 %v7985_v44  ;;  %v8069_v44 = vld [vmem:[%s11533_s7 + $0x160] ss:$56 sps:$4 sm:$0xff]  }
 0x510   :  { %5963 = vmatpush1.bf16.msra.mxu1 %v7982_v47  ;;  %7268 = vmatprep.mubr.msk.bf16.mxu1 %vm1313_vm0, %v9975_v59  ;;  %v8074_v47 = vld [vmem:[%s11533_s7 + $0xa1c] ss:$56 sps:$4 sm:$0xff]  }
 0x511   :  { %5964 = vmatprep.subr.bf16.mxu1 %v7990_v50  ;;  %6021 = vmatprep.subr.bf16.mxu0 %v7993_v48  ;;  %v8077_v50 = vld [vmem:[%s11533_s7 + $0x1d4] ss:$56 sps:$4 sm:$0xff]   ;;  %v8072_v48 = vld [vmem:[%s11533_s7 + $0xa18] ss:$56 sps:$4 sm:$0xff]  }
 0x513   :  { %6022 = vmatpush1.bf16.msra.mxu0 %v7991_v63  ;;  %v8075_v63 = vld [vmem:[%s11533_s7 + $0x1d0] ss:$56 sps:$4 sm:$0xff]  }
 0x514   :  { %5965 = vmatpush1.bf16.msra.mxu1 %v7988_v39  ;;  %6023 = vmatprep.subr.bf16.mxu0 %v7999_v41  ;;  %v8080_v39 = vld [vmem:[%s11533_s7 + $0xa8c] ss:$56 sps:$4 sm:$0xff]  }
 0x515   :  { %5966 = vmatprep.subr.bf16.mxu1 %v7996_v43  ;;  %v8083_v41 = vld [vmem:[%s11533_s7 + $0x244] ss:$56 sps:$4 sm:$0xff]   ;;  %v8078_v43 = vld [vmem:[%s11533_s7 + $0xa88] ss:$56 sps:$4 sm:$0xff]  }
 0x517   :  { %6024 = vmatpush1.bf16.msra.mxu0 %v7997_v45  ;;  %v8081_v45 = vld [vmem:[%s11533_s7 + $0x240] ss:$56 sps:$4 sm:$0xff]  }
 0x518   :  { %5967 = vmatpush1.bf16.msra.mxu1 %v7994_v49  ;;  %6025 = vmatprep.subr.bf16.mxu0 %v8005_v60  ;;  %v8086_v49 = vld [vmem:[%s11533_s7 + $0xafc] ss:$56 sps:$4 sm:$0xff]   ;;  %v8092_v60 = vld [vmem:[%s11533_s7 + $0xb6c] ss:$56 sps:$4 sm:$0xff]  }
 0x519   :  { %5968 = vmatprep.subr.bf16.mxu1 %v8002_v58  ;;  %v8089_v58 = vld [vmem:[%s11533_s7 + $0x2b4] ss:$56 sps:$4 sm:$0xff]  }
 0x51b   :  { %6026 = vmatpush1.bf16.msra.mxu0 %v8003_v53  ;;  %v8084_v53 = vld [vmem:[%s11533_s7 + $0xaf8] ss:$56 sps:$4 sm:$0xff]  }
 0x51c   :  { %5969 = vmatpush1.bf16.msra.mxu1 %v8000_v2  ;;  %6027 = vmatprep.subr.bf16.mxu0 %v8011_v4  ;;  %v8090_v2 = vld [vmem:[%s11533_s7 + $0xb68] ss:$56 sps:$4 sm:$0xff]  }
 0x51d   :  { %5970 = vmatprep.subr.bf16.mxu1 %v8008_v6  ;;  %v8087_v4 = vld [vmem:[%s11533_s7 + $0x2b0] ss:$56 sps:$4 sm:$0xff]   ;;  %v5889_v6 = vand.u32 %v8092_v60, %v11710_v8  ;;  %v8155_v60 = vld [vmem:[%s11533_s7 + $0x40c] ss:$56 sps:$4 sm:$0xff]  }
 0x51f   :  { %6028 = vmatpush1.bf16.msra.mxu0 %v8009_v11  ;;  %v8095_v11 = vld [vmem:[%s11533_s7 + $0x324] ss:$56 sps:$4 sm:$0xff]  }
 0x520   :  { %5971 = vmatpush1.bf16.msra.mxu1 %v8006_v17  ;;  %6029 = vmatprep.subr.bf16.mxu0 %v8017_v57  ;;  %v5886_v17 = vand.u32 %v8090_v2, %v11710_v8  ;;  %v8093_v57 = vld [vmem:[%s11533_s7 + $0x320] ss:$56 sps:$4 sm:$0xff]   ;;  %v8161_v2 = vld [vmem:[%s11533_s7 + $0x47c] ss:$56 sps:$4 sm:$0xff]  }
 0x521   :  { %5972 = vmatprep.subr.bf16.mxu1 %v8014_v21  ;;  %v8101_v21 = vld [vmem:[%s11533_s7 + $0x1c] ss:$56 sps:$4 sm:$0xff]  }
 0x523   :  { %6030 = vmatpush1.bf16.msra.mxu0 %v8015_v23 }
 0x524   :  { %5973 = vmatpush1.bf16.msra.mxu1 %v8012_v25  ;;  %6031 = vmatprep.subr.bf16.mxu0 %v8023_v30  ;;  %v8098_v30 = vld [vmem:[%s11533_s7 + $0x394] ss:$56 sps:$4 sm:$0xff]  }
 0x525   :  { %5974 = vmatprep.subr.bf16.mxu1 %v8020_v9 }
 0x527   :  { %6032 = vmatpush1.bf16.msra.mxu0 %v8021_v51 }
 0x528   :  { %5975 = vmatpush1.bf16.msra.mxu1 %v8018_v31  ;;  %6033 = vmatprep.subr.bf16.mxu0 %v8029_v13 }
 0x529   :  { %5976 = vmatprep.subr.bf16.mxu1 %v8026_v28  ;;  %v8099_v28 = vld [vmem:[%s11533_s7 + $0x18] ss:$56 sps:$4 sm:$0xff]  }
 0x52b   :  { %6034 = vmatpush1.bf16.msra.mxu0 %v8027_v42 }
 0x52c   :  { %5977 = vmatpush1.bf16.msra.mxu1 %v8024_v52  ;;  %6044 = vmatprep.subr.bf16.mxu0 %v8035_v54  ;;  %v8096_v54 = vld [vmem:[%s11533_s7 + $0x390] ss:$56 sps:$4 sm:$0xff]  }
 0x52d   :  { %5978 = vmatprep.subr.bf16.mxu1 %v8032_v62  ;;  %v8107_v62 = vld [vmem:[%s11533_s7 + $0x8c] ss:$56 sps:$4 sm:$0xff]  }
 0x52e   :  { %6036 = vmatmul.mubr.bf16.vlgmr.msra.gmra.mrb[80].mxu0 %v9856_v14 }
 0x52f   :  { %6045 = vmatpush1.bf16.msra.mxu0 %v8033_v56  ;;  %7269 = vmatprep.mubr.msk.bf16.mxu0 %vm1313_vm0, %v9975_v59  ;;  %v8104_v56 = vld [vmem:[%s11533_s7 + $0x404] ss:$56 sps:$4 sm:$0xff]  }
 0x530   :  { %5979 = vmatpush1.bf16.msra.mxu1 %v8030_v61  ;;  %6046 = vmatprep.subr.bf16.mxu0 %v8041_v0  ;;  %v8105_v61 = vld [vmem:[%s11533_s7 + $0x88] ss:$56 sps:$4 sm:$0xff]  }
 0x531   :  { %5980 = vmatprep.subr.bf16.mxu1 %v8038_v3  ;;  %v8102_v0 = vld [vmem:[%s11533_s7 + $0x400] ss:$56 sps:$4 sm:$0xff]   ;;  %v8113_v3 = vld [vmem:[%s11533_s7 + $0xfc] ss:$56 sps:$4 sm:$0xff]  }
 0x533   :  { %6047 = vmatpush1.bf16.msra.mxu0 %v8039_v7  ;;  %v8111_v7 = vld [vmem:[%s11533_s7 + $0xf8] ss:$56 sps:$4 sm:$0xff]  }
 0x534   :  { %5981 = vmatpush1.bf16.msra.mxu1 %v8036_v10  ;;  %6048 = vmatprep.subr.bf16.mxu0 %v8047_v15  ;;  %v8108_v10 = vld [vmem:[%s11533_s7 + $0x470] ss:$56 sps:$4 sm:$0xff]   ;;  %v8116_v15 = vld [vmem:[%s11533_s7 + $0x4e4] ss:$56 sps:$4 sm:$0xff]  }
 0x535   :  { %5982 = vmatprep.subr.bf16.mxu1 %v5883_v16  ;;  %v8117_v16 = vld [vmem:[%s11533_s7 + $0x168] ss:$56 sps:$4 sm:$0xff]  }
 0x537   :  { %6049 = vmatpush1.bf16.msra.mxu0 %v8045_v18  ;;  %v8114_v18 = vld [vmem:[%s11533_s7 + $0x4e0] ss:$56 sps:$4 sm:$0xff]  }
 0x538   :  { %5983 = vmatpush1.bf16.msra.mxu1 %v5880_v20  ;;  %6050 = vmatprep.subr.bf16.mxu0 %v8050_v22  ;;  %v8125_v20 = vld [vmem:[%s11533_s7 + $0x1dc] ss:$56 sps:$4 sm:$0xff]  }
 0x539   :  { %6085 = vmatprep.subr.bf16.mxu1 %v8053_v26  ;;  %v8122_v22 = vld [vmem:[%s11533_s7 + $0x554] ss:$56 sps:$4 sm:$0xff]   ;;  %v8123_v26 = vld [vmem:[%s11533_s7 + $0x1d8] ss:$56 sps:$4 sm:$0xff]  }
 0x53b   :  { %5995 = vmatmul.mubr.bf16.vlgmr.msra.gmra.mrb[80].mxu1 %v10015_v24  ;;  %6051 = vmatpush1.bf16.msra.mxu0 %v8048_v27  ;;  %v8120_v27 = vld [vmem:[%s11533_s7 + $0x550] ss:$56 sps:$4 sm:$0xff]  }
 0x53c   :  { %6086 = vmatpush1.bf16.msra.mxu1 %v8051_v55  ;;  %6117 = vmatprep.mubr.bf16.mxu1 %v9851_v35  ;;  %v8131_v55 = vld [vmem:[%s11533_s7 + $0x24c] ss:$56 sps:$4 sm:$0xff]  }
 0x53d   :  { %6052 = vmatprep.subr.bf16.mxu0 %v8056_v1  ;;  %6087 = vmatprep.subr.bf16.mxu1 %v8059_v46  ;;  %v8128_v1 = vld [vmem:[%s11533_s7 + $0x5c4] ss:$56 sps:$4 sm:$0xff]   ;;  %v8129_v46 = vld [vmem:[%s11533_s7 + $0x248] ss:$56 sps:$4 sm:$0xff]  }
 0x53f   :  { %6053 = vmatpush1.bf16.msra.mxu0 %v8054_v37  ;;  %v8126_v37 = vld [vmem:[%s11533_s7 + $0x5c0] ss:$56 sps:$4 sm:$0xff]  }
 0x540   :  { %6088 = vmatpush1.bf16.msra.mxu1 %v8057_v19  ;;  %6054 = vmatprep.subr.bf16.mxu0 %v8062_v29  ;;  %v8137_v19 = vld [vmem:[%s11533_s7 + $0x2bc] ss:$56 sps:$4 sm:$0xff]  }
 0x541   :  { %6089 = vmatprep.subr.bf16.mxu1 %v8065_v32  ;;  %v8134_v29 = vld [vmem:[%s11533_s7 + $0x634] ss:$56 sps:$4 sm:$0xff]   ;;  %v8135_v32 = vld [vmem:[%s11533_s7 + $0x2b8] ss:$56 sps:$4 sm:$0xff]  }
 0x543   :  { %6055 = vmatpush1.bf16.msra.mxu0 %v8060_v33  ;;  %v8132_v33 = vld [vmem:[%s11533_s7 + $0x630] ss:$56 sps:$4 sm:$0xff]  }
 0x544   :  { %6090 = vmatpush1.bf16.msra.mxu1 %v8063_v34  ;;  %6056 = vmatprep.subr.bf16.mxu0 %v8068_v36  ;;  %v8143_v34 = vld [vmem:[%s11533_s7 + $0x32c] ss:$56 sps:$4 sm:$0xff]  }
 0x545   :  { %6091 = vmatprep.subr.bf16.mxu1 %v8071_v38  ;;  %v8140_v36 = vld [vmem:[%s11533_s7 + $0x6a4] ss:$56 sps:$4 sm:$0xff]   ;;  %v8141_v38 = vld [vmem:[%s11533_s7 + $0x328] ss:$56 sps:$4 sm:$0xff]  }
 0x547   :  { %6057 = vmatpush1.bf16.msra.mxu0 %v8066_v40  ;;  %v8138_v40 = vld [vmem:[%s11533_s7 + $0x6a0] ss:$56 sps:$4 sm:$0xff]  }
 0x548   :  { %6092 = vmatpush1.bf16.msra.mxu1 %v8069_v44  ;;  %6058 = vmatprep.subr.bf16.mxu0 %v8074_v47  ;;  %v8149_v44 = vld [vmem:[%s11533_s7 + $0x39c] ss:$56 sps:$4 sm:$0xff]  }
 0x549   :  { %6093 = vmatprep.subr.bf16.mxu1 %v8077_v50  ;;  %v8146_v47 = vld [vmem:[%s11533_s7 + $0x714] ss:$56 sps:$4 sm:$0xff]  }
 0x54b   :  { %6059 = vmatpush1.bf16.msra.mxu0 %v8072_v48 }
 0x54c   :  { %6094 = vmatpush1.bf16.msra.mxu1 %v8075_v63  ;;  %6060 = vmatprep.subr.bf16.mxu0 %v8080_v39  ;;  %v8147_v63 = vld [vmem:[%s11533_s7 + $0x398] ss:$56 sps:$4 sm:$0xff]  }
 0x54d   :  { %6095 = vmatprep.subr.bf16.mxu1 %v8083_v41 }
 0x54f   :  { %6061 = vmatpush1.bf16.msra.mxu0 %v8078_v43  ;;  %v8144_v43 = vld [vmem:[%s11533_s7 + $0x710] ss:$56 sps:$4 sm:$0xff]  }
 0x550   :  { %6096 = vmatpush1.bf16.msra.mxu1 %v8081_v45  ;;  %6062 = vmatprep.subr.bf16.mxu0 %v8086_v49  ;;  %v8152_v49 = vld [vmem:[%s11533_s7 + $0x784] ss:$56 sps:$4 sm:$0xff]  }
 0x551   :  { %6097 = vmatprep.subr.bf16.mxu1 %v8089_v58  ;;  %v8153_v58 = vld [vmem:[%s11533_s7 + $0x408] ss:$56 sps:$4 sm:$0xff]  }
 0x553   :  { %6063 = vmatpush1.bf16.msra.mxu0 %v8084_v53  ;;  %v8150_v53 = vld [vmem:[%s11533_s7 + $0x780] ss:$56 sps:$4 sm:$0xff]  }
 0x554   :  { %6098 = vmatpush1.bf16.msra.mxu1 %v8087_v4  ;;  %6064 = vmatprep.subr.bf16.mxu0 %v5889_v6  ;;  %v8158_v4 = vld [vmem:[%s11533_s7 + $0x7f4] ss:$56 sps:$4 sm:$0xff]   ;;  %v8159_v6 = vld [vmem:[%s11533_s7 + $0x478] ss:$56 sps:$4 sm:$0xff]  }
 0x555   :  { %v3752_v23 = vpop.f32.mrb[72].mxu0  ;;  %v3834_v25 = vpop.f32.mrb[68].mxu1  ;;  %6099 = vmatprep.subr.bf16.mxu1 %v8095_v11  ;;  %v8156_v11 = vld [vmem:[%s11533_s7 + $0x7f0] ss:$56 sps:$4 sm:$0xff]  }
 0x556   :  { %6500 = vst [vmem:[%s11535_s9] sm:$0x3f] %v3752_v23  ;;  %6502 = vst [vmem:[%s11535_s9 + $0x10] sm:$0x3f] %v3834_v25  ;;  %v3754_v9 = vpop.f32.mrb[73].mxu0  ;;  %v3836_v51 = vpop.f32.mrb[69].mxu1 }
 0x557   :  { %6501 = vst [vmem:[%s11535_s9 + $0x8] sm:$0x3f] %v3754_v9  ;;  %6503 = vst [vmem:[%s11535_s9 + $0x18] sm:$0x3f] %v3836_v51  ;;  %v3756_v31 = vpop.f32.mrb[74].mxu0  ;;  %v3838_v13 = vpop.f32.mrb[70].mxu1  ;;  %6065 = vmatpush1.bf16.msra.mxu0 %v5886_v17 }
 0x558   :  { %6100 = vmatpush1.bf16.msra.mxu1 %v8093_v57  ;;  %v3757_v42 = vpop.f32.mrb[75].mxu0  ;;  %v3839_v52 = vpop.f32.mrb[71].mxu1  ;;  %6167 = vmatprep.subr.bf16.mxu0 %v8101_v21  ;;  %v8167_v17 = vld [vmem:[%s11533_s7 + $0x4ec] ss:$56 sps:$4 sm:$0xff]   ;;  %v8165_v21 = vld [vmem:[%s11533_s7 + $0x4e8] ss:$56 sps:$4 sm:$0xff]  }
 0x559   :  { %6101 = vmatprep.subr.bf16.mxu1 %v8098_v30  ;;  %v8164_v57 = vld [vmem:[%s11533_s7 + $0x864] ss:$56 sps:$4 sm:$0xff]   ;;  %v8162_v23 = vld [vmem:[%s11533_s7 + $0x860] ss:$56 sps:$4 sm:$0xff]   ;;  %v8170_v30 = vld [vmem:[%s11533_s7 + $0x8d4] ss:$56 sps:$4 sm:$0xff]  }
 0x55a   :  { %6077 = vmatmul.mubr.bf16.vlgmr.msra.gmra.mrb[80].mxu0 %v10015_v24  ;;  %v8173_v25 = vld [vmem:[%s11533_s7 + $0x55c] ss:$56 sps:$4 sm:$0xff]   ;;  %v8171_v9 = vld [vmem:[%s11533_s7 + $0x558] ss:$56 sps:$4 sm:$0xff]   ;;  %v8179_v31 = vld [vmem:[%s11533_s7 + $0x5cc] ss:$56 sps:$4 sm:$0xff]  }
 0x55b   :  { %6168 = vmatpush1.bf16.msra.mxu0 %v8099_v28  ;;  %6199 = vmatprep.mubr.bf16.mxu0 %v9851_v35  ;;  %v8168_v51 = vld [vmem:[%s11533_s7 + $0x8d0] ss:$56 sps:$4 sm:$0xff]   ;;  %v8176_v13 = vld [vmem:[%s11533_s7 + $0x944] ss:$56 sps:$4 sm:$0xff]   ;;  %v8174_v42 = vld [vmem:[%s11533_s7 + $0x940] ss:$56 sps:$4 sm:$0xff]  }
 0x55c   :  { %6102 = vmatpush1.bf16.msra.mxu1 %v8096_v54  ;;  %6169 = vmatprep.subr.bf16.mxu0 %v8107_v62  ;;  %v8177_v28 = vld [vmem:[%s11533_s7 + $0x5c8] ss:$56 sps:$4 sm:$0xff]   ;;  %v8185_v52 = vld [vmem:[%s11533_s7 + $0x63c] ss:$56 sps:$4 sm:$0xff]   ;;  %v8183_v62 = vld [vmem:[%s11533_s7 + $0x638] ss:$56 sps:$4 sm:$0xff]  }
 0x55d   :  { %6103 = vmatprep.subr.bf16.mxu1 %v8104_v56  ;;  %v8182_v54 = vld [vmem:[%s11533_s7 + $0x9b4] ss:$56 sps:$4 sm:$0xff]   ;;  %v8180_v56 = vld [vmem:[%s11533_s7 + $0x9b0] ss:$56 sps:$4 sm:$0xff]  }
 0x55f   :  { %6170 = vmatpush1.bf16.msra.mxu0 %v8105_v61  ;;  %v8191_v61 = vld [vmem:[%s11533_s7 + $0x6ac] ss:$56 sps:$4 sm:$0xff]  }
 0x560   :  { %6104 = vmatpush1.bf16.msra.mxu1 %v8102_v0  ;;  %6171 = vmatprep.subr.bf16.mxu0 %v8113_v3  ;;  %v8188_v0 = vld [vmem:[%s11533_s7 + $0xa24] ss:$56 sps:$4 sm:$0xff]   ;;  %v8189_v3 = vld [vmem:[%s11533_s7 + $0x6a8] ss:$56 sps:$4 sm:$0xff]  }
 0x561   :  { %6105 = vmatprep.subr.bf16.mxu1 %v8110_v5  ;;  %v8186_v5 = vld [vmem:[%s11533_s7 + $0xa20] ss:$56 sps:$4 sm:$0xff]  }
 0x563   :  { %6172 = vmatpush1.bf16.msra.mxu0 %v8111_v7  ;;  %v8197_v7 = vld [vmem:[%s11533_s7 + $0x71c] ss:$56 sps:$4 sm:$0xff]  }
 0x564   :  { %6106 = vmatpush1.bf16.msra.mxu1 %v8108_v10  ;;  %6173 = vmatprep.subr.bf16.mxu0 %v8119_v12  ;;  %v8194_v10 = vld [vmem:[%s11533_s7 + $0xa94] ss:$56 sps:$4 sm:$0xff]   ;;  %v8195_v12 = vld [vmem:[%s11533_s7 + $0x718] ss:$56 sps:$4 sm:$0xff]  }
 0x565   :  { %6107 = vmatprep.subr.bf16.mxu1 %v8116_v15  ;;  %v8192_v15 = vld [vmem:[%s11533_s7 + $0xa90] ss:$56 sps:$4 sm:$0xff]  }
 0x567   :  { %6174 = vmatpush1.bf16.msra.mxu0 %v8117_v16  ;;  %v8203_v16 = vld [vmem:[%s11533_s7 + $0x78c] ss:$56 sps:$4 sm:$0xff]  }
 0x568   :  { %6108 = vmatpush1.bf16.msra.mxu1 %v8114_v18  ;;  %6175 = vmatprep.subr.bf16.mxu0 %v8125_v20  ;;  %v8200_v18 = vld [vmem:[%s11533_s7 + $0xb04] ss:$56 sps:$4 sm:$0xff]   ;;  %v8206_v20 = vld [vmem:[%s11533_s7 + $0xb74] ss:$56 sps:$4 sm:$0xff]  }
 0x569   :  { %6109 = vmatprep.subr.bf16.mxu1 %v8122_v22  ;;  %v8201_v22 = vld [vmem:[%s11533_s7 + $0x788] ss:$56 sps:$4 sm:$0xff]  }
 0x56b   :  { %6176 = vmatpush1.bf16.msra.mxu0 %v8123_v26  ;;  %v8198_v26 = vld [vmem:[%s11533_s7 + $0xb00] ss:$56 sps:$4 sm:$0xff]  }
 0x56c   :  { %6110 = vmatpush1.bf16.msra.mxu1 %v8120_v27  ;;  %6177 = vmatprep.subr.bf16.mxu0 %v8131_v55  ;;  %v8204_v27 = vld [vmem:[%s11533_s7 + $0xb70] ss:$56 sps:$4 sm:$0xff]   ;;  %v8209_v55 = vld [vmem:[%s11533_s7 + $0x7fc] ss:$56 sps:$4 sm:$0xff]  }
 0x56d   :  { %6111 = vmatprep.subr.bf16.mxu1 %v8128_v1  ;;  %v5895_v1 = vand.u32 %v8206_v20, %v11710_v8  ;;  %v8275_v20 = vld [vmem:[%s11533_s7 + $0x10c] ss:$56 sps:$4 sm:$0xff]  }
 0x56f   :  { %6178 = vmatpush1.bf16.msra.mxu0 %v8129_v46  ;;  %v8207_v46 = vld [vmem:[%s11533_s7 + $0x7f8] ss:$56 sps:$4 sm:$0xff]  }
 0x570   :  { %6112 = vmatpush1.bf16.msra.mxu1 %v8126_v37  ;;  %6179 = vmatprep.subr.bf16.mxu0 %v8137_v19  ;;  %v5892_v37 = vand.u32 %v8204_v27, %v11710_v8  ;;  %v8212_v19 = vld [vmem:[%s11533_s7 + $0x86c] ss:$56 sps:$4 sm:$0xff]   ;;  %v8270_v27 = vld [vmem:[%s11533_s7 + $0x480] ss:$56 sps:$4 sm:$0xff]  }
 0x571   :  { %6113 = vmatprep.subr.bf16.mxu1 %v8134_v29  ;;  %v8215_v29 = vld [vmem:[%s11533_s7 + $0x24] ss:$56 sps:$4 sm:$0xff]  }
 0x573   :  { %6180 = vmatpush1.bf16.msra.mxu0 %v8135_v32 }
 0x574   :  { %6114 = vmatpush1.bf16.msra.mxu1 %v8132_v33  ;;  %6181 = vmatprep.subr.bf16.mxu0 %v8143_v34 }
 0x575   :  { %6115 = vmatprep.subr.bf16.mxu1 %v8140_v36  ;;  %v8210_v36 = vld [vmem:[%s11533_s7 + $0x868] ss:$56 sps:$4 sm:$0xff]  }
 0x576   :  { %v7291_v50 = vpop.f32.mrb[72].mxu1 }
 0x577   :  { %v7292_v48 = vpop.f32.mrb[73].mxu1  ;;  %6182 = vmatpush1.bf16.msra.mxu0 %v8141_v38 }
 0x578   :  { %v10782_v39 = vadd.f32 %v7292_v48, %v7291_v50  ;;  %v7294_v41 = vpop.f32.mrb[74].mxu1  ;;  %6116 = vmatpush1.bf16.msra.mxu1 %v8138_v40  ;;  %6183 = vmatprep.subr.bf16.mxu0 %v8149_v44  ;;  %v8213_v40 = vld [vmem:[%s11533_s7 + $0x20] ss:$56 sps:$4 sm:$0xff]   ;;  %v8221_v50 = vld [vmem:[%s11533_s7 + $0x94] ss:$56 sps:$4 sm:$0xff]  }
 0x579   :  { %v7295_v45 = vpop.f32.mrb[75].mxu1  ;;  %6126 = vmatprep.subr.bf16.mxu1 %v8146_v47  ;;  %v8218_v47 = vld [vmem:[%s11533_s7 + $0x8dc] ss:$56 sps:$4 sm:$0xff]   ;;  %v8216_v48 = vld [vmem:[%s11533_s7 + $0x8d8] ss:$56 sps:$4 sm:$0xff]  }
 0x57a   :  { %v8227_v41 = vld [vmem:[%s11533_s7 + $0x104] ss:$56 sps:$4 sm:$0xff]   ;;  %v8225_v45 = vld [vmem:[%s11533_s7 + $0x100] ss:$56 sps:$4 sm:$0xff]  }
 0x57b   :  { %6118 = vmatmul.mubr.bf16.vlgmr.msra.gmra.mrb[84].mxu1 %v9856_v14  ;;  %6184 = vmatpush1.bf16.msra.mxu0 %v8147_v63  ;;  %v8219_v63 = vld [vmem:[%s11533_s7 + $0x90] ss:$56 sps:$4 sm:$0xff]  }
 0x57c   :  { %6127 = vmatpush1.bf16.msra.mxu1 %v8144_v43  ;;  %7270 = vmatprep.mubr.msk.bf16.mxu1 %vm1313_vm0, %v9975_v59  ;;  %v8222_v43 = vld [vmem:[%s11533_s7 + $0x948] ss:$56 sps:$4 sm:$0xff]  }
 0x57d   :  { %6128 = vmatprep.subr.bf16.mxu1 %v8152_v49  ;;  %6185 = vmatprep.subr.bf16.mxu0 %v8155_v60  ;;  %v8230_v49 = vld [vmem:[%s11533_s7 + $0x9bc] ss:$56 sps:$4 sm:$0xff]  }
 0x57e   :  { %v8233_v60 = vld [vmem:[%s11533_s7 + $0x174] ss:$56 sps:$4 sm:$0xff]  }
 0x57f   :  { %6186 = vmatpush1.bf16.msra.mxu0 %v8153_v58  ;;  %v8228_v58 = vld [vmem:[%s11533_s7 + $0x9b8] ss:$56 sps:$4 sm:$0xff]  }
 0x580   :  { %6129 = vmatpush1.bf16.msra.mxu1 %v8150_v53  ;;  %6187 = vmatprep.subr.bf16.mxu0 %v8161_v2  ;;  %v8231_v53 = vld [vmem:[%s11533_s7 + $0x170] ss:$56 sps:$4 sm:$0xff]   ;;  %v8236_v2 = vld [vmem:[%s11533_s7 + $0xa2c] ss:$56 sps:$4 sm:$0xff]  }
 0x581   :  { %6130 = vmatprep.subr.bf16.mxu1 %v8158_v4  ;;  %v8239_v4 = vld [vmem:[%s11533_s7 + $0x1e4] ss:$56 sps:$4 sm:$0xff]  }
 0x583   :  { %6188 = vmatpush1.bf16.msra.mxu0 %v8159_v6  ;;  %v8234_v6 = vld [vmem:[%s11533_s7 + $0xa28] ss:$56 sps:$4 sm:$0xff]  }
 0x584   :  { %6131 = vmatpush1.bf16.msra.mxu1 %v8156_v11  ;;  %6189 = vmatprep.subr.bf16.mxu0 %v8167_v17  ;;  %v8237_v11 = vld [vmem:[%s11533_s7 + $0x1e0] ss:$56 sps:$4 sm:$0xff]   ;;  %v8242_v17 = vld [vmem:[%s11533_s7 + $0xa9c] ss:$56 sps:$4 sm:$0xff]  }
 0x585   :  { %6132 = vmatprep.subr.bf16.mxu1 %v8164_v57  ;;  %v8245_v57 = vld [vmem:[%s11533_s7 + $0x254] ss:$56 sps:$4 sm:$0xff]  }
 0x587   :  { %6190 = vmatpush1.bf16.msra.mxu0 %v8165_v21  ;;  %v8240_v21 = vld [vmem:[%s11533_s7 + $0xa98] ss:$56 sps:$4 sm:$0xff]  }
 0x588   :  { %6133 = vmatpush1.bf16.msra.mxu1 %v8162_v23  ;;  %6191 = vmatprep.subr.bf16.mxu0 %v8173_v25  ;;  %v8243_v23 = vld [vmem:[%s11533_s7 + $0x250] ss:$56 sps:$4 sm:$0xff]   ;;  %v8248_v25 = vld [vmem:[%s11533_s7 + $0xb0c] ss:$56 sps:$4 sm:$0xff]  }
 0x589   :  { %6134 = vmatprep.subr.bf16.mxu1 %v8170_v30  ;;  %v8254_v30 = vld [vmem:[%s11533_s7 + $0xb7c] ss:$56 sps:$4 sm:$0xff]  }
 0x58b   :  { %6192 = vmatpush1.bf16.msra.mxu0 %v8171_v9  ;;  %v8251_v9 = vld [vmem:[%s11533_s7 + $0x2c4] ss:$56 sps:$4 sm:$0xff]  }
 0x58c   :  { %6135 = vmatpush1.bf16.msra.mxu1 %v8168_v51  ;;  %6193 = vmatprep.subr.bf16.mxu0 %v8179_v31  ;;  %v8246_v51 = vld [vmem:[%s11533_s7 + $0xb08] ss:$56 sps:$4 sm:$0xff]   ;;  %v8252_v31 = vld [vmem:[%s11533_s7 + $0xb78] ss:$56 sps:$4 sm:$0xff]  }
 0x58d   :  { %6136 = vmatprep.subr.bf16.mxu1 %v8176_v13  ;;  %v8249_v13 = vld [vmem:[%s11533_s7 + $0x2c0] ss:$56 sps:$4 sm:$0xff]  }
 0x58f   :  { %6194 = vmatpush1.bf16.msra.mxu0 %v8177_v28  ;;  %v5901_v28 = vand.u32 %v8254_v30, %v11710_v8  ;;  %v8327_v30 = vld [vmem:[%s11533_s7 + $0x4f8] ss:$56 sps:$4 sm:$0xff]  }
 0x590   :  { %6137 = vmatpush1.bf16.msra.mxu1 %v8174_v42  ;;  %6195 = vmatprep.subr.bf16.mxu0 %v8185_v52  ;;  %v8257_v42 = vld [vmem:[%s11533_s7 + $0x334] ss:$56 sps:$4 sm:$0xff]   ;;  %v5898_v52 = vand.u32 %v8252_v31, %v11710_v8  ;;  %v8332_v31 = vld [vmem:[%s11533_s7 + $0x8e4] ss:$56 sps:$4 sm:$0xff]  }
 0x591   :  { %6138 = vmatprep.subr.bf16.mxu1 %v8182_v54  ;;  %v8255_v54 = vld [vmem:[%s11533_s7 + $0x330] ss:$56 sps:$4 sm:$0xff]  }
 0x593   :  { %6196 = vmatpush1.bf16.msra.mxu0 %v8183_v62  ;;  %v8263_v62 = vld [vmem:[%s11533_s7 + $0x2c] ss:$56 sps:$4 sm:$0xff]  }
 0x594   :  { %6139 = vmatpush1.bf16.msra.mxu1 %v8180_v56  ;;  %6197 = vmatprep.subr.bf16.mxu0 %v8191_v61  ;;  %v8260_v61 = vld [vmem:[%s11533_s7 + $0x3a4] ss:$56 sps:$4 sm:$0xff]  }
 0x595   :  { %6140 = vmatprep.subr.bf16.mxu1 %v8188_v0 }
 0x597   :  { %6198 = vmatpush1.bf16.msra.mxu0 %v8189_v3 }
 0x598   :  { %6141 = vmatpush1.bf16.msra.mxu1 %v8186_v5  ;;  %6208 = vmatprep.subr.bf16.mxu0 %v8197_v7  ;;  %v8261_v5 = vld [vmem:[%s11533_s7 + $0x28] ss:$56 sps:$4 sm:$0xff]  }
 0x599   :  { %6142 = vmatprep.subr.bf16.mxu1 %v8194_v10  ;;  %v8258_v10 = vld [vmem:[%s11533_s7 + $0x3a0] ss:$56 sps:$4 sm:$0xff]  }
 0x59a   :  { %6200 = vmatmul.mubr.bf16.vlgmr.msra.gmra.mrb[84].mxu0 %v9856_v14 }
 0x59b   :  { %6209 = vmatpush1.bf16.msra.mxu0 %v8195_v12  ;;  %7271 = vmatprep.mubr.msk.bf16.mxu0 %vm1313_vm0, %v9975_v59  ;;  %v8269_v12 = vld [vmem:[%s11533_s7 + $0x9c] ss:$56 sps:$4 sm:$0xff]  }
 0x59c   :  { %6143 = vmatpush1.bf16.msra.mxu1 %v8192_v15  ;;  %6210 = vmatprep.subr.bf16.mxu0 %v8203_v16  ;;  %v8266_v15 = vld [vmem:[%s11533_s7 + $0x414] ss:$56 sps:$4 sm:$0xff]   ;;  %v8267_v16 = vld [vmem:[%s11533_s7 + $0x98] ss:$56 sps:$4 sm:$0xff]  }
 0x59d   :  { %6144 = vmatprep.subr.bf16.mxu1 %v8200_v18  ;;  %v8264_v18 = vld [vmem:[%s11533_s7 + $0x410] ss:$56 sps:$4 sm:$0xff]  }
 0x59f   :  { %6211 = vmatpush1.bf16.msra.mxu0 %v8201_v22  ;;  %v8272_v22 = vld [vmem:[%s11533_s7 + $0x484] ss:$56 sps:$4 sm:$0xff]  }
 0x5a0   :  { %6145 = vmatpush1.bf16.msra.mxu1 %v8198_v26  ;;  %6212 = vmatprep.subr.bf16.mxu0 %v8209_v55  ;;  %v8273_v26 = vld [vmem:[%s11533_s7 + $0x108] ss:$56 sps:$4 sm:$0xff]   ;;  %v8281_v55 = vld [vmem:[%s11533_s7 + $0x17c] ss:$56 sps:$4 sm:$0xff]  }
 0x5a1   :  { %6146 = vmatprep.subr.bf16.mxu1 %v5895_v1  ;;  %v8278_v1 = vld [vmem:[%s11533_s7 + $0x4f4] ss:$56 sps:$4 sm:$0xff]  }
 0x5a2   :  { %v3997_v32 = vpop.f32.mrb[76].mxu1 }
 0x5a3   :  { %v3998_v33 = vadd.f32 %v10782_v39, %v3997_v32  ;;  %v3999_v34 = vpop.f32.mrb[77].mxu1  ;;  %6213 = vmatpush1.bf16.msra.mxu0 %v8207_v46  ;;  %v8224_v39 = vld [vmem:[%s11533_s7 + $0x94c] ss:$56 sps:$4 sm:$0xff]   ;;  %v8279_v46 = vld [vmem:[%s11533_s7 + $0x178] ss:$56 sps:$4 sm:$0xff]  }
 0x5a4   :  { %v4000_v38 = vpop.f32.mrb[78].mxu1  ;;  %6147 = vmatpush1.bf16.msra.mxu1 %v5892_v37  ;;  %6214 = vmatprep.subr.bf16.mxu0 %v8212_v19  ;;  %v8276_v37 = vld [vmem:[%s11533_s7 + $0x4f0] ss:$56 sps:$4 sm:$0xff]   ;;  %v8287_v19 = vld [vmem:[%s11533_s7 + $0x1ec] ss:$56 sps:$4 sm:$0xff]  }
 0x5a5   :  { %6507 = vst.msk [vmem:[%s11535_s9 + $0x30] sm:$0x3f] %vm6506_vm6, %v3998_v33  ;;  %v4001_v44 = vpop.f32.mrb[79].mxu1  ;;  %6249 = vmatprep.subr.bf16.mxu1 %v8215_v29  ;;  %v8284_v29 = vld [vmem:[%s11533_s7 + $0x564] ss:$56 sps:$4 sm:$0xff]  }
 0x5a6   :  { %v8285_v32 = vld [vmem:[%s11533_s7 + $0x1e8] ss:$56 sps:$4 sm:$0xff]   ;;  %v8293_v34 = vld [vmem:[%s11533_s7 + $0x25c] ss:$56 sps:$4 sm:$0xff]   ;;  %v8291_v38 = vld [vmem:[%s11533_s7 + $0x258] ss:$56 sps:$4 sm:$0xff]  }
 0x5a7   :  { %6159 = vmatmul.mubr.bf16.vlgmr.msra.gmra.mrb[84].mxu1 %v10015_v24  ;;  %6215 = vmatpush1.bf16.msra.mxu0 %v8210_v36  ;;  %v8282_v33 = vld [vmem:[%s11533_s7 + $0x560] ss:$56 sps:$4 sm:$0xff]   ;;  %v8290_v36 = vld [vmem:[%s11533_s7 + $0x5d4] ss:$56 sps:$4 sm:$0xff]  }
 0x5a8   :  { %6250 = vmatpush1.bf16.msra.mxu1 %v8213_v40  ;;  %6281 = vmatprep.mubr.bf16.mxu1 %v9851_v35  ;;  %v8288_v40 = vld [vmem:[%s11533_s7 + $0x5d0] ss:$56 sps:$4 sm:$0xff]   ;;  %v8299_v44 = vld [vmem:[%s11533_s7 + $0x2cc] ss:$56 sps:$4 sm:$0xff]  }
 0x5a9   :  { %6216 = vmatprep.subr.bf16.mxu0 %v8218_v47  ;;  %6251 = vmatprep.subr.bf16.mxu1 %v8221_v50  ;;  %v8296_v47 = vld [vmem:[%s11533_s7 + $0x644] ss:$56 sps:$4 sm:$0xff]   ;;  %v8297_v50 = vld [vmem:[%s11533_s7 + $0x2c8] ss:$56 sps:$4 sm:$0xff]  }
 0x5ab   :  { %6217 = vmatpush1.bf16.msra.mxu0 %v8216_v48  ;;  %v8294_v48 = vld [vmem:[%s11533_s7 + $0x640] ss:$56 sps:$4 sm:$0xff]  }
 0x5ac   :  { %6252 = vmatpush1.bf16.msra.mxu1 %v8219_v63  ;;  %6218 = vmatprep.subr.bf16.mxu0 %v8224_v39  ;;  %v8305_v63 = vld [vmem:[%s11533_s7 + $0x33c] ss:$56 sps:$4 sm:$0xff]  }
 0x5ad   :  { %6253 = vmatprep.subr.bf16.mxu1 %v8227_v41  ;;  %v8302_v39 = vld [vmem:[%s11533_s7 + $0x6b4] ss:$56 sps:$4 sm:$0xff]   ;;  %v8303_v41 = vld [vmem:[%s11533_s7 + $0x338] ss:$56 sps:$4 sm:$0xff]  }
 0x5af   :  { %6219 = vmatpush1.bf16.msra.mxu0 %v8222_v43  ;;  %v8300_v43 = vld [vmem:[%s11533_s7 + $0x6b0] ss:$56 sps:$4 sm:$0xff]  }
 0x5b0   :  { %6254 = vmatpush1.bf16.msra.mxu1 %v8225_v45  ;;  %6220 = vmatprep.subr.bf16.mxu0 %v8230_v49  ;;  %v8311_v45 = vld [vmem:[%s11533_s7 + $0x3ac] ss:$56 sps:$4 sm:$0xff]  }
 0x5b1   :  { %6255 = vmatprep.subr.bf16.mxu1 %v8233_v60  ;;  %v8308_v49 = vld [vmem:[%s11533_s7 + $0x724] ss:$56 sps:$4 sm:$0xff]   ;;  %v8309_v60 = vld [vmem:[%s11533_s7 + $0x3a8] ss:$56 sps:$4 sm:$0xff]  }
 0x5b3   :  { %6221 = vmatpush1.bf16.msra.mxu0 %v8228_v58  ;;  %v8306_v58 = vld [vmem:[%s11533_s7 + $0x720] ss:$56 sps:$4 sm:$0xff]  }
 0x5b4   :  { %6256 = vmatpush1.bf16.msra.mxu1 %v8231_v53  ;;  %6222 = vmatprep.subr.bf16.mxu0 %v8236_v2  ;;  %v8314_v53 = vld [vmem:[%s11533_s7 + $0x794] ss:$56 sps:$4 sm:$0xff]  }
 0x5b5   :  { %6257 = vmatprep.subr.bf16.mxu1 %v8239_v4  ;;  %v8317_v2 = vld [vmem:[%s11533_s7 + $0x41c] ss:$56 sps:$4 sm:$0xff]   ;;  %v8315_v4 = vld [vmem:[%s11533_s7 + $0x418] ss:$56 sps:$4 sm:$0xff]  }
 0x5b7   :  { %6223 = vmatpush1.bf16.msra.mxu0 %v8234_v6  ;;  %v8312_v6 = vld [vmem:[%s11533_s7 + $0x790] ss:$56 sps:$4 sm:$0xff]  }
 0x5b8   :  { %6258 = vmatpush1.bf16.msra.mxu1 %v8237_v11  ;;  %6224 = vmatprep.subr.bf16.mxu0 %v8242_v17  ;;  %v8323_v11 = vld [vmem:[%s11533_s7 + $0x48c] ss:$56 sps:$4 sm:$0xff]  }
 0x5b9   :  { %6259 = vmatprep.subr.bf16.mxu1 %v8245_v57  ;;  %v8320_v17 = vld [vmem:[%s11533_s7 + $0x804] ss:$56 sps:$4 sm:$0xff]   ;;  %v8321_v57 = vld [vmem:[%s11533_s7 + $0x488] ss:$56 sps:$4 sm:$0xff]  }
 0x5bb   :  { %6225 = vmatpush1.bf16.msra.mxu0 %v8240_v21  ;;  %v8318_v21 = vld [vmem:[%s11533_s7 + $0x800] ss:$56 sps:$4 sm:$0xff]  }
 0x5bc   :  { %6260 = vmatpush1.bf16.msra.mxu1 %v8243_v23  ;;  %6226 = vmatprep.subr.bf16.mxu0 %v8248_v25  ;;  %v8329_v23 = vld [vmem:[%s11533_s7 + $0x4fc] ss:$56 sps:$4 sm:$0xff]  }
 0x5bd   :  { %6261 = vmatprep.subr.bf16.mxu1 %v8251_v9  ;;  %v8326_v25 = vld [vmem:[%s11533_s7 + $0x874] ss:$56 sps:$4 sm:$0xff]   ;;  %v8324_v9 = vld [vmem:[%s11533_s7 + $0x870] ss:$56 sps:$4 sm:$0xff]  }
 0x5bf   :  { %6227 = vmatpush1.bf16.msra.mxu0 %v8246_v51  ;;  %v8335_v51 = vld [vmem:[%s11533_s7 + $0x56c] ss:$56 sps:$4 sm:$0xff]  }
 0x5c0   :  { %6262 = vmatpush1.bf16.msra.mxu1 %v8249_v13  ;;  %6228 = vmatprep.subr.bf16.mxu0 %v5901_v28  ;;  %v8333_v13 = vld [vmem:[%s11533_s7 + $0x568] ss:$56 sps:$4 sm:$0xff]  }
 0x5c1   :  { %v3916_v56 = vpop.f32.mrb[76].mxu0  ;;  %6263 = vmatprep.subr.bf16.mxu1 %v8257_v42  ;;  %v8330_v28 = vld [vmem:[%s11533_s7 + $0x8e0] ss:$56 sps:$4 sm:$0xff]   ;;  %v8341_v42 = vld [vmem:[%s11533_s7 + $0x5dc] ss:$56 sps:$4 sm:$0xff]  }
 0x5c2   :  { %6504 = vst [vmem:[%s11535_s9 + $0x20] sm:$0x3f] %v3916_v56  ;;  %v3918_v0 = vpop.f32.mrb[77].mxu0  ;;  %v8347_v56 = vld [vmem:[%s11533_s7 + $0x64c] ss:$56 sps:$4 sm:$0xff]  }
 0x5c3   :  { %6505 = vst [vmem:[%s11535_s9 + $0x28] sm:$0x3f] %v3918_v0  ;;  %v3920_v3 = vpop.f32.mrb[78].mxu0  ;;  %6229 = vmatpush1.bf16.msra.mxu0 %v5898_v52  ;;  %v8338_v52 = vld [vmem:[%s11533_s7 + $0x954] ss:$56 sps:$4 sm:$0xff]  }
 0x5c4   :  { %6264 = vmatpush1.bf16.msra.mxu1 %v8255_v54  ;;  %v3921_v7 = vpop.f32.mrb[79].mxu0  ;;  %6331 = vmatprep.subr.bf16.mxu0 %v8263_v62  ;;  %v8339_v54 = vld [vmem:[%s11533_s7 + $0x5d8] ss:$56 sps:$4 sm:$0xff]   ;;  %v8345_v0 = vld [vmem:[%s11533_s7 + $0x648] ss:$56 sps:$4 sm:$0xff]  }
 0x5c5   :  { %6265 = vmatprep.subr.bf16.mxu1 %v8260_v61  ;;  %v8336_v62 = vld [vmem:[%s11533_s7 + $0x950] ss:$56 sps:$4 sm:$0xff]   ;;  %v8344_v61 = vld [vmem:[%s11533_s7 + $0x9c4] ss:$56 sps:$4 sm:$0xff]   ;;  %v8342_v3 = vld [vmem:[%s11533_s7 + $0x9c0] ss:$56 sps:$4 sm:$0xff]  }
 0x5c6   :  { %6241 = vmatmul.mubr.bf16.vlgmr.msra.gmra.mrb[84].mxu0 %v10015_v24  ;;  %v8350_v7 = vld [vmem:[%s11533_s7 + $0xa34] ss:$56 sps:$4 sm:$0xff]  }
 0x5c7   :  { %6332 = vmatpush1.bf16.msra.mxu0 %v8261_v5  ;;  %6363 = vmatprep.mubr.bf16.mxu0 %v9851_v35  ;;  %v8353_v5 = vld [vmem:[%s11533_s7 + $0x6bc] ss:$56 sps:$4 sm:$0xff]  }
 0x5c8   :  { %6266 = vmatpush1.bf16.msra.mxu1 %v8258_v10  ;;  %6333 = vmatprep.subr.bf16.mxu0 %v8269_v12  ;;  %v8351_v10 = vld [vmem:[%s11533_s7 + $0x6b8] ss:$56 sps:$4 sm:$0xff]  }
 0x5c9   :  { %6267 = vmatprep.subr.bf16.mxu1 %v8266_v15  ;;  %v8348_v12 = vld [vmem:[%s11533_s7 + $0xa30] ss:$56 sps:$4 sm:$0xff]   ;;  %v8359_v15 = vld [vmem:[%s11533_s7 + $0x72c] ss:$56 sps:$4 sm:$0xff]  }
 0x5cb   :  { %6334 = vmatpush1.bf16.msra.mxu0 %v8267_v16  ;;  %v8356_v16 = vld [vmem:[%s11533_s7 + $0xaa4] ss:$56 sps:$4 sm:$0xff]  }
 0x5cc   :  { %6268 = vmatpush1.bf16.msra.mxu1 %v8264_v18  ;;  %6335 = vmatprep.subr.bf16.mxu0 %v8275_v20  ;;  %v8357_v18 = vld [vmem:[%s11533_s7 + $0x728] ss:$56 sps:$4 sm:$0xff]  }
 0x5cd   :  { %6269 = vmatprep.subr.bf16.mxu1 %v8272_v22  ;;  %v8354_v20 = vld [vmem:[%s11533_s7 + $0xaa0] ss:$56 sps:$4 sm:$0xff]   ;;  %v8365_v22 = vld [vmem:[%s11533_s7 + $0x79c] ss:$56 sps:$4 sm:$0xff]  }
 0x5cf   :  { %6336 = vmatpush1.bf16.msra.mxu0 %v8273_v26  ;;  %v8362_v26 = vld [vmem:[%s11533_s7 + $0xb14] ss:$56 sps:$4 sm:$0xff]  }
 0x5d0   :  { %6270 = vmatpush1.bf16.msra.mxu1 %v8270_v27  ;;  %6337 = vmatprep.subr.bf16.mxu0 %v8281_v55  ;;  %v8368_v27 = vld [vmem:[%s11533_s7 + $0xb84] ss:$56 sps:$4 sm:$0xff]   ;;  %v8363_v55 = vld [vmem:[%s11533_s7 + $0x798] ss:$56 sps:$4 sm:$0xff]  }
 0x5d1   :  { %6271 = vmatprep.subr.bf16.mxu1 %v8278_v1  ;;  %v8360_v1 = vld [vmem:[%s11533_s7 + $0xb10] ss:$56 sps:$4 sm:$0xff]  }
 0x5d3   :  { %6338 = vmatpush1.bf16.msra.mxu0 %v8279_v46  ;;  %v8366_v46 = vld [vmem:[%s11533_s7 + $0xb80] ss:$56 sps:$4 sm:$0xff]  }
 0x5d4   :  { %6272 = vmatpush1.bf16.msra.mxu1 %v8276_v37  ;;  %6339 = vmatprep.subr.bf16.mxu0 %v8287_v19  ;;  %v8371_v37 = vld [vmem:[%s11533_s7 + $0x80c] ss:$56 sps:$4 sm:$0xff]   ;;  %v5907_v19 = vand.u32 %v8368_v27, %v11710_v8 }
 0x5d5   :  { %6273 = vmatprep.subr.bf16.mxu1 %v8284_v29  ;;  %v8369_v29 = vld [vmem:[%s11533_s7 + $0x808] ss:$56 sps:$4 sm:$0xff]   ;;  %v8437_v27 = vld [vmem:[%s11533_s7 + $0x5e4] ss:$56 sps:$4 sm:$0xff]  }
 0x5d7   :  { %6340 = vmatpush1.bf16.msra.mxu0 %v8285_v32  ;;  %v5904_v32 = vand.u32 %v8366_v46, %v11710_v8  ;;  %v8438_v46 = vld [vmem:[%s11533_s7 + $0x650] ss:$56 sps:$4 sm:$0xff]  }
 0x5d8   :  { %6274 = vmatpush1.bf16.msra.mxu1 %v8282_v33  ;;  %6341 = vmatprep.subr.bf16.mxu0 %v8293_v34  ;;  %v8374_v33 = vld [vmem:[%s11533_s7 + $0x87c] ss:$56 sps:$4 sm:$0xff]  }
 0x5d9   :  { %6275 = vmatprep.subr.bf16.mxu1 %v8290_v36  ;;  %v8377_v34 = vld [vmem:[%s11533_s7 + $0x34] ss:$56 sps:$4 sm:$0xff]  }
 0x5db   :  { %6342 = vmatpush1.bf16.msra.mxu0 %v8291_v38 }
 0x5dc   :  { %6276 = vmatpush1.bf16.msra.mxu1 %v8288_v40  ;;  %6343 = vmatprep.subr.bf16.mxu0 %v8299_v44  ;;  %v8372_v40 = vld [vmem:[%s11533_s7 + $0x878] ss:$56 sps:$4 sm:$0xff]  }
 0x5dd   :  { %6277 = vmatprep.subr.bf16.mxu1 %v8296_v47  ;;  %v8375_v47 = vld [vmem:[%s11533_s7 + $0x30] ss:$56 sps:$4 sm:$0xff]  }
 0x5df   :  { %6344 = vmatpush1.bf16.msra.mxu0 %v8297_v50 }
 0x5e0   :  { %6278 = vmatpush1.bf16.msra.mxu1 %v8294_v48  ;;  %6345 = vmatprep.subr.bf16.mxu0 %v8305_v63  ;;  %v8380_v48 = vld [vmem:[%s11533_s7 + $0x8ec] ss:$56 sps:$4 sm:$0xff]  }
 0x5e1   :  { %6279 = vmatprep.subr.bf16.mxu1 %v8302_v39  ;;  %v8383_v63 = vld [vmem:[%s11533_s7 + $0xa4] ss:$56 sps:$4 sm:$0xff]   ;;  %v8378_v39 = vld [vmem:[%s11533_s7 + $0x8e8] ss:$56 sps:$4 sm:$0xff]  }
 0x5e3   :  { %6346 = vmatpush1.bf16.msra.mxu0 %v8303_v41  ;;  %v8381_v41 = vld [vmem:[%s11533_s7 + $0xa0] ss:$56 sps:$4 sm:$0xff]  }
 0x5e4   :  { %6280 = vmatpush1.bf16.msra.mxu1 %v8300_v43  ;;  %6347 = vmatprep.subr.bf16.mxu0 %v8311_v45  ;;  %v8386_v43 = vld [vmem:[%s11533_s7 + $0x95c] ss:$56 sps:$4 sm:$0xff]  }
 0x5e5   :  { %6290 = vmatprep.subr.bf16.mxu1 %v8308_v49  ;;  %v8389_v45 = vld [vmem:[%s11533_s7 + $0x114] ss:$56 sps:$4 sm:$0xff]   ;;  %v8384_v49 = vld [vmem:[%s11533_s7 + $0x958] ss:$56 sps:$4 sm:$0xff]  }
 0x5e7   :  { %6282 = vmatmul.mubr.bf16.vlgmr.msra.gmra.mrb[88].mxu1 %v9856_v14  ;;  %6348 = vmatpush1.bf16.msra.mxu0 %v8309_v60  ;;  %v8392_v60 = vld [vmem:[%s11533_s7 + $0x9cc] ss:$56 sps:$4 sm:$0xff]  }
 0x5e8   :  { %6291 = vmatpush1.bf16.msra.mxu1 %v8306_v58  ;;  %7272 = vmatprep.mubr.msk.bf16.mxu1 %vm1313_vm0, %v9975_v59  ;;  %v8395_v58 = vld [vmem:[%s11533_s7 + $0x184] ss:$56 sps:$4 sm:$0xff]  }
 0x5e9   :  { %6292 = vmatprep.subr.bf16.mxu1 %v8314_v53  ;;  %6349 = vmatprep.subr.bf16.mxu0 %v8317_v2  ;;  %v8390_v53 = vld [vmem:[%s11533_s7 + $0x9c8] ss:$56 sps:$4 sm:$0xff]  }
 0x5ea   :  { %v8393_v2 = vld [vmem:[%s11533_s7 + $0x180] ss:$56 sps:$4 sm:$0xff]  }
 0x5eb   :  { %6350 = vmatpush1.bf16.msra.mxu0 %v8315_v4  ;;  %v8398_v4 = vld [vmem:[%s11533_s7 + $0xa3c] ss:$56 sps:$4 sm:$0xff]  }
 0x5ec   :  { %6293 = vmatpush1.bf16.msra.mxu1 %v8312_v6  ;;  %6351 = vmatprep.subr.bf16.mxu0 %v8323_v11  ;;  %v8401_v6 = vld [vmem:[%s11533_s7 + $0x1f4] ss:$56 sps:$4 sm:$0xff]   ;;  %v8396_v11 = vld [vmem:[%s11533_s7 + $0xa38] ss:$56 sps:$4 sm:$0xff]  }
 0x5ed   :  { %6294 = vmatprep.subr.bf16.mxu1 %v8320_v17  ;;  %v8399_v17 = vld [vmem:[%s11533_s7 + $0x1f0] ss:$56 sps:$4 sm:$0xff]  }
 0x5ef   :  { %6352 = vmatpush1.bf16.msra.mxu0 %v8321_v57  ;;  %v8404_v57 = vld [vmem:[%s11533_s7 + $0xaac] ss:$56 sps:$4 sm:$0xff]  }
 0x5f0   :  { %6295 = vmatpush1.bf16.msra.mxu1 %v8318_v21  ;;  %6353 = vmatprep.subr.bf16.mxu0 %v8329_v23  ;;  %v8407_v21 = vld [vmem:[%s11533_s7 + $0x264] ss:$56 sps:$4 sm:$0xff]   ;;  %v8402_v23 = vld [vmem:[%s11533_s7 + $0xaa8] ss:$56 sps:$4 sm:$0xff]  }
 0x5f1   :  { %6296 = vmatprep.subr.bf16.mxu1 %v8326_v25  ;;  %v8405_v25 = vld [vmem:[%s11533_s7 + $0x260] ss:$56 sps:$4 sm:$0xff]  }
 0x5f3   :  { %6354 = vmatpush1.bf16.msra.mxu0 %v8327_v30  ;;  %v8410_v30 = vld [vmem:[%s11533_s7 + $0xb1c] ss:$56 sps:$4 sm:$0xff]  }
 0x5f4   :  { %6297 = vmatpush1.bf16.msra.mxu1 %v8324_v9  ;;  %6355 = vmatprep.subr.bf16.mxu0 %v8335_v51  ;;  %v8416_v9 = vld [vmem:[%s11533_s7 + $0xb8c] ss:$56 sps:$4 sm:$0xff]  }
 0x5f5   :  { %6298 = vmatprep.subr.bf16.mxu1 %v8332_v31  ;;  %v8413_v51 = vld [vmem:[%s11533_s7 + $0x2d4] ss:$56 sps:$4 sm:$0xff]   ;;  %v8408_v31 = vld [vmem:[%s11533_s7 + $0xb18] ss:$56 sps:$4 sm:$0xff]  }
 0x5f7   :  { %6356 = vmatpush1.bf16.msra.mxu0 %v8333_v13  ;;  %v8414_v13 = vld [vmem:[%s11533_s7 + $0xb88] ss:$56 sps:$4 sm:$0xff]  }
 0x5f8   :  { %6299 = vmatpush1.bf16.msra.mxu1 %v8330_v28  ;;  %6357 = vmatprep.subr.bf16.mxu0 %v8341_v42  ;;  %v8411_v28 = vld [vmem:[%s11533_s7 + $0x2d0] ss:$56 sps:$4 sm:$0xff]   ;;  %v5913_v42 = vand.u32 %v8416_v9, %v11710_v8 }
 0x5f9   :  { %6300 = vmatprep.subr.bf16.mxu1 %v8338_v52  ;;  %v8419_v52 = vld [vmem:[%s11533_s7 + $0x344] ss:$56 sps:$4 sm:$0xff]  }
 0x5fb   :  { %6358 = vmatpush1.bf16.msra.mxu0 %v8339_v54  ;;  %v5910_v54 = vand.u32 %v8414_v13, %v11710_v8 }
 0x5fc   :  { %6301 = vmatpush1.bf16.msra.mxu1 %v8336_v62  ;;  %6359 = vmatprep.subr.bf16.mxu0 %v8347_v56  ;;  %v8417_v62 = vld [vmem:[%s11533_s7 + $0x340] ss:$56 sps:$4 sm:$0xff]  }
 0x5fd   :  { %6302 = vmatprep.subr.bf16.mxu1 %v8344_v61  ;;  %v8422_v61 = vld [vmem:[%s11533_s7 + $0x3b4] ss:$56 sps:$4 sm:$0xff]  }
 0x5ff   :  { %6360 = vmatpush1.bf16.msra.mxu0 %v8345_v0 }
 0x600   :  { %6303 = vmatpush1.bf16.msra.mxu1 %v8342_v3  ;;  %6361 = vmatprep.subr.bf16.mxu0 %v8353_v5 }
 0x601   :  { %6304 = vmatprep.subr.bf16.mxu1 %v8350_v7  ;;  %v8420_v7 = vld [vmem:[%s11533_s7 + $0x3b0] ss:$56 sps:$4 sm:$0xff]  }
 0x603   :  { %6362 = vmatpush1.bf16.msra.mxu0 %v8351_v10  ;;  %v8425_v10 = vld [vmem:[%s11533_s7 + $0x424] ss:$56 sps:$4 sm:$0xff]  }
 0x604   :  { %6305 = vmatpush1.bf16.msra.mxu1 %v8348_v12  ;;  %6372 = vmatprep.subr.bf16.mxu0 %v8359_v15  ;;  %v8423_v12 = vld [vmem:[%s11533_s7 + $0x420] ss:$56 sps:$4 sm:$0xff]   ;;  %v8428_v15 = vld [vmem:[%s11533_s7 + $0x494] ss:$56 sps:$4 sm:$0xff]  }
 0x605   :  { %6306 = vmatprep.subr.bf16.mxu1 %v8356_v16  ;;  %v8426_v16 = vld [vmem:[%s11533_s7 + $0x490] ss:$56 sps:$4 sm:$0xff]  }
 0x606   :  { %6364 = vmatmul.mubr.bf16.vlgmr.msra.gmra.mrb[88].mxu0 %v9856_v14 }
 0x607   :  { %6373 = vmatpush1.bf16.msra.mxu0 %v8357_v18  ;;  %7273 = vmatprep.mubr.msk.bf16.mxu0 %vm1313_vm0, %v9975_v59  ;;  %v8431_v18 = vld [vmem:[%s11533_s7 + $0x504] ss:$56 sps:$4 sm:$0xff]  }
 0x608   :  { %6307 = vmatpush1.bf16.msra.mxu1 %v8354_v20  ;;  %6374 = vmatprep.subr.bf16.mxu0 %v8365_v22  ;;  %v8429_v20 = vld [vmem:[%s11533_s7 + $0x500] ss:$56 sps:$4 sm:$0xff]   ;;  %v8434_v22 = vld [vmem:[%s11533_s7 + $0x574] ss:$56 sps:$4 sm:$0xff]  }
 0x609   :  { %6308 = vmatprep.subr.bf16.mxu1 %v8362_v26  ;;  %v8432_v26 = vld [vmem:[%s11533_s7 + $0x570] ss:$56 sps:$4 sm:$0xff]  }
 0x60b   :  { %6375 = vmatpush1.bf16.msra.mxu0 %v8363_v55  ;;  %v8435_v55 = vld [vmem:[%s11533_s7 + $0x5e0] ss:$56 sps:$4 sm:$0xff]  }
 0x60c   :  { %6309 = vmatpush1.bf16.msra.mxu1 %v8360_v1  ;;  %6376 = vmatprep.subr.bf16.mxu0 %v8371_v37  ;;  %v8440_v1 = vld [vmem:[%s11533_s7 + $0x654] ss:$56 sps:$4 sm:$0xff]   ;;  %v8443_v37 = vld [vmem:[%s11533_s7 + $0x6c4] ss:$56 sps:$4 sm:$0xff]  }
 0x60d   :  { %6310 = vmatprep.subr.bf16.mxu1 %v5907_v19  ;;  %v8441_v19 = vld [vmem:[%s11533_s7 + $0x6c0] ss:$56 sps:$4 sm:$0xff]  }
 0x60e   :  { %v5996_v36 = vpop.f32.mrb[80].mxu1 }
 0x60f   :  { %6508 = vst [vmem:[%s11536_s10] sm:$0x3f] %v5996_v36  ;;  %v5998_v38 = vpop.f32.mrb[81].mxu1  ;;  %6377 = vmatpush1.bf16.msra.mxu0 %v8369_v29  ;;  %v8446_v29 = vld [vmem:[%s11533_s7 + $0x734] ss:$56 sps:$4 sm:$0xff]  }
 0x610   :  { %6509 = vst [vmem:[%s11536_s10 + $0x8] sm:$0x3f] %v5998_v38  ;;  %v6000_v44 = vpop.f32.mrb[82].mxu1  ;;  %6311 = vmatpush1.bf16.msra.mxu1 %v5904_v32  ;;  %6378 = vmatprep.subr.bf16.mxu0 %v8374_v33  ;;  %v8444_v32 = vld [vmem:[%s11533_s7 + $0x730] ss:$56 sps:$4 sm:$0xff]  }
 0x611   :  { %v6001_v50 = vpop.f32.mrb[83].mxu1  ;;  %6413 = vmatprep.subr.bf16.mxu1 %v8377_v34  ;;  %v8449_v33 = vld [vmem:[%s11533_s7 + $0x7a4] ss:$56 sps:$4 sm:$0xff]   ;;  %v8447_v34 = vld [vmem:[%s11533_s7 + $0x7a0] ss:$56 sps:$4 sm:$0xff]  }
 0x612   :  { %v8452_v36 = vld [vmem:[%s11533_s7 + $0x814] ss:$56 sps:$4 sm:$0xff]   ;;  %v8450_v38 = vld [vmem:[%s11533_s7 + $0x810] ss:$56 sps:$4 sm:$0xff]   ;;  %v8459_v50 = vld [vmem:[%s11533_s7 + $0x960] ss:$56 sps:$4 sm:$0xff]  }
 0x613   :  { %6323 = vmatmul.mubr.bf16.vlgmr.msra.gmra.mrb[88].mxu1 %v10015_v24  ;;  %6379 = vmatpush1.bf16.msra.mxu0 %v8372_v40  ;;  %v8458_v40 = vld [vmem:[%s11533_s7 + $0x8f4] ss:$56 sps:$4 sm:$0xff]   ;;  %v8456_v44 = vld [vmem:[%s11533_s7 + $0x8f0] ss:$56 sps:$4 sm:$0xff]  }
 0x614   :  { %6414 = vmatpush1.bf16.msra.mxu1 %v8375_v47  ;;  %6445 = vmatprep.mubr.bf16.mxu1 %v9851_v35  ;;  %v8387_v35 = vld [vmem:[%s11533_s7 + $0x110] ss:$56 sps:$4 sm:$0xff]   ;;  %v8461_v47 = vld [vmem:[%s11533_s7 + $0x964] ss:$56 sps:$4 sm:$0xff]  }
 0x615   :  { %6380 = vmatprep.subr.bf16.mxu0 %v8380_v48  ;;  %6415 = vmatprep.subr.bf16.mxu1 %v8383_v63  ;;  %v8464_v48 = vld [vmem:[%s11533_s7 + $0x9d4] ss:$56 sps:$4 sm:$0xff]   ;;  %v8462_v63 = vld [vmem:[%s11533_s7 + $0x9d0] ss:$56 sps:$4 sm:$0xff]  }
 0x617   :  { %6381 = vmatpush1.bf16.msra.mxu0 %v8378_v39  ;;  %v8467_v39 = vld [vmem:[%s11533_s7 + $0xa44] ss:$56 sps:$4 sm:$0xff]  }
 0x618   :  { %6416 = vmatpush1.bf16.msra.mxu1 %v8381_v41  ;;  %6382 = vmatprep.subr.bf16.mxu0 %v8386_v43  ;;  %v8465_v41 = vld [vmem:[%s11533_s7 + $0xa40] ss:$56 sps:$4 sm:$0xff]   ;;  %v8470_v43 = vld [vmem:[%s11533_s7 + $0xab4] ss:$56 sps:$4 sm:$0xff]  }
 0x619   :  { %6417 = vmatprep.subr.bf16.mxu1 %v8389_v45  ;;  %v8468_v45 = vld [vmem:[%s11533_s7 + $0xab0] ss:$56 sps:$4 sm:$0xff]  }
 0x61b   :  { %6383 = vmatpush1.bf16.msra.mxu0 %v8384_v49  ;;  %v8473_v49 = vld [vmem:[%s11533_s7 + $0xb24] ss:$56 sps:$4 sm:$0xff]  }
 0x61c   :  { %6418 = vmatpush1.bf16.msra.mxu1 %v8387_v35  ;;  %6384 = vmatprep.subr.bf16.mxu0 %v8392_v60  ;;  %v8476_v35 = vld [vmem:[%s11533_s7 + $0xb94] ss:$56 sps:$4 sm:$0xff]   ;;  %v8471_v60 = vld [vmem:[%s11533_s7 + $0xb20] ss:$56 sps:$4 sm:$0xff]  }
 0x61d   :  { %6419 = vmatprep.subr.bf16.mxu1 %v8395_v58  ;;  %v8474_v58 = vld [vmem:[%s11533_s7 + $0xb90] ss:$56 sps:$4 sm:$0xff]  }
 0x61f   :  { %6385 = vmatpush1.bf16.msra.mxu0 %v8390_v53  ;;  %v5919_v53 = vand.u32 %v8476_v35, %v11710_v8 }
 0x620   :  { %6420 = vmatpush1.bf16.msra.mxu1 %v8393_v2  ;;  %6386 = vmatprep.subr.bf16.mxu0 %v8398_v4  ;;  %v5916_v2 = vand.u32 %v8474_v58, %v11710_v8 }
 0x621   :  { %6421 = vmatprep.subr.bf16.mxu1 %v8401_v6 }
 0x623   :  { %6387 = vmatpush1.bf16.msra.mxu0 %v8396_v11 }
 0x624   :  { %6422 = vmatpush1.bf16.msra.mxu1 %v8399_v17  ;;  %6388 = vmatprep.subr.bf16.mxu0 %v8404_v57 }
 0x625   :  { %6423 = vmatprep.subr.bf16.mxu1 %v8407_v21 }
 0x627   :  { %6389 = vmatpush1.bf16.msra.mxu0 %v8402_v23 }
 0x628   :  { %6424 = vmatpush1.bf16.msra.mxu1 %v8405_v25  ;;  %6390 = vmatprep.subr.bf16.mxu0 %v8410_v30 }
 0x629   :  { %6425 = vmatprep.subr.bf16.mxu1 %v8413_v51 }
 0x62b   :  { %6391 = vmatpush1.bf16.msra.mxu0 %v8408_v31 }
 0x62c   :  { %6426 = vmatpush1.bf16.msra.mxu1 %v8411_v28  ;;  %6392 = vmatprep.subr.bf16.mxu0 %v5913_v42 }
 0x62d   :  { %v6078_v56 = vpop.f32.mrb[80].mxu0  ;;  %6427 = vmatprep.subr.bf16.mxu1 %v8419_v52 }
 0x62e   :  { %6510 = vst [vmem:[%s11536_s10 + $0x10] sm:$0x3f] %v6078_v56  ;;  %v6080_v0 = vpop.f32.mrb[81].mxu0 }
 0x62f   :  { %6511 = vst [vmem:[%s11536_s10 + $0x18] sm:$0x3f] %v6080_v0  ;;  %v6082_v3 = vpop.f32.mrb[82].mxu0  ;;  %6393 = vmatpush1.bf16.msra.mxu0 %v5910_v54 }
 0x630   :  { %6428 = vmatpush1.bf16.msra.mxu1 %v8417_v62  ;;  %v6083_v5 = vpop.f32.mrb[83].mxu0 }
 0x631   :  { %6429 = vmatprep.subr.bf16.mxu1 %v8422_v61 }
 0x632   :  { %6405 = vmatmul.mubr.bf16.vlgmr.msra.gmra.mrb[88].mxu0 %v10015_v24 }
 0x634   :  { %6430 = vmatpush1.bf16.msra.mxu1 %v8420_v7 }
 0x635   :  { %6431 = vmatprep.subr.bf16.mxu1 %v8425_v10 }
 0x638   :  { %6432 = vmatpush1.bf16.msra.mxu1 %v8423_v12 }
 0x639   :  { %6433 = vmatprep.subr.bf16.mxu1 %v8428_v15 }
 0x63c   :  { %6434 = vmatpush1.bf16.msra.mxu1 %v8426_v16 }
 0x63d   :  { %6435 = vmatprep.subr.bf16.mxu1 %v8431_v18 }
 0x640   :  { %6436 = vmatpush1.bf16.msra.mxu1 %v8429_v20 }
 0x641   :  { %6437 = vmatprep.subr.bf16.mxu1 %v8434_v22 }
 0x644   :  { %6438 = vmatpush1.bf16.msra.mxu1 %v8432_v26 }
 0x645   :  { %6439 = vmatprep.subr.bf16.mxu1 %v8437_v27 }
 0x648   :  { %6440 = vmatpush1.bf16.msra.mxu1 %v8435_v55 }
 0x649   :  { %6441 = vmatprep.subr.bf16.mxu1 %v8440_v1 }
 0x64c   :  { %6442 = vmatpush1.bf16.msra.mxu1 %v8438_v46 }
 0x64d   :  { %6443 = vmatprep.subr.bf16.mxu1 %v8443_v37 }
 0x650   :  { %6444 = vmatpush1.bf16.msra.mxu1 %v8441_v19 }
 0x651   :  { %6454 = vmatprep.subr.bf16.mxu1 %v8446_v29 }
 0x653   :  { %6446 = vmatmul.mubr.bf16.vlgmr.msra.gmra.mrb[92].mxu1 %v9856_v14  ;;  %v8455_v14 = vld [vmem:[%s11533_s7 + $0x884] ss:$56 sps:$4 sm:$0xff]  }
 0x654   :  { %6455 = vmatpush1.bf16.msra.mxu1 %v8444_v32  ;;  %7274 = vmatprep.mubr.msk.bf16.mxu1 %vm1313_vm0, %v9975_v59  ;;  %v8453_v59 = vld [vmem:[%s11533_s7 + $0x880] ss:$56 sps:$4 sm:$0xff]  }
 0x655   :  { %6456 = vmatprep.subr.bf16.mxu1 %v8449_v33 }
 0x658   :  { %6457 = vmatpush1.bf16.msra.mxu1 %v8447_v34 }
 0x659   :  { %6458 = vmatprep.subr.bf16.mxu1 %v8452_v36 }
 0x65c   :  { %6459 = vmatpush1.bf16.msra.mxu1 %v8450_v38 }
 0x65d   :  { %6460 = vmatprep.subr.bf16.mxu1 %v8455_v14 }
 0x660   :  { %6461 = vmatpush1.bf16.msra.mxu1 %v8453_v59 }
 0x661   :  { %6462 = vmatprep.subr.bf16.mxu1 %v8458_v40 }
 0x664   :  { %6463 = vmatpush1.bf16.msra.mxu1 %v8456_v44 }
 0x665   :  { %6464 = vmatprep.subr.bf16.mxu1 %v8461_v47 }
 0x668   :  { %6465 = vmatpush1.bf16.msra.mxu1 %v8459_v50 }
 0x669   :  { %6466 = vmatprep.subr.bf16.mxu1 %v8464_v48 }
 0x66c   :  { %6467 = vmatpush1.bf16.msra.mxu1 %v8462_v63 }
 0x66d   :  { %6468 = vmatprep.subr.bf16.mxu1 %v8467_v39 }
 0x670   :  { %6469 = vmatpush1.bf16.msra.mxu1 %v8465_v41 }
 0x671   :  { %6470 = vmatprep.subr.bf16.mxu1 %v8470_v43 }
 0x674   :  { %6471 = vmatpush1.bf16.msra.mxu1 %v8468_v45 }
 0x675   :  { %6472 = vmatprep.subr.bf16.mxu1 %v8473_v49 }
 0x678   :  { %6473 = vmatpush1.bf16.msra.mxu1 %v8471_v60 }
 0x679   :  { %6474 = vmatprep.subr.bf16.mxu1 %v5919_v53 }
 0x67a   :  { %v6160_v4 = vpop.f32.mrb[84].mxu1 }
 0x67b   :  { %6512 = vst [vmem:[%s11536_s10 + $0x20] sm:$0x3f] %v6160_v4  ;;  %v6162_v6 = vpop.f32.mrb[85].mxu1 }
 0x67c   :  { %6513 = vst [vmem:[%s11536_s10 + $0x28] sm:$0x3f] %v6162_v6  ;;  %v6164_v11 = vpop.f32.mrb[86].mxu1  ;;  %6475 = vmatpush1.bf16.msra.mxu1 %v5916_v2 }
 0x67d   :  { %v6165_v17 = vpop.f32.mrb[87].mxu1 }
 0x67f   :  { %6487 = vmatmul.mubr.bf16.vlgmr.msra.gmra.mrb[92].mxu1 %v10015_v24 }
 0x699   :  { %v6242_v57 = vpop.f32.mrb[84].mxu0 }
 0x69a   :  { %6514 = vst [vmem:[%s11536_s10 + $0x30] sm:$0x3f] %v6242_v57  ;;  %v6244_v8 = vpop.f32.mrb[85].mxu0 }
 0x69b   :  { %6515 = vst [vmem:[%s11536_s10 + $0x38] sm:$0x3f] %v6244_v8  ;;  %v6246_v21 = vpop.f32.mrb[86].mxu0 }
 0x69c   :  { %v6247_v23 = vpop.f32.mrb[87].mxu0 }
 0x6e6   :  { %v6324_v25 = vpop.f32.mrb[88].mxu1 }
 0x6e7   :  { %6516 = vst [vmem:[%s11536_s10 + $0x40] sm:$0x3f] %v6324_v25  ;;  %v6326_v30 = vpop.f32.mrb[89].mxu1 }
 0x6e8   :  { %6517 = vst [vmem:[%s11536_s10 + $0x48] sm:$0x3f] %v6326_v30  ;;  %v6328_v24 = vpop.f32.mrb[90].mxu1 }
 0x6e9   :  { %v6329_v9 = vpop.f32.mrb[91].mxu1 }
 0x705   :  { %v6406_v51 = vpop.f32.mrb[88].mxu0 }
 0x706   :  { %6518 = vst [vmem:[%s11536_s10 + $0x50] sm:$0x3f] %v6406_v51  ;;  %v6408_v31 = vpop.f32.mrb[89].mxu0 }
 0x707   :  { %6519 = vst [vmem:[%s11536_s10 + $0x58] sm:$0x3f] %v6408_v31  ;;  %v6410_v13 = vpop.f32.mrb[90].mxu0 }
 0x708   :  { %v6411_v28 = vpop.f32.mrb[91].mxu0 }
 0x752   :  { %v6488_v42 = vpop.f32.mrb[92].mxu1 }
 0x753   :  { %6520 = vst [vmem:[%s11536_s10 + $0x60] sm:$0x3f] %v6488_v42  ;;  %v6490_v52 = vpop.f32.mrb[93].mxu1 }
 0x754   :  { %6522 = vst.msk [vmem:[%s11536_s10 + $0x68] sm:$0x3f] %vm6521_vm7, %v6490_v52  ;;  %v6492_v54 = vpop.f32.mrb[94].mxu1 }
 0x755   :  { %v6493_v62 = vpop.f32.mrb[95].mxu1 }

</bundles_post_ra>
